<compile_context>
chip_gen: v6e
topology: v6e:2x2x1
jax: 0.10.0
libtpu: 0.0.40
codegen_flags: <defaults>
</compile_context>

<pallas_src>
import functools
import numpy as np

import jax
import jax.numpy as jnp
from jax.experimental import pallas as pl
from jax.experimental.pallas import tpu as pltpu


# ----------------------------------------------------------------------------
# Tile / grid / VMEM-budget helpers
# ----------------------------------------------------------------------------
def _pick_row_tile(M, target=1024):
    """Largest row tile (multiple of 8, <= target) dividing M; prefers >= 4 grid
    steps (>= 2 per TensorCore on v7x), then >= 2, then any divisor."""
    cands = [t for t in (1024, 512, 256, 128, 64, 32, 16, 8)
             if t <= target and M % t == 0]
    if not cands:
        return M
    for min_steps in (4, 2, 1):
        pref = [t for t in cands if M // t >= min_steps]
        if pref:
            return max(pref)
    return max(cands)


def _pick_window_batch(divisor_of, total_windows, N, max_rows=512):
    """Windows per grid step: divides `divisor_of`, keeps the block <= max_rows rows,
    prefers >= 4 grid steps (2 per v7x core), then >= 2, then 1."""
    divs = [d for d in range(1, divisor_of + 1)
            if divisor_of % d == 0 and d * N <= max_rows]
    if not divs:
        return 1
    for min_steps in (4, 2, 1):
        pref = [d for d in divs if total_windows // d >= min_steps]
        if pref:
            return max(pref)
    return max(divs)


def _vmem_params(streamed, resident=()):
    """Single 'parallel' grid axis + explicit VMEM budget.

    Budget = 2x every block (double buffering) + 4 MiB Mosaic-internal headroom,
    floored at 32 MiB (above the scoped defaults) and clamped to physical VMEM
    minus 16 MiB.  Physical VMEM is queried from hardware when possible; the
    fallback assumes the v7x 64 MiB worst case, so the 48 MiB clamp is safe on
    every generation.
    """
    def nbytes(block):
        shape, dtype = block
        return int(np.prod(shape)) * jnp.dtype(dtype).itemsize

    need = 2 * sum(nbytes(b) for b in tuple(streamed) + tuple(resident)) + (4 << 20)
    phys = 64 << 20
    try:
        phys = int(pltpu.get_tpu_info().vmem_capacity_bytes)
    except Exception:
        pass
    limit = int(min(max(need, 32 << 20), phys - (16 << 20)))
    return pltpu.CompilerParams(dimension_semantics=("parallel",),
                                vmem_limit_bytes=limit)


# ----------------------------------------------------------------------------
# Pallas kernels
# ----------------------------------------------------------------------------
def ln_qkv_kernel(x_ref, g_ref, b_ref, w_ref, wb_ref, o_ref):
    """Fused LayerNorm1 + QKV projection for a row tile of tokens.
    LN math in f32; matmul inputs bf16, f32 accumulation (MXU-native)."""
    x = x_ref[...].astype(jnp.float32)                        # (tile, C)
    mu = jnp.mean(x, axis=-1, keepdims=True)
    var = jnp.mean((x - mu) ** 2, axis=-1, keepdims=True)
    y = (x - mu) * jax.lax.rsqrt(var + 1e-5)
    y = y * g_ref[...] + b_ref[...]
    qkv = jnp.dot(y.astype(w_ref.dtype), w_ref[...],
                  preferred_element_type=jnp.float32) + wb_ref[...]
    # TODO(synk): at toy dims 3C=96 the store is still sub-128-lane; at production
    # dims 3C is a multiple of 128 so stores are already dense.
    o_ref[...] = qkv.astype(o_ref.dtype)


def _attn_math(qkv, bias, mask, num_heads, scale):
    """Attention core for a batch of windows.  qkv: (WB, N, 3C) bf16;
    bias: (H, N, N) f32; mask: (WB, N, N) f32 or None.  Returns (WB, N, C) f32."""
    WB, N, C3 = qkv.shape
    C = C3 // 3
    hd = C // num_heads
    # TODO(synk): replace the per-head lane slices + concat with a head-folded
    # (B_*num_heads, N, hd) layout and pack scores lane-dense before softmax.
    outs = []
    for h in range(num_heads):                                # static unroll over heads
        q = qkv[:, :, h * hd:(h + 1) * hd]                    # (WB, N, hd) bf16
        k = qkv[:, :, C + h * hd:C + (h + 1) * hd]
        v = qkv[:, :, 2 * C + h * hd:2 * C + (h + 1) * hd]
        s = jnp.einsum("wnd,wmd->wnm", q, k,
                       preferred_element_type=jnp.float32)    # (WB, N, N) f32
        s = s * scale + bias[h][None]
        if mask is not None:
            s = s + mask
        s = s - jnp.max(s, axis=-1, keepdims=True)
        p = jnp.exp(s)
        p = p * pl.reciprocal(jnp.sum(p, axis=-1, keepdims=True), approx=True)
        outs.append(jnp.einsum("wnm,wmd->wnd", p.astype(qkv.dtype), v,
                               preferred_element_type=jnp.float32))
    return jnp.concatenate(outs, axis=-1)                     # (WB, N, C) f32


def attn_core_kernel(qkv_ref, bias_ref, o_ref, *, num_heads, scale):
    wb, N, _ = qkv_ref.shape
    out = _attn_math(qkv_ref[...], bias_ref[...].astype(jnp.float32),
                     None, num_heads, scale)
    C = out.shape[-1]
    # lane-dense store: (1, wb, N*C) slab, last dim a multiple of 128
    o_ref[...] = out.astype(o_ref.dtype).reshape(1, wb, N * C)


def attn_core_mask_kernel(qkv_ref, bias_ref, mask_ref, o_ref, *, num_heads, scale):
    wb, N, _ = qkv_ref.shape
    nW = mask_ref.shape[0]
    nb = max(nW // wb, 1)
    # full (nW, N, N) mask stays resident in VMEM; slice this step's windows here
    start = pl.multiple_of((pl.program_id(0) % nb) * wb, wb)
    mask = mask_ref[pl.ds(start, wb)].astype(jnp.float32)
    out = _attn_math(qkv_ref[...], bias_ref[...].astype(jnp.float32),
                     mask, num_heads, scale)
    C = out.shape[-1]
    o_ref[...] = out.astype(o_ref.dtype).reshape(1, wb, N * C)


def proj_mlp_kernel(a_ref, res_ref, pw_ref, pb_ref,
                    g2_ref, b2_ref, w1_ref, b1_ref, w2_ref, wb2_ref, o_ref):
    """Fused output-proj + residual + LayerNorm2 + MLP + residual for a row tile.
    Elementwise (LN/GELU/residual) in f32, matmul inputs bf16, f32 accumulation."""
    a = a_ref[...].astype(pw_ref.dtype)                       # (tile, C) bf16 attn tokens
    r = res_ref[...].astype(jnp.float32)                      # (tile, C) f32 shortcut
    x1 = r + jnp.dot(a, pw_ref[...], preferred_element_type=jnp.float32) + pb_ref[...]

    mu = jnp.mean(x1, axis=-1, keepdims=True)
    var = jnp.mean((x1 - mu) ** 2, axis=-1, keepdims=True)
    y = (x1 - mu) * jax.lax.rsqrt(var + 1e-5)
    y = y * g2_ref[...] + b2_ref[...]

    # TODO(synk): at production dim~1024 on v7x, split the hidden (Hd) contraction
    # over a second "arbitrary" grid axis with a VMEM f32 accumulator so the bf16
    # MLP weights + row tiles stay inside 64 MiB.
    h = jnp.dot(y.astype(w1_ref.dtype), w1_ref[...],
                preferred_element_type=jnp.float32) + b1_ref[...]
    # exact (erf) GELU, matching nn.GELU default
    h = 0.5 * h * (1.0 + jax.lax.erf(h * np.float32(1.0 / np.sqrt(2.0))))
    y2 = jnp.dot(h.astype(w2_ref.dtype), w2_ref[...],
                 preferred_element_type=jnp.float32) + wb2_ref[...]

    o_ref[...] = (x1 + y2).astype(o_ref.dtype)


# ----------------------------------------------------------------------------
# Pallas wrappers
# ----------------------------------------------------------------------------
def ln_qkv(x2d, g, b, w, wb):
    M, C = x2d.shape
    C3 = w.shape[1]
    tile = _pick_row_tile(M)
    streamed = [((tile, C), x2d.dtype), ((tile, C3), w.dtype)]
    resident = [((1, C), g.dtype), ((1, C), b.dtype),
                ((C, C3), w.dtype), ((1, C3), wb.dtype)]
    return pl.pallas_call(
        ln_qkv_kernel,
        out_shape=jax.ShapeDtypeStruct((M, C3), w.dtype),     # bf16 activations out
        grid=(M // tile,),
        in_specs=[
            pl.BlockSpec((tile, C), lambda i: (i, 0)),
            pl.BlockSpec((1, C), lambda i: (0, 0)),
            pl.BlockSpec((1, C), lambda i: (0, 0)),
            pl.BlockSpec((C, C3), lambda i: (0, 0)),
            pl.BlockSpec((1, C3), lambda i: (0, 0)),
        ],
        out_specs=pl.BlockSpec((tile, C3), lambda i: (i, 0)),
        compiler_params=_vmem_params(streamed, resident),
    )(x2d, g, b, w, wb)


def window_attention_core(qkv_windows, rel_bias, mask, *, num_heads, scale):
    B_, N, C3 = qkv_windows.shape
    C = C3 // 3

    if mask is not None:
        nW = mask.shape[0]
        wb = _pick_window_batch(nW, B_, N)
        kern = functools.partial(attn_core_mask_kernel,
                                 num_heads=num_heads, scale=scale)
        in_specs = [
            pl.BlockSpec((wb, N, C3), lambda i: (i, 0, 0)),
            pl.BlockSpec((num_heads, N, N), lambda i: (0, 0, 0)),   # resident
            pl.BlockSpec((nW, N, N), lambda i: (0, 0, 0)),          # resident full mask
        ]
        args = (qkv_windows, rel_bias, mask)
        streamed = [((wb, N, C3), qkv_windows.dtype),
                    ((1, wb, N * C), qkv_windows.dtype)]
        resident = [((num_heads, N, N), rel_bias.dtype), ((nW, N, N), mask.dtype)]
    else:
        wb = _pick_window_batch(B_, B_, N)
        kern = functools.partial(attn_core_kernel,
                                 num_heads=num_heads, scale=scale)
        in_specs = [
            pl.BlockSpec((wb, N, C3), lambda i: (i, 0, 0)),
            pl.BlockSpec((num_heads, N, N), lambda i: (0, 0, 0)),
        ]
        args = (qkv_windows, rel_bias)
        streamed = [((wb, N, C3), qkv_windows.dtype),
                    ((1, wb, N * C), qkv_windows.dtype)]
        resident = [((num_heads, N, N), rel_bias.dtype)]

    G = B_ // wb
    out = pl.pallas_call(
        kern,
        # lane-dense output slab; reshaped back to (B_, N, C) below (free, contiguous)
        out_shape=jax.ShapeDtypeStruct((G, wb, N * C), qkv_windows.dtype),
        grid=(G,),
        in_specs=in_specs,
        out_specs=pl.BlockSpec((1, wb, N * C), lambda i: (i, 0, 0)),
        compiler_params=_vmem_params(streamed, resident),
    )(*args)
    return out.reshape(B_, N, C)


def proj_mlp(attn_tok, shortcut, pw, pb, g2, b2, w1, b1, w2, wb2):
    M, C = attn_tok.shape
    Hd = w1.shape[1]
    tile = _pick_row_tile(M)
    streamed = [((tile, C), attn_tok.dtype), ((tile, C), shortcut.dtype),
                ((tile, C), shortcut.dtype)]
    resident = [((C, C), pw.dtype), ((1, C), pb.dtype), ((1, C), g2.dtype),
                ((1, C), b2.dtype), ((C, Hd), w1.dtype), ((1, Hd), b1.dtype),
                ((Hd, C), w2.dtype), ((1, C), wb2.dtype)]
    return pl.pallas_call(
        proj_mlp_kernel,
        out_shape=jax.ShapeDtypeStruct((M, C), shortcut.dtype),
        grid=(M // tile,),
        in_specs=[
            pl.BlockSpec((tile, C), lambda i: (i, 0)),
            pl.BlockSpec((tile, C), lambda i: (i, 0)),
            pl.BlockSpec((C, C), lambda i: (0, 0)),
            pl.BlockSpec((1, C), lambda i: (0, 0)),
            pl.BlockSpec((1, C), lambda i: (0, 0)),
            pl.BlockSpec((1, C), lambda i: (0, 0)),
            pl.BlockSpec((C, Hd), lambda i: (0, 0)),
            pl.BlockSpec((1, Hd), lambda i: (0, 0)),
            pl.BlockSpec((Hd, C), lambda i: (0, 0)),
            pl.BlockSpec((1, C), lambda i: (0, 0)),
        ],
        out_specs=pl.BlockSpec((tile, C), lambda i: (i, 0)),
        compiler_params=_vmem_params(streamed, resident),
    )(attn_tok, shortcut, pw, pb, g2, b2, w1, b1, w2, wb2)


# ----------------------------------------------------------------------------
# Plain JAX / numpy glue (window partition, masks, rel-pos index, params)
# ----------------------------------------------------------------------------
def window_partition_jax(x, ws):
    B, H, W, C = x.shape
    x = x.reshape(B, H // ws, ws, W // ws, ws, C)
    return x.transpose(0, 1, 3, 2, 4, 5).reshape(-1, ws, ws, C)


def window_reverse_jax(windows, ws, H, W):
    B = windows.shape[0] // (H * W // ws // ws)
    x = windows.reshape(B, H // ws, W // ws, ws, ws, -1)
    return x.transpose(0, 1, 3, 2, 4, 5).reshape(B, H, W, -1)


def compute_attn_mask(H, W, ws, ss):
    Hp = int(np.ceil(H / ws)) * ws
    Wp = int(np.ceil(W / ws)) * ws
    img_mask = np.zeros((1, Hp, Wp, 1), np.float32)
    h_slices = (slice(0, -ws), slice(-ws, -ss), slice(-ss, None))
    w_slices = (slice(0, -ws), slice(-ws, -ss), slice(-ss, None))
    cnt = 0
    for h in h_slices:
        for w in w_slices:
            img_mask[:, h, w, :] = cnt
            cnt += 1
    mw = img_mask.reshape(1, Hp // ws, ws, Wp // ws, ws, 1)
    mw = mw.transpose(0, 1, 3, 2, 4, 5).reshape(-1, ws * ws)          # (nW, N)
    attn_mask = mw[:, None, :] - mw[:, :, None]
    attn_mask = np.where(attn_mask != 0, np.float32(-100.0), np.float32(0.0))
    return jnp.asarray(attn_mask)                                     # (nW, N, N)


def relative_position_index(ws):
    coords = np.stack(np.meshgrid(np.arange(ws), np.arange(ws), indexing="ij"))
    coords_flat = coords.reshape(2, -1)
    rel = coords_flat[:, :, None] - coords_flat[:, None, :]
    rel = rel.transpose(1, 2, 0).astype(np.int64)
    rel[:, :, 0] += ws - 1
    rel[:, :, 1] += ws - 1
    rel[:, :, 0] *= 2 * ws - 1
    return rel.sum(-1)                                                # (N, N)


def init_params(key, dim, depth, num_heads, window_size, mlp_ratio):
    # Weights stored in bf16 (MXU peak rate, half the HBM/VMEM footprint); biases,
    # LayerNorm params and the rel-pos table stay f32 since they enter f32 adds.
    # Accumulation is f32 everywhere, so results are numerically close to (not
    # bit-identical with) the f32 PyTorch reference.
    hidden = int(dim * mlp_ratio)
    num_rel = (2 * window_size - 1) ** 2
    bf16 = jnp.bfloat16
    blocks = []
    for _ in range(depth):
        key, k0, k1, k2, k3, k4 = jax.random.split(key, 6)
        blk = {
            "ln1_g": jnp.ones((1, dim), jnp.float32),
            "ln1_b": jnp.zeros((1, dim), jnp.float32),
            "qkv_w": (0.02 * jax.random.normal(k0, (dim, 3 * dim), jnp.float32)).astype(bf16),
            "qkv_b": jnp.zeros((1, 3 * dim), jnp.float32),
            "proj_w": (0.02 * jax.random.normal(k1, (dim, dim), jnp.float32)).astype(bf16),
            "proj_b": jnp.zeros((1, dim), jnp.float32),
            "rel_table": 0.02 * jax.random.normal(k2, (num_rel, num_heads), jnp.float32),
            "ln2_g": jnp.ones((1, dim), jnp.float32),
            "ln2_b": jnp.zeros((1, dim), jnp.float32),
            "fc1_w": (0.02 * jax.random.normal(k3, (dim, hidden), jnp.float32)).astype(bf16),
            "fc1_b": jnp.zeros((1, hidden), jnp.float32),
            "fc2_w": (0.02 * jax.random.normal(k4, (hidden, dim), jnp.float32)).astype(bf16),
            "fc2_b": jnp.zeros((1, dim), jnp.float32),
        }
        blocks.append(blk)
    return blocks


# ----------------------------------------------------------------------------
# Swin block / BasicLayer forward
# ----------------------------------------------------------------------------
def swin_block(x, H, W, shift_size, window_size, num_heads, p, attn_mask):
    B, L, C = x.shape
    ws = window_size
    N = ws * ws
    scale = (C // num_heads) ** (-0.5)

    shortcut = x

    # --- fused LN1 + QKV projection over ALL tokens (single big matmul, bf16 out) ---
    qkv = ln_qkv(x.reshape(-1, C), p["ln1_g"], p["ln1_b"],
                 p["qkv_w"], p["qkv_b"])                              # (B*L, 3C) bf16
    qkv = qkv.reshape(B, H, W, 3 * C)

    pad_r = (ws - W % ws) % ws
    pad_b = (ws - H % ws) % ws
    if pad_r > 0 or pad_b > 0:
        # padded tokens have LN output 0 in the reference -> their qkv equals the bias
        bias_row = p["qkv_b"].astype(qkv.dtype).reshape(1, 1, 1, -1)
        qkv = jnp.pad(qkv - bias_row,
                      ((0, 0), (0, pad_b), (0, pad_r), (0, 0))) + bias_row
    Hp, Wp = H + pad_b, W + pad_r

    if shift_size > 0:
        qkv = jnp.roll(qkv, shift=(-shift_size, -shift_size), axis=(1, 2))
        mask = attn_mask                                              # (nW, N, N)
    else:
        mask = None                                                   # no mask add at all

    # TODO(synk): fold window_partition/window_reverse (and the un-pad slice) into
    # kernel B's BlockSpecs (grid over (B, Hp/ws) window rows) to remove these two
    # XLA permute passes over the activation tensor at production shapes.
    qkv_windows = window_partition_jax(qkv, ws).reshape(-1, N, 3 * C)  # (B_, N, 3C)

    # gather relative position bias -> (num_heads, N, N)
    rel_idx = relative_position_index(ws)
    rel_bias = p["rel_table"][rel_idx.reshape(-1)].reshape(N, N, num_heads)
    rel_bias = jnp.transpose(rel_bias, (2, 0, 1))

    # --- attention core (window-batched, lane-dense output slab) ---
    attn_out = window_attention_core(qkv_windows, rel_bias, mask,
                                     num_heads=num_heads, scale=scale)  # (B_, N, C)

    attn_out = attn_out.reshape(-1, ws, ws, C)
    attn_full = window_reverse_jax(attn_out, ws, Hp, Wp)
    if shift_size > 0:
        attn_full = jnp.roll(attn_full, shift=(shift_size, shift_size), axis=(1, 2))
    attn_tok = attn_full[:, :H, :W, :].reshape(-1, C)                 # (B*L, C) bf16

    # --- fused output-proj + residual + LN2 + MLP + residual (f32 out) ---
    out = proj_mlp(attn_tok, shortcut.reshape(-1, C),
                   p["proj_w"], p["proj_b"], p["ln2_g"], p["ln2_b"],
                   p["fc1_w"], p["fc1_b"], p["fc2_w"], p["fc2_b"])
    return out.reshape(B, L, C)


def basic_layer_forward(x, H, W, blocks_params, window_size, num_heads):
    shift_size = window_size // 2
    attn_mask = (compute_attn_mask(H, W, window_size, shift_size)
                 if shift_size > 0 else None)
    for i, p in enumerate(blocks_params):
        ss = 0 if i % 2 == 0 else shift_size
        x = swin_block(x, H, W, ss, window_size, num_heads, p, attn_mask)
    # no downsample module -> (x, H, W, x, H, W), matching BasicLayer
    return x, H, W, x, H, W


# ----------------------------------------------------------------------------
if __name__ == "__main__":
    B, H, W = 2, 8, 8
    dim, depth, num_heads, window_size, mlp_ratio = 32, 2, 4, 4, 4.0

    key = jax.random.PRNGKey(0)
    kx, kp = jax.random.split(key)
    x = jax.random.normal(kx, (B, H * W, dim), jnp.float32)
    params = init_params(kp, dim, depth, num_heads, window_size, mlp_ratio)

    fwd = jax.jit(basic_layer_forward, static_argnums=(1, 2, 4, 5))
    out, oh, ow, x_down, wh, ww = fwd(x, H, W, params, window_size, num_heads)
    out = jax.block_until_ready(out)

    assert out.shape == (B, H * W, dim)
    assert (int(oh), int(ow), int(wh), int(ww)) == (H, W, H, W)
    assert bool(jnp.all(jnp.isfinite(out)))
    print("KERNEL_OK")
</pallas_src>

<mosaic_0001>
module attributes {stable_mosaic.version = 11 : i64} {
  func.func @ln_qkv_kernel(%arg0: i32, %arg1: memref<32x32xf32, #tpu.memory_space<vmem>>, %arg2: memref<1x32xf32, #tpu.memory_space<vmem>>, %arg3: memref<1x32xf32, #tpu.memory_space<vmem>>, %arg4: memref<32x96xbf16, #tpu.memory_space<vmem>>, %arg5: memref<1x96xf32, #tpu.memory_space<vmem>>, %arg6: memref<32x96xbf16, #tpu.memory_space<vmem>>) attributes {dimension_semantics = [#tpu.dimension_semantics<parallel>], iteration_bounds = array<i64: 4>, scalar_prefetch = 0 : i64, scratch_operands = 0 : i64, tpu.core_type = #tpu.core_type<tc>, window_params = [{transform_indices = @transform_0, window_bounds = array<i64: 32, 32>}, {pipeline_mode = #tpu.pipeline_mode<synchronous>, transform_indices = @transform_1, window_bounds = array<i64: 1, 32>}, {pipeline_mode = #tpu.pipeline_mode<synchronous>, transform_indices = @transform_2, window_bounds = array<i64: 1, 32>}, {pipeline_mode = #tpu.pipeline_mode<synchronous>, transform_indices = @transform_3, window_bounds = array<i64: 32, 96>}, {pipeline_mode = #tpu.pipeline_mode<synchronous>, transform_indices = @transform_4, window_bounds = array<i64: 1, 96>}, {transform_indices = @transform_5, window_bounds = array<i64: 32, 96>}]} {
    %c0 = arith.constant 0 : index
    %c0_0 = arith.constant 0 : index
    %0 = vector.load %arg1[%c0, %c0_0] : memref<32x32xf32, #tpu.memory_space<vmem>>, vector<32x32xf32>
    %cst = arith.constant dense<0.000000e+00> : vector<32xf32>
    %1 = vector.multi_reduction <add>, %0, %cst [1] : vector<32x32xf32> to vector<32xf32>
    %2 = vector.shape_cast %1 : vector<32xf32> to vector<32x1xf32>
    %cst_1 = arith.constant 3.200000e+01 : f32
    %3 = vector.broadcast %cst_1 : f32 to vector<32x1xf32>
    %4 = arith.divf %2, %3 : vector<32x1xf32>
    %5 = vector.broadcast %4 : vector<32x1xf32> to vector<32x32xf32>
    %6 = arith.subf %0, %5 : vector<32x32xf32>
    %7 = arith.mulf %6, %6 : vector<32x32xf32>
    %cst_2 = arith.constant dense<0.000000e+00> : vector<32xf32>
    %8 = vector.multi_reduction <add>, %7, %cst_2 [1] : vector<32x32xf32> to vector<32xf32>
    %9 = vector.shape_cast %8 : vector<32xf32> to vector<32x1xf32>
    %cst_3 = arith.constant 3.200000e+01 : f32
    %10 = vector.broadcast %cst_3 : f32 to vector<32x1xf32>
    %11 = arith.divf %9, %10 : vector<32x1xf32>
    %12 = vector.broadcast %4 : vector<32x1xf32> to vector<32x32xf32>
    %13 = arith.subf %0, %12 : vector<32x32xf32>
    %cst_4 = arith.constant 9.99999974E-6 : f32
    %14 = vector.broadcast %cst_4 : f32 to vector<32x1xf32>
    %15 = arith.addf %11, %14 : vector<32x1xf32>
    %16 = math.rsqrt %15 : vector<32x1xf32>
    %17 = vector.broadcast %16 : vector<32x1xf32> to vector<32x32xf32>
    %18 = arith.mulf %13, %17 : vector<32x32xf32>
    %c0_5 = arith.constant 0 : index
    %c0_6 = arith.constant 0 : index
    %19 = vector.load %arg2[%c0_5, %c0_6] : memref<1x32xf32, #tpu.memory_space<vmem>>, vector<1x32xf32>
    %20 = vector.broadcast %19 : vector<1x32xf32> to vector<32x32xf32>
    %21 = arith.mulf %18, %20 : vector<32x32xf32>
    %c0_7 = arith.constant 0 : index
    %c0_8 = arith.constant 0 : index
    %22 = vector.load %arg3[%c0_7, %c0_8] : memref<1x32xf32, #tpu.memory_space<vmem>>, vector<1x32xf32>
    %23 = vector.broadcast %22 : vector<1x32xf32> to vector<32x32xf32>
    %24 = arith.addf %21, %23 : vector<32x32xf32>
    %25 = arith.truncf %24 : vector<32x32xf32> to vector<32x32xbf16>
    %c0_9 = arith.constant 0 : index
    %c0_10 = arith.constant 0 : index
    %26 = vector.load %arg4[%c0_9, %c0_10] : memref<32x96xbf16, #tpu.memory_space<vmem>>, vector<32x96xbf16>
    %cst_11 = arith.constant dense<0.000000e+00> : vector<32x96xf32>
    %27 = tpu.matmul %25, %26, %cst_11 {dimension_numbers = #tpu.dot_dimension_numbers<[1], [0], [0], [1], [0, 0, 1, 1], [], []>} : vector<32x32xbf16>, vector<32x96xbf16>, vector<32x96xf32> -> vector<32x96xf32>
    %c0_12 = arith.constant 0 : index
    %c0_13 = arith.constant 0 : index
    %28 = vector.load %arg5[%c0_12, %c0_13] : memref<1x96xf32, #tpu.memory_space<vmem>>, vector<1x96xf32>
    %29 = vector.broadcast %28 : vector<1x96xf32> to vector<32x96xf32>
    %30 = arith.addf %27, %29 : vector<32x96xf32>
    %31 = arith.truncf %30 : vector<32x96xf32> to vector<32x96xbf16>
    %c0_14 = arith.constant 0 : index
    %c0_15 = arith.constant 0 : index
    %32 = vector.load %arg6[%c0_14, %c0_15] : memref<32x96xbf16, #tpu.memory_space<vmem>>, vector<32x96xbf16>
    tpu.vector_store %arg6[%c0_14, %c0_15], %31 {strides = array<i32>} : memref<32x96xbf16, #tpu.memory_space<vmem>>, vector<32x96xbf16>,
    return
  }
  func.func @transform_0(%arg0: i32) -> (i32, i32) {
    %c0_i32 = arith.constant 0 : i32
    %c0_i32_0 = arith.constant 0 : i32
    return %arg0, %c0_i32 : i32, i32
  }
  func.func @transform_1(%arg0: i32) -> (i32, i32) {
    %c0_i32 = arith.constant 0 : i32
    %c0_i32_0 = arith.constant 0 : i32
    %c0_i32_1 = arith.constant 0 : i32
    return %c0_i32, %c0_i32_0 : i32, i32
  }
  func.func @transform_2(%arg0: i32) -> (i32, i32) {
    %c0_i32 = arith.constant 0 : i32
    %c0_i32_0 = arith.constant 0 : i32
    %c0_i32_1 = arith.constant 0 : i32
    return %c0_i32, %c0_i32_0 : i32, i32
  }
  func.func @transform_3(%arg0: i32) -> (i32, i32) {
    %c0_i32 = arith.constant 0 : i32
    %c0_i32_0 = arith.constant 0 : i32
    %c0_i32_1 = arith.constant 0 : i32
    return %c0_i32, %c0_i32_0 : i32, i32
  }
  func.func @transform_4(%arg0: i32) -> (i32, i32) {
    %c0_i32 = arith.constant 0 : i32
    %c0_i32_0 = arith.constant 0 : i32
    %c0_i32_1 = arith.constant 0 : i32
    return %c0_i32, %c0_i32_0 : i32, i32
  }
  func.func @transform_5(%arg0: i32) -> (i32, i32) {
    %c0_i32 = arith.constant 0 : i32
    %c0_i32_0 = arith.constant 0 : i32
    return %arg0, %c0_i32 : i32, i32
  }
}

module attributes {stable_mosaic.version = 11 : i64} {
  func.func @attn_core_kernel(%arg0: i32, %arg1: memref<2x16x96xbf16, #tpu.memory_space<vmem>>, %arg2: memref<4x16x16xf32, #tpu.memory_space<vmem>>, %arg3: memref<1x2x512xbf16, #tpu.memory_space<vmem>>) attributes {dimension_semantics = [#tpu.dimension_semantics<parallel>], iteration_bounds = array<i64: 4>, scalar_prefetch = 0 : i64, scratch_operands = 0 : i64, tpu.core_type = #tpu.core_type<tc>, window_params = [{transform_indices = @transform_0, window_bounds = array<i64: 2, 16, 96>}, {pipeline_mode = #tpu.pipeline_mode<synchronous>, transform_indices = @transform_1, window_bounds = array<i64: 4, 16, 16>}, {transform_indices = @transform_2, window_bounds = array<i64: 1, 2, 512>}]} {
    %c0 = arith.constant 0 : index
    %c0_0 = arith.constant 0 : index
    %c0_1 = arith.constant 0 : index
    %0 = vector.load %arg1[%c0, %c0_0, %c0_1] : memref<2x16x96xbf16, #tpu.memory_space<vmem>>, vector<2x16x96xbf16>
    %c0_2 = arith.constant 0 : index
    %c0_3 = arith.constant 0 : index
    %c0_4 = arith.constant 0 : index
    %1 = vector.load %arg2[%c0_2, %c0_3, %c0_4] : memref<4x16x16xf32, #tpu.memory_space<vmem>>, vector<4x16x16xf32>
    %2 = vector.extract_strided_slice %0 {offsets = [0, 0, 0], sizes = [2, 16, 8], strides = [1, 1, 1]} : vector<2x16x96xbf16> to vector<2x16x8xbf16>
    %3 = vector.extract_strided_slice %0 {offsets = [0, 0, 32], sizes = [2, 16, 8], strides = [1, 1, 1]} : vector<2x16x96xbf16> to vector<2x16x8xbf16>
    %4 = vector.extract_strided_slice %0 {offsets = [0, 0, 64], sizes = [2, 16, 8], strides = [1, 1, 1]} : vector<2x16x96xbf16> to vector<2x16x8xbf16>
    "tpu.trace_start"() <{level = 10 : i32, message = "wnd,wmd->wnm"}> : () -> ()
    %cst = arith.constant dense<0.000000e+00> : vector<2x16x16xf32>
    %5 = tpu.matmul %2, %3, %cst {dimension_numbers = #tpu.dot_dimension_numbers<[2], [2], [1], [1], [0, 0, 0, 1, 1, 1], [0], [0]>} : vector<2x16x8xbf16>, vector<2x16x8xbf16>, vector<2x16x16xf32> -> vector<2x16x16xf32>
    "tpu.trace_stop"() : () -> ()
    %cst_5 = arith.constant 0.353553385 : f32
    %6 = vector.broadcast %cst_5 : f32 to vector<2x16x16xf32>
    %7 = arith.mulf %5, %6 : vector<2x16x16xf32>
    %8 = vector.extract_strided_slice %1 {offsets = [0, 0, 0], sizes = [1, 16, 16], strides = [1, 1, 1]} : vector<4x16x16xf32> to vector<1x16x16xf32>
    %9 = vector.shape_cast %8 : vector<1x16x16xf32> to vector<16x16xf32>
    %10 = vector.shape_cast %9 : vector<16x16xf32> to vector<1x16x16xf32>
    %11 = vector.broadcast %10 : vector<1x16x16xf32> to vector<2x16x16xf32>
    %12 = arith.addf %7, %11 : vector<2x16x16xf32>
    %cst_6 = arith.constant dense<0xFF800000> : vector<2x16xf32>
    %13 = vector.multi_reduction <maximumf>, %12, %cst_6 [2] : vector<2x16x16xf32> to vector<2x16xf32>
    %14 = vector.shape_cast %13 : vector<2x16xf32> to vector<2x16x1xf32>
    %15 = vector.broadcast %14 : vector<2x16x1xf32> to vector<2x16x16xf32>
    %16 = arith.subf %12, %15 : vector<2x16x16xf32>
    %17 = math.exp %16 : vector<2x16x16xf32>
    %cst_7 = arith.constant dense<0.000000e+00> : vector<2x16xf32>
    %18 = vector.multi_reduction <add>, %17, %cst_7 [2] : vector<2x16x16xf32> to vector<2x16xf32>
    %19 = vector.shape_cast %18 : vector<2x16xf32> to vector<2x16x1xf32>
    %20 = tpu.reciprocal %19 {approx = true} : vector<2x16x1xf32> -> vector<2x16x1xf32>
    %21 = vector.broadcast %20 : vector<2x16x1xf32> to vector<2x16x16xf32>
    %22 = arith.mulf %17, %21 : vector<2x16x16xf32>
    %23 = arith.truncf %22 : vector<2x16x16xf32> to vector<2x16x16xbf16>
    "tpu.trace_start"() <{level = 10 : i32, message = "wnm,wmd->wnd"}> : () -> ()
    %cst_8 = arith.constant dense<0.000000e+00> : vector<2x16x8xf32>
    %24 = tpu.matmul %23, %4, %cst_8 {dimension_numbers = #tpu.dot_dimension_numbers<[2], [1], [1], [2], [0, 0, 0, 1, 1, 2], [0], [0]>} : vector<2x16x16xbf16>, vector<2x16x8xbf16>, vector<2x16x8xf32> -> vector<2x16x8xf32>
    "tpu.trace_stop"() : () -> ()
    %25 = vector.extract_strided_slice %0 {offsets = [0, 0, 8], sizes = [2, 16, 8], strides = [1, 1, 1]} : vector<2x16x96xbf16> to vector<2x16x8xbf16>
    %26 = vector.extract_strided_slice %0 {offsets = [0, 0, 40], sizes = [2, 16, 8], strides = [1, 1, 1]} : vector<2x16x96xbf16> to vector<2x16x8xbf16>
    %27 = vector.extract_strided_slice %0 {offsets = [0, 0, 72], sizes = [2, 16, 8], strides = [1, 1, 1]} : vector<2x16x96xbf16> to vector<2x16x8xbf16>
    "tpu.trace_start"() <{level = 10 : i32, message = "wnd,wmd->wnm"}> : () -> ()
    %cst_9 = arith.constant dense<0.000000e+00> : vector<2x16x16xf32>
    %28 = tpu.matmul %25, %26, %cst_9 {dimension_numbers = #tpu.dot_dimension_numbers<[2], [2], [1], [1], [0, 0, 0, 1, 1, 1], [0], [0]>} : vector<2x16x8xbf16>, vector<2x16x8xbf16>, vector<2x16x16xf32> -> vector<2x16x16xf32>
    "tpu.trace_stop"() : () -> ()
    %cst_10 = arith.constant 0.353553385 : f32
    %29 = vector.broadcast %cst_10 : f32 to vector<2x16x16xf32>
    %30 = arith.mulf %28, %29 : vector<2x16x16xf32>
    %31 = vector.extract_strided_slice %1 {offsets = [1, 0, 0], sizes = [1, 16, 16], strides = [1, 1, 1]} : vector<4x16x16xf32> to vector<1x16x16xf32>
    %32 = vector.shape_cast %31 : vector<1x16x16xf32> to vector<16x16xf32>
    %33 = vector.shape_cast %32 : vector<16x16xf32> to vector<1x16x16xf32>
    %34 = vector.broadcast %33 : vector<1x16x16xf32> to vector<2x16x16xf32>
    %35 = arith.addf %30, %34 : vector<2x16x16xf32>
    %cst_11 = arith.constant dense<0xFF800000> : vector<2x16xf32>
    %36 = vector.multi_reduction <maximumf>, %35, %cst_11 [2] : vector<2x16x16xf32> to vector<2x16xf32>
    %37 = vector.shape_cast %36 : vector<2x16xf32> to vector<2x16x1xf32>
    %38 = vector.broadcast %37 : vector<2x16x1xf32> to vector<2x16x16xf32>
    %39 = arith.subf %35, %38 : vector<2x16x16xf32>
    %40 = math.exp %39 : vector<2x16x16xf32>
    %cst_12 = arith.constant dense<0.000000e+00> : vector<2x16xf32>
    %41 = vector.multi_reduction <add>, %40, %cst_12 [2] : vector<2x16x16xf32> to vector<2x16xf32>
    %42 = vector.shape_cast %41 : vector<2x16xf32> to vector<2x16x1xf32>
    %43 = tpu.reciprocal %42 {approx = true} : vector<2x16x1xf32> -> vector<2x16x1xf32>
    %44 = vector.broadcast %43 : vector<2x16x1xf32> to vector<2x16x16xf32>
    %45 = arith.mulf %40, %44 : vector<2x16x16xf32>
    %46 = arith.truncf %45 : vector<2x16x16xf32> to vector<2x16x16xbf16>
    "tpu.trace_start"() <{level = 10 : i32, message = "wnm,wmd->wnd"}> : () -> ()
    %cst_13 = arith.constant dense<0.000000e+00> : vector<2x16x8xf32>
    %47 = tpu.matmul %46, %27, %cst_13 {dimension_numbers = #tpu.dot_dimension_numbers<[2], [1], [1], [2], [0, 0, 0, 1, 1, 2], [0], [0]>} : vector<2x16x16xbf16>, vector<2x16x8xbf16>, vector<2x16x8xf32> -> vector<2x16x8xf32>
    "tpu.trace_stop"() : () -> ()
    %48 = vector.extract_strided_slice %0 {offsets = [0, 0, 16], sizes = [2, 16, 8], strides = [1, 1, 1]} : vector<2x16x96xbf16> to vector<2x16x8xbf16>
    %49 = vector.extract_strided_slice %0 {offsets = [0, 0, 48], sizes = [2, 16, 8], strides = [1, 1, 1]} : vector<2x16x96xbf16> to vector<2x16x8xbf16>
    %50 = vector.extract_strided_slice %0 {offsets = [0, 0, 80], sizes = [2, 16, 8], strides = [1, 1, 1]} : vector<2x16x96xbf16> to vector<2x16x8xbf16>
    "tpu.trace_start"() <{level = 10 : i32, message = "wnd,wmd->wnm"}> : () -> ()
    %cst_14 = arith.constant dense<0.000000e+00> : vector<2x16x16xf32>
    %51 = tpu.matmul %48, %49, %cst_14 {dimension_numbers = #tpu.dot_dimension_numbers<[2], [2], [1], [1], [0, 0, 0, 1, 1, 1], [0], [0]>} : vector<2x16x8xbf16>, vector<2x16x8xbf16>, vector<2x16x16xf32> -> vector<2x16x16xf32>
    "tpu.trace_stop"() : () -> ()
    %cst_15 = arith.constant 0.353553385 : f32
    %52 = vector.broadcast %cst_15 : f32 to vector<2x16x16xf32>
    %53 = arith.mulf %51, %52 : vector<2x16x16xf32>
    %54 = vector.extract_strided_slice %1 {offsets = [2, 0, 0], sizes = [1, 16, 16], strides = [1, 1, 1]} : vector<4x16x16xf32> to vector<1x16x16xf32>
    %55 = vector.shape_cast %54 : vector<1x16x16xf32> to vector<16x16xf32>
    %56 = vector.shape_cast %55 : vector<16x16xf32> to vector<1x16x16xf32>
    %57 = vector.broadcast %56 : vector<1x16x16xf32> to vector<2x16x16xf32>
    %58 = arith.addf %53, %57 : vector<2x16x16xf32>
    %cst_16 = arith.constant dense<0xFF800000> : vector<2x16xf32>
    %59 = vector.multi_reduction <maximumf>, %58, %cst_16 [2] : vector<2x16x16xf32> to vector<2x16xf32>
    %60 = vector.shape_cast %59 : vector<2x16xf32> to vector<2x16x1xf32>
    %61 = vector.broadcast %60 : vector<2x16x1xf32> to vector<2x16x16xf32>
    %62 = arith.subf %58, %61 : vector<2x16x16xf32>
    %63 = math.exp %62 : vector<2x16x16xf32>
    %cst_17 = arith.constant dense<0.000000e+00> : vector<2x16xf32>
    %64 = vector.multi_reduction <add>, %63, %cst_17 [2] : vector<2x16x16xf32> to vector<2x16xf32>
    %65 = vector.shape_cast %64 : vector<2x16xf32> to vector<2x16x1xf32>
    %66 = tpu.reciprocal %65 {approx = true} : vector<2x16x1xf32> -> vector<2x16x1xf32>
    %67 = vector.broadcast %66 : vector<2x16x1xf32> to vector<2x16x16xf32>
    %68 = arith.mulf %63, %67 : vector<2x16x16xf32>
    %69 = arith.truncf %68 : vector<2x16x16xf32> to vector<2x16x16xbf16>
    "tpu.trace_start"() <{level = 10 : i32, message = "wnm,wmd->wnd"}> : () -> ()
    %cst_18 = arith.constant dense<0.000000e+00> : vector<2x16x8xf32>
    %70 = tpu.matmul %69, %50, %cst_18 {dimension_numbers = #tpu.dot_dimension_numbers<[2], [1], [1], [2], [0, 0, 0, 1, 1, 2], [0], [0]>} : vector<2x16x16xbf16>, vector<2x16x8xbf16>, vector<2x16x8xf32> -> vector<2x16x8xf32>
    "tpu.trace_stop"() : () -> ()
    %71 = vector.extract_strided_slice %0 {offsets = [0, 0, 24], sizes = [2, 16, 8], strides = [1, 1, 1]} : vector<2x16x96xbf16> to vector<2x16x8xbf16>
    %72 = vector.extract_strided_slice %0 {offsets = [0, 0, 56], sizes = [2, 16, 8], strides = [1, 1, 1]} : vector<2x16x96xbf16> to vector<2x16x8xbf16>
    %73 = vector.extract_strided_slice %0 {offsets = [0, 0, 88], sizes = [2, 16, 8], strides = [1, 1, 1]} : vector<2x16x96xbf16> to vector<2x16x8xbf16>
    "tpu.trace_start"() <{level = 10 : i32, message = "wnd,wmd->wnm"}> : () -> ()
    %cst_19 = arith.constant dense<0.000000e+00> : vector<2x16x16xf32>
    %74 = tpu.matmul %71, %72, %cst_19 {dimension_numbers = #tpu.dot_dimension_numbers<[2], [2], [1], [1], [0, 0, 0, 1, 1, 1], [0], [0]>} : vector<2x16x8xbf16>, vector<2x16x8xbf16>, vector<2x16x16xf32> -> vector<2x16x16xf32>
    "tpu.trace_stop"() : () -> ()
    %cst_20 = arith.constant 0.353553385 : f32
    %75 = vector.broadcast %cst_20 : f32 to vector<2x16x16xf32>
    %76 = arith.mulf %74, %75 : vector<2x16x16xf32>
    %77 = vector.extract_strided_slice %1 {offsets = [3, 0, 0], sizes = [1, 16, 16], strides = [1, 1, 1]} : vector<4x16x16xf32> to vector<1x16x16xf32>
    %78 = vector.shape_cast %77 : vector<1x16x16xf32> to vector<16x16xf32>
    %79 = vector.shape_cast %78 : vector<16x16xf32> to vector<1x16x16xf32>
    %80 = vector.broadcast %79 : vector<1x16x16xf32> to vector<2x16x16xf32>
    %81 = arith.addf %76, %80 : vector<2x16x16xf32>
    %cst_21 = arith.constant dense<0xFF800000> : vector<2x16xf32>
    %82 = vector.multi_reduction <maximumf>, %81, %cst_21 [2] : vector<2x16x16xf32> to vector<2x16xf32>
    %83 = vector.shape_cast %82 : vector<2x16xf32> to vector<2x16x1xf32>
    %84 = vector.broadcast %83 : vector<2x16x1xf32> to vector<2x16x16xf32>
    %85 = arith.subf %81, %84 : vector<2x16x16xf32>
    %86 = math.exp %85 : vector<2x16x16xf32>
    %cst_22 = arith.constant dense<0.000000e+00> : vector<2x16xf32>
    %87 = vector.multi_reduction <add>, %86, %cst_22 [2] : vector<2x16x16xf32> to vector<2x16xf32>
    %88 = vector.shape_cast %87 : vector<2x16xf32> to vector<2x16x1xf32>
    %89 = tpu.reciprocal %88 {approx = true} : vector<2x16x1xf32> -> vector<2x16x1xf32>
    %90 = vector.broadcast %89 : vector<2x16x1xf32> to vector<2x16x16xf32>
    %91 = arith.mulf %86, %90 : vector<2x16x16xf32>
    %92 = arith.truncf %91 : vector<2x16x16xf32> to vector<2x16x16xbf16>
    "tpu.trace_start"() <{level = 10 : i32, message = "wnm,wmd->wnd"}> : () -> ()
    %cst_23 = arith.constant dense<0.000000e+00> : vector<2x16x8xf32>
    %93 = tpu.matmul %92, %73, %cst_23 {dimension_numbers = #tpu.dot_dimension_numbers<[2], [1], [1], [2], [0, 0, 0, 1, 1, 2], [0], [0]>} : vector<2x16x16xbf16>, vector<2x16x8xbf16>, vector<2x16x8xf32> -> vector<2x16x8xf32>
    "tpu.trace_stop"() : () -> ()
    %94 = tpu.concatenate %24, %47, %70, %93 in 2 : vector<2x16x8xf32>, vector<2x16x8xf32>, vector<2x16x8xf32>, vector<2x16x8xf32> -> vector<2x16x32xf32>
    %95 = arith.truncf %94 : vector<2x16x32xf32> to vector<2x16x32xbf16>
    %96 = vector.shape_cast %95 : vector<2x16x32xbf16> to vector<1x2x512xbf16>
    %c0_24 = arith.constant 0 : index
    %c0_25 = arith.constant 0 : index
    %c0_26 = arith.constant 0 : index
    %97 = vector.load %arg3[%c0_24, %c0_25, %c0_26] : memref<1x2x512xbf16, #tpu.memory_space<vmem>>, vector<1x2x512xbf16>
    tpu.vector_store %arg3[%c0_24, %c0_25, %c0_26], %96 {strides = array<i32>} : memref<1x2x512xbf16, #tpu.memory_space<vmem>>, vector<1x2x512xbf16>,
    return
  }
  func.func @transform_0(%arg0: i32) -> (i32, i32, i32) {
    %c0_i32 = arith.constant 0 : i32
    %c0_i32_0 = arith.constant 0 : i32
    %c0_i32_1 = arith.constant 0 : i32
    return %arg0, %c0_i32, %c0_i32_0 : i32, i32, i32
  }
  func.func @transform_1(%arg0: i32) -> (i32, i32, i32) {
    %c0_i32 = arith.constant 0 : i32
    %c0_i32_0 = arith.constant 0 : i32
    %c0_i32_1 = arith.constant 0 : i32
    %c0_i32_2 = arith.constant 0 : i32
    return %c0_i32, %c0_i32_0, %c0_i32_1 : i32, i32, i32
  }
  func.func @transform_2(%arg0: i32) -> (i32, i32, i32) {
    %c0_i32 = arith.constant 0 : i32
    %c0_i32_0 = arith.constant 0 : i32
    %c0_i32_1 = arith.constant 0 : i32
    return %arg0, %c0_i32, %c0_i32_0 : i32, i32, i32
  }
}

module attributes {stable_mosaic.version = 11 : i64} {
  func.func @proj_mlp_kernel(%arg0: i32, %arg1: memref<32x32xbf16, #tpu.memory_space<vmem>>, %arg2: memref<32x32xf32, #tpu.memory_space<vmem>>, %arg3: memref<32x32xbf16, #tpu.memory_space<vmem>>, %arg4: memref<1x32xf32, #tpu.memory_space<vmem>>, %arg5: memref<1x32xf32, #tpu.memory_space<vmem>>, %arg6: memref<1x32xf32, #tpu.memory_space<vmem>>, %arg7: memref<32x128xbf16, #tpu.memory_space<vmem>>, %arg8: memref<1x128xf32, #tpu.memory_space<vmem>>, %arg9: memref<128x32xbf16, #tpu.memory_space<vmem>>, %arg10: memref<1x32xf32, #tpu.memory_space<vmem>>, %arg11: memref<32x32xf32, #tpu.memory_space<vmem>>) attributes {dimension_semantics = [#tpu.dimension_semantics<parallel>], iteration_bounds = array<i64: 4>, scalar_prefetch = 0 : i64, scratch_operands = 0 : i64, tpu.core_type = #tpu.core_type<tc>, window_params = [{transform_indices = @transform_0, window_bounds = array<i64: 32, 32>}, {transform_indices = @transform_1, window_bounds = array<i64: 32, 32>}, {pipeline_mode = #tpu.pipeline_mode<synchronous>, transform_indices = @transform_2, window_bounds = array<i64: 32, 32>}, {pipeline_mode = #tpu.pipeline_mode<synchronous>, transform_indices = @transform_3, window_bounds = array<i64: 1, 32>}, {pipeline_mode = #tpu.pipeline_mode<synchronous>, transform_indices = @transform_4, window_bounds = array<i64: 1, 32>}, {pipeline_mode = #tpu.pipeline_mode<synchronous>, transform_indices = @transform_5, window_bounds = array<i64: 1, 32>}, {pipeline_mode = #tpu.pipeline_mode<synchronous>, transform_indices = @transform_6, window_bounds = array<i64: 32, 128>}, {pipeline_mode = #tpu.pipeline_mode<synchronous>, transform_indices = @transform_7, window_bounds = array<i64: 1, 128>}, {pipeline_mode = #tpu.pipeline_mode<synchronous>, transform_indices = @transform_8, window_bounds = array<i64: 128, 32>}, {pipeline_mode = #tpu.pipeline_mode<synchronous>, transform_indices = @transform_9, window_bounds = array<i64: 1, 32>}, {transform_indices = @transform_10, window_bounds = array<i64: 32, 32>}]} {
    %c0 = arith.constant 0 : index
    %c0_0 = arith.constant 0 : index
    %0 = vector.load %arg1[%c0, %c0_0] : memref<32x32xbf16, #tpu.memory_space<vmem>>, vector<32x32xbf16>
    %c0_1 = arith.constant 0 : index
    %c0_2 = arith.constant 0 : index
    %1 = vector.load %arg2[%c0_1, %c0_2] : memref<32x32xf32, #tpu.memory_space<vmem>>, vector<32x32xf32>
    %c0_3 = arith.constant 0 : index
    %c0_4 = arith.constant 0 : index
    %2 = vector.load %arg3[%c0_3, %c0_4] : memref<32x32xbf16, #tpu.memory_space<vmem>>, vector<32x32xbf16>
    %cst = arith.constant dense<0.000000e+00> : vector<32x32xf32>
    %3 = tpu.matmul %0, %2, %cst {dimension_numbers = #tpu.dot_dimension_numbers<[1], [0], [0], [1], [0, 0, 1, 1], [], []>} : vector<32x32xbf16>, vector<32x32xbf16>, vector<32x32xf32> -> vector<32x32xf32>
    %4 = arith.addf %1, %3 : vector<32x32xf32>
    %c0_5 = arith.constant 0 : index
    %c0_6 = arith.constant 0 : index
    %5 = vector.load %arg4[%c0_5, %c0_6] : memref<1x32xf32, #tpu.memory_space<vmem>>, vector<1x32xf32>
    %6 = vector.broadcast %5 : vector<1x32xf32> to vector<32x32xf32>
    %7 = arith.addf %4, %6 : vector<32x32xf32>
    %cst_7 = arith.constant dense<0.000000e+00> : vector<32xf32>
    %8 = vector.multi_reduction <add>, %7, %cst_7 [1] : vector<32x32xf32> to vector<32xf32>
    %9 = vector.shape_cast %8 : vector<32xf32> to vector<32x1xf32>
    %cst_8 = arith.constant 3.200000e+01 : f32
    %10 = vector.broadcast %cst_8 : f32 to vector<32x1xf32>
    %11 = arith.divf %9, %10 : vector<32x1xf32>
    %12 = vector.broadcast %11 : vector<32x1xf32> to vector<32x32xf32>
    %13 = arith.subf %7, %12 : vector<32x32xf32>
    %14 = arith.mulf %13, %13 : vector<32x32xf32>
    %cst_9 = arith.constant dense<0.000000e+00> : vector<32xf32>
    %15 = vector.multi_reduction <add>, %14, %cst_9 [1] : vector<32x32xf32> to vector<32xf32>
    %16 = vector.shape_cast %15 : vector<32xf32> to vector<32x1xf32>
    %cst_10 = arith.constant 3.200000e+01 : f32
    %17 = vector.broadcast %cst_10 : f32 to vector<32x1xf32>
    %18 = arith.divf %16, %17 : vector<32x1xf32>
    %19 = vector.broadcast %11 : vector<32x1xf32> to vector<32x32xf32>
    %20 = arith.subf %7, %19 : vector<32x32xf32>
    %cst_11 = arith.constant 9.99999974E-6 : f32
    %21 = vector.broadcast %cst_11 : f32 to vector<32x1xf32>
    %22 = arith.addf %18, %21 : vector<32x1xf32>
    %23 = math.rsqrt %22 : vector<32x1xf32>
    %24 = vector.broadcast %23 : vector<32x1xf32> to vector<32x32xf32>
    %25 = arith.mulf %20, %24 : vector<32x32xf32>
    %c0_12 = arith.constant 0 : index
    %c0_13 = arith.constant 0 : index
    %26 = vector.load %arg5[%c0_12, %c0_13] : memref<1x32xf32, #tpu.memory_space<vmem>>, vector<1x32xf32>
    %27 = vector.broadcast %26 : vector<1x32xf32> to vector<32x32xf32>
    %28 = arith.mulf %25, %27 : vector<32x32xf32>
    %c0_14 = arith.constant 0 : index
    %c0_15 = arith.constant 0 : index
    %29 = vector.load %arg6[%c0_14, %c0_15] : memref<1x32xf32, #tpu.memory_space<vmem>>, vector<1x32xf32>
    %30 = vector.broadcast %29 : vector<1x32xf32> to vector<32x32xf32>
    %31 = arith.addf %28, %30 : vector<32x32xf32>
    %32 = arith.truncf %31 : vector<32x32xf32> to vector<32x32xbf16>
    %c0_16 = arith.constant 0 : index
    %c0_17 = arith.constant 0 : index
    %33 = vector.load %arg7[%c0_16, %c0_17] : memref<32x128xbf16, #tpu.memory_space<vmem>>, vector<32x128xbf16>
    %cst_18 = arith.constant dense<0.000000e+00> : vector<32x128xf32>
    %34 = tpu.matmul %32, %33, %cst_18 {dimension_numbers = #tpu.dot_dimension_numbers<[1], [0], [0], [1], [0, 0, 1, 1], [], []>} : vector<32x32xbf16>, vector<32x128xbf16>, vector<32x128xf32> -> vector<32x128xf32>
    %c0_19 = arith.constant 0 : index
    %c0_20 = arith.constant 0 : index
    %35 = vector.load %arg8[%c0_19, %c0_20] : memref<1x128xf32, #tpu.memory_space<vmem>>, vector<1x128xf32>
    %36 = vector.broadcast %35 : vector<1x128xf32> to vector<32x128xf32>
    %37 = arith.addf %34, %36 : vector<32x128xf32>
    %cst_21 = arith.constant 5.000000e-01 : f32
    %38 = vector.broadcast %cst_21 : f32 to vector<32x128xf32>
    %39 = arith.mulf %38, %37 : vector<32x128xf32>
    %cst_22 = arith.constant 0.707106769 : f32
    %40 = vector.broadcast %cst_22 : f32 to vector<32x128xf32>
    %41 = arith.mulf %37, %40 : vector<32x128xf32>
    %42 = math.erf %41 : vector<32x128xf32>
    %cst_23 = arith.constant 1.000000e+00 : f32
    %43 = vector.broadcast %cst_23 : f32 to vector<32x128xf32>
    %44 = arith.addf %43, %42 : vector<32x128xf32>
    %45 = arith.mulf %39, %44 : vector<32x128xf32>
    %46 = arith.truncf %45 : vector<32x128xf32> to vector<32x128xbf16>
    %c0_24 = arith.constant 0 : index
    %c0_25 = arith.constant 0 : index
    %47 = vector.load %arg9[%c0_24, %c0_25] : memref<128x32xbf16, #tpu.memory_space<vmem>>, vector<128x32xbf16>
    %cst_26 = arith.constant dense<0.000000e+00> : vector<32x32xf32>
    %48 = tpu.matmul %46, %47, %cst_26 {dimension_numbers = #tpu.dot_dimension_numbers<[1], [0], [0], [1], [0, 0, 1, 1], [], []>} : vector<32x128xbf16>, vector<128x32xbf16>, vector<32x32xf32> -> vector<32x32xf32>
    %c0_27 = arith.constant 0 : index
    %c0_28 = arith.constant 0 : index
    %49 = vector.load %arg10[%c0_27, %c0_28] : memref<1x32xf32, #tpu.memory_space<vmem>>, vector<1x32xf32>
    %50 = vector.broadcast %49 : vector<1x32xf32> to vector<32x32xf32>
    %51 = arith.addf %48, %50 : vector<32x32xf32>
    %52 = arith.addf %7, %51 : vector<32x32xf32>
    %c0_29 = arith.constant 0 : index
    %c0_30 = arith.constant 0 : index
    %53 = vector.load %arg11[%c0_29, %c0_30] : memref<32x32xf32, #tpu.memory_space<vmem>>, vector<32x32xf32>
    tpu.vector_store %arg11[%c0_29, %c0_30], %52 {strides = array<i32>} : memref<32x32xf32, #tpu.memory_space<vmem>>, vector<32x32xf32>,
    return
  }
  func.func @transform_0(%arg0: i32) -> (i32, i32) {
    %c0_i32 = arith.constant 0 : i32
    %c0_i32_0 = arith.constant 0 : i32
    return %arg0, %c0_i32 : i32, i32
  }
  func.func @transform_1(%arg0: i32) -> (i32, i32) {
    %c0_i32 = arith.constant 0 : i32
    %c0_i32_0 = arith.constant 0 : i32
    return %arg0, %c0_i32 : i32, i32
  }
  func.func @transform_2(%arg0: i32) -> (i32, i32) {
    %c0_i32 = arith.constant 0 : i32
    %c0_i32_0 = arith.constant 0 : i32
    %c0_i32_1 = arith.constant 0 : i32
    return %c0_i32, %c0_i32_0 : i32, i32
  }
  func.func @transform_3(%arg0: i32) -> (i32, i32) {
    %c0_i32 = arith.constant 0 : i32
    %c0_i32_0 = arith.constant 0 : i32
    %c0_i32_1 = arith.constant 0 : i32
    return %c0_i32, %c0_i32_0 : i32, i32
  }
  func.func @transform_4(%arg0: i32) -> (i32, i32) {
    %c0_i32 = arith.constant 0 : i32
    %c0_i32_0 = arith.constant 0 : i32
    %c0_i32_1 = arith.constant 0 : i32
    return %c0_i32, %c0_i32_0 : i32, i32
  }
  func.func @transform_5(%arg0: i32) -> (i32, i32) {
    %c0_i32 = arith.constant 0 : i32
    %c0_i32_0 = arith.constant 0 : i32
    %c0_i32_1 = arith.constant 0 : i32
    return %c0_i32, %c0_i32_0 : i32, i32
  }
  func.func @transform_6(%arg0: i32) -> (i32, i32) {
    %c0_i32 = arith.constant 0 : i32
    %c0_i32_0 = arith.constant 0 : i32
    %c0_i32_1 = arith.constant 0 : i32
    return %c0_i32, %c0_i32_0 : i32, i32
  }
  func.func @transform_7(%arg0: i32) -> (i32, i32) {
    %c0_i32 = arith.constant 0 : i32
    %c0_i32_0 = arith.constant 0 : i32
    %c0_i32_1 = arith.constant 0 : i32
    return %c0_i32, %c0_i32_0 : i32, i32
  }
  func.func @transform_8(%arg0: i32) -> (i32, i32) {
    %c0_i32 = arith.constant 0 : i32
    %c0_i32_0 = arith.constant 0 : i32
    %c0_i32_1 = arith.constant 0 : i32
    return %c0_i32, %c0_i32_0 : i32, i32
  }
  func.func @transform_9(%arg0: i32) -> (i32, i32) {
    %c0_i32 = arith.constant 0 : i32
    %c0_i32_0 = arith.constant 0 : i32
    %c0_i32_1 = arith.constant 0 : i32
    return %c0_i32, %c0_i32_0 : i32, i32
  }
  func.func @transform_10(%arg0: i32) -> (i32, i32) {
    %c0_i32 = arith.constant 0 : i32
    %c0_i32_0 = arith.constant 0 : i32
    return %arg0, %c0_i32 : i32, i32
  }
}

module attributes {stable_mosaic.version = 11 : i64} {
  func.func @attn_core_mask_kernel(%arg0: i32, %arg1: memref<2x16x96xbf16, #tpu.memory_space<vmem>>, %arg2: memref<4x16x16xf32, #tpu.memory_space<vmem>>, %arg3: memref<4x16x16xf32, #tpu.memory_space<vmem>>, %arg4: memref<1x2x512xbf16, #tpu.memory_space<vmem>>) attributes {dimension_semantics = [#tpu.dimension_semantics<parallel>], iteration_bounds = array<i64: 4>, scalar_prefetch = 0 : i64, scratch_operands = 0 : i64, tpu.core_type = #tpu.core_type<tc>, window_params = [{transform_indices = @transform_0, window_bounds = array<i64: 2, 16, 96>}, {pipeline_mode = #tpu.pipeline_mode<synchronous>, transform_indices = @transform_1, window_bounds = array<i64: 4, 16, 16>}, {pipeline_mode = #tpu.pipeline_mode<synchronous>, transform_indices = @transform_2, window_bounds = array<i64: 4, 16, 16>}, {transform_indices = @transform_3, window_bounds = array<i64: 1, 2, 512>}]} {
    %c2_i32 = arith.constant 2 : i32
    %c0_i32 = arith.constant 0 : i32
    %0 = arith.cmpi eq, %c2_i32, %c0_i32 : i32
    %c1_i32 = arith.constant 1 : i32
    %1 = arith.select %0, %c1_i32, %c2_i32 : i32
    %2 = arith.remsi %arg0, %1 : i32
    %c0_i32_0 = arith.constant 0 : i32
    %3 = arith.cmpi ne, %2, %c0_i32_0 : i32
    %c0_i32_1 = arith.constant 0 : i32
    %4 = arith.cmpi slt, %2, %c0_i32_1 : i32
    %c0_i32_2 = arith.constant 0 : i32
    %5 = arith.cmpi slt, %1, %c0_i32_2 : i32
    %6 = arith.xori %4, %5 : i1
    %7 = arith.andi %6, %3 : i1
    %8 = arith.addi %2, %1 : i32
    %9 = arith.select %7, %8, %2 : i32
    %c2_i32_3 = arith.constant 2 : i32
    %10 = arith.muli %9, %c2_i32_3 : i32
    %11 = tpu.assume_multiple %10, 2 : i32
    %12 = arith.index_cast %11 : i32 to index
    %c0 = arith.constant 0 : index
    %c0_4 = arith.constant 0 : index
    %13 = vector.load %arg3[%12, %c0, %c0_4] : memref<4x16x16xf32, #tpu.memory_space<vmem>>, vector<2x16x16xf32>
    %c0_5 = arith.constant 0 : index
    %c0_6 = arith.constant 0 : index
    %c0_7 = arith.constant 0 : index
    %14 = vector.load %arg1[%c0_5, %c0_6, %c0_7] : memref<2x16x96xbf16, #tpu.memory_space<vmem>>, vector<2x16x96xbf16>
    %c0_8 = arith.constant 0 : index
    %c0_9 = arith.constant 0 : index
    %c0_10 = arith.constant 0 : index
    %15 = vector.load %arg2[%c0_8, %c0_9, %c0_10] : memref<4x16x16xf32, #tpu.memory_space<vmem>>, vector<4x16x16xf32>
    %16 = vector.extract_strided_slice %14 {offsets = [0, 0, 0], sizes = [2, 16, 8], strides = [1, 1, 1]} : vector<2x16x96xbf16> to vector<2x16x8xbf16>
    %17 = vector.extract_strided_slice %14 {offsets = [0, 0, 32], sizes = [2, 16, 8], strides = [1, 1, 1]} : vector<2x16x96xbf16> to vector<2x16x8xbf16>
    %18 = vector.extract_strided_slice %14 {offsets = [0, 0, 64], sizes = [2, 16, 8], strides = [1, 1, 1]} : vector<2x16x96xbf16> to vector<2x16x8xbf16>
    "tpu.trace_start"() <{level = 10 : i32, message = "wnd,wmd->wnm"}> : () -> ()
    %cst = arith.constant dense<0.000000e+00> : vector<2x16x16xf32>
    %19 = tpu.matmul %16, %17, %cst {dimension_numbers = #tpu.dot_dimension_numbers<[2], [2], [1], [1], [0, 0, 0, 1, 1, 1], [0], [0]>} : vector<2x16x8xbf16>, vector<2x16x8xbf16>, vector<2x16x16xf32> -> vector<2x16x16xf32>
    "tpu.trace_stop"() : () -> ()
    %cst_11 = arith.constant 0.353553385 : f32
    %20 = vector.broadcast %cst_11 : f32 to vector<2x16x16xf32>
    %21 = arith.mulf %19, %20 : vector<2x16x16xf32>
    %22 = vector.extract_strided_slice %15 {offsets = [0, 0, 0], sizes = [1, 16, 16], strides = [1, 1, 1]} : vector<4x16x16xf32> to vector<1x16x16xf32>
    %23 = vector.shape_cast %22 : vector<1x16x16xf32> to vector<16x16xf32>
    %24 = vector.shape_cast %23 : vector<16x16xf32> to vector<1x16x16xf32>
    %25 = vector.broadcast %24 : vector<1x16x16xf32> to vector<2x16x16xf32>
    %26 = arith.addf %21, %25 : vector<2x16x16xf32>
    %27 = arith.addf %26, %13 : vector<2x16x16xf32>
    %cst_12 = arith.constant dense<0xFF800000> : vector<2x16xf32>
    %28 = vector.multi_reduction <maximumf>, %27, %cst_12 [2] : vector<2x16x16xf32> to vector<2x16xf32>
    %29 = vector.shape_cast %28 : vector<2x16xf32> to vector<2x16x1xf32>
    %30 = vector.broadcast %29 : vector<2x16x1xf32> to vector<2x16x16xf32>
    %31 = arith.subf %27, %30 : vector<2x16x16xf32>
    %32 = math.exp %31 : vector<2x16x16xf32>
    %cst_13 = arith.constant dense<0.000000e+00> : vector<2x16xf32>
    %33 = vector.multi_reduction <add>, %32, %cst_13 [2] : vector<2x16x16xf32> to vector<2x16xf32>
    %34 = vector.shape_cast %33 : vector<2x16xf32> to vector<2x16x1xf32>
    %35 = tpu.reciprocal %34 {approx = true} : vector<2x16x1xf32> -> vector<2x16x1xf32>
    %36 = vector.broadcast %35 : vector<2x16x1xf32> to vector<2x16x16xf32>
    %37 = arith.mulf %32, %36 : vector<2x16x16xf32>
    %38 = arith.truncf %37 : vector<2x16x16xf32> to vector<2x16x16xbf16>
    "tpu.trace_start"() <{level = 10 : i32, message = "wnm,wmd->wnd"}> : () -> ()
    %cst_14 = arith.constant dense<0.000000e+00> : vector<2x16x8xf32>
    %39 = tpu.matmul %38, %18, %cst_14 {dimension_numbers = #tpu.dot_dimension_numbers<[2], [1], [1], [2], [0, 0, 0, 1, 1, 2], [0], [0]>} : vector<2x16x16xbf16>, vector<2x16x8xbf16>, vector<2x16x8xf32> -> vector<2x16x8xf32>
    "tpu.trace_stop"() : () -> ()
    %40 = vector.extract_strided_slice %14 {offsets = [0, 0, 8], sizes = [2, 16, 8], strides = [1, 1, 1]} : vector<2x16x96xbf16> to vector<2x16x8xbf16>
    %41 = vector.extract_strided_slice %14 {offsets = [0, 0, 40], sizes = [2, 16, 8], strides = [1, 1, 1]} : vector<2x16x96xbf16> to vector<2x16x8xbf16>
    %42 = vector.extract_strided_slice %14 {offsets = [0, 0, 72], sizes = [2, 16, 8], strides = [1, 1, 1]} : vector<2x16x96xbf16> to vector<2x16x8xbf16>
    "tpu.trace_start"() <{level = 10 : i32, message = "wnd,wmd->wnm"}> : () -> ()
    %cst_15 = arith.constant dense<0.000000e+00> : vector<2x16x16xf32>
    %43 = tpu.matmul %40, %41, %cst_15 {dimension_numbers = #tpu.dot_dimension_numbers<[2], [2], [1], [1], [0, 0, 0, 1, 1, 1], [0], [0]>} : vector<2x16x8xbf16>, vector<2x16x8xbf16>, vector<2x16x16xf32> -> vector<2x16x16xf32>
    "tpu.trace_stop"() : () -> ()
    %cst_16 = arith.constant 0.353553385 : f32
    %44 = vector.broadcast %cst_16 : f32 to vector<2x16x16xf32>
    %45 = arith.mulf %43, %44 : vector<2x16x16xf32>
    %46 = vector.extract_strided_slice %15 {offsets = [1, 0, 0], sizes = [1, 16, 16], strides = [1, 1, 1]} : vector<4x16x16xf32> to vector<1x16x16xf32>
    %47 = vector.shape_cast %46 : vector<1x16x16xf32> to vector<16x16xf32>
    %48 = vector.shape_cast %47 : vector<16x16xf32> to vector<1x16x16xf32>
    %49 = vector.broadcast %48 : vector<1x16x16xf32> to vector<2x16x16xf32>
    %50 = arith.addf %45, %49 : vector<2x16x16xf32>
    %51 = arith.addf %50, %13 : vector<2x16x16xf32>
    %cst_17 = arith.constant dense<0xFF800000> : vector<2x16xf32>
    %52 = vector.multi_reduction <maximumf>, %51, %cst_17 [2] : vector<2x16x16xf32> to vector<2x16xf32>
    %53 = vector.shape_cast %52 : vector<2x16xf32> to vector<2x16x1xf32>
    %54 = vector.broadcast %53 : vector<2x16x1xf32> to vector<2x16x16xf32>
    %55 = arith.subf %51, %54 : vector<2x16x16xf32>
    %56 = math.exp %55 : vector<2x16x16xf32>
    %cst_18 = arith.constant dense<0.000000e+00> : vector<2x16xf32>
    %57 = vector.multi_reduction <add>, %56, %cst_18 [2] : vector<2x16x16xf32> to vector<2x16xf32>
    %58 = vector.shape_cast %57 : vector<2x16xf32> to vector<2x16x1xf32>
    %59 = tpu.reciprocal %58 {approx = true} : vector<2x16x1xf32> -> vector<2x16x1xf32>
    %60 = vector.broadcast %59 : vector<2x16x1xf32> to vector<2x16x16xf32>
    %61 = arith.mulf %56, %60 : vector<2x16x16xf32>
    %62 = arith.truncf %61 : vector<2x16x16xf32> to vector<2x16x16xbf16>
    "tpu.trace_start"() <{level = 10 : i32, message = "wnm,wmd->wnd"}> : () -> ()
    %cst_19 = arith.constant dense<0.000000e+00> : vector<2x16x8xf32>
    %63 = tpu.matmul %62, %42, %cst_19 {dimension_numbers = #tpu.dot_dimension_numbers<[2], [1], [1], [2], [0, 0, 0, 1, 1, 2], [0], [0]>} : vector<2x16x16xbf16>, vector<2x16x8xbf16>, vector<2x16x8xf32> -> vector<2x16x8xf32>
    "tpu.trace_stop"() : () -> ()
    %64 = vector.extract_strided_slice %14 {offsets = [0, 0, 16], sizes = [2, 16, 8], strides = [1, 1, 1]} : vector<2x16x96xbf16> to vector<2x16x8xbf16>
    %65 = vector.extract_strided_slice %14 {offsets = [0, 0, 48], sizes = [2, 16, 8], strides = [1, 1, 1]} : vector<2x16x96xbf16> to vector<2x16x8xbf16>
    %66 = vector.extract_strided_slice %14 {offsets = [0, 0, 80], sizes = [2, 16, 8], strides = [1, 1, 1]} : vector<2x16x96xbf16> to vector<2x16x8xbf16>
    "tpu.trace_start"() <{level = 10 : i32, message = "wnd,wmd->wnm"}> : () -> ()
    %cst_20 = arith.constant dense<0.000000e+00> : vector<2x16x16xf32>
    %67 = tpu.matmul %64, %65, %cst_20 {dimension_numbers = #tpu.dot_dimension_numbers<[2], [2], [1], [1], [0, 0, 0, 1, 1, 1], [0], [0]>} : vector<2x16x8xbf16>, vector<2x16x8xbf16>, vector<2x16x16xf32> -> vector<2x16x16xf32>
    "tpu.trace_stop"() : () -> ()
    %cst_21 = arith.constant 0.353553385 : f32
    %68 = vector.broadcast %cst_21 : f32 to vector<2x16x16xf32>
    %69 = arith.mulf %67, %68 : vector<2x16x16xf32>
    %70 = vector.extract_strided_slice %15 {offsets = [2, 0, 0], sizes = [1, 16, 16], strides = [1, 1, 1]} : vector<4x16x16xf32> to vector<1x16x16xf32>
    %71 = vector.shape_cast %70 : vector<1x16x16xf32> to vector<16x16xf32>
    %72 = vector.shape_cast %71 : vector<16x16xf32> to vector<1x16x16xf32>
    %73 = vector.broadcast %72 : vector<1x16x16xf32> to vector<2x16x16xf32>
    %74 = arith.addf %69, %73 : vector<2x16x16xf32>
    %75 = arith.addf %74, %13 : vector<2x16x16xf32>
    %cst_22 = arith.constant dense<0xFF800000> : vector<2x16xf32>
    %76 = vector.multi_reduction <maximumf>, %75, %cst_22 [2] : vector<2x16x16xf32> to vector<2x16xf32>
    %77 = vector.shape_cast %76 : vector<2x16xf32> to vector<2x16x1xf32>
    %78 = vector.broadcast %77 : vector<2x16x1xf32> to vector<2x16x16xf32>
    %79 = arith.subf %75, %78 : vector<2x16x16xf32>
    %80 = math.exp %79 : vector<2x16x16xf32>
    %cst_23 = arith.constant dense<0.000000e+00> : vector<2x16xf32>
    %81 = vector.multi_reduction <add>, %80, %cst_23 [2] : vector<2x16x16xf32> to vector<2x16xf32>
    %82 = vector.shape_cast %81 : vector<2x16xf32> to vector<2x16x1xf32>
    %83 = tpu.reciprocal %82 {approx = true} : vector<2x16x1xf32> -> vector<2x16x1xf32>
    %84 = vector.broadcast %83 : vector<2x16x1xf32> to vector<2x16x16xf32>
    %85 = arith.mulf %80, %84 : vector<2x16x16xf32>
    %86 = arith.truncf %85 : vector<2x16x16xf32> to vector<2x16x16xbf16>
    "tpu.trace_start"() <{level = 10 : i32, message = "wnm,wmd->wnd"}> : () -> ()
    %cst_24 = arith.constant dense<0.000000e+00> : vector<2x16x8xf32>
    %87 = tpu.matmul %86, %66, %cst_24 {dimension_numbers = #tpu.dot_dimension_numbers<[2], [1], [1], [2], [0, 0, 0, 1, 1, 2], [0], [0]>} : vector<2x16x16xbf16>, vector<2x16x8xbf16>, vector<2x16x8xf32> -> vector<2x16x8xf32>
    "tpu.trace_stop"() : () -> ()
    %88 = vector.extract_strided_slice %14 {offsets = [0, 0, 24], sizes = [2, 16, 8], strides = [1, 1, 1]} : vector<2x16x96xbf16> to vector<2x16x8xbf16>
    %89 = vector.extract_strided_slice %14 {offsets = [0, 0, 56], sizes = [2, 16, 8], strides = [1, 1, 1]} : vector<2x16x96xbf16> to vector<2x16x8xbf16>
    %90 = vector.extract_strided_slice %14 {offsets = [0, 0, 88], sizes = [2, 16, 8], strides = [1, 1, 1]} : vector<2x16x96xbf16> to vector<2x16x8xbf16>
    "tpu.trace_start"() <{level = 10 : i32, message = "wnd,wmd->wnm"}> : () -> ()
    %cst_25 = arith.constant dense<0.000000e+00> : vector<2x16x16xf32>
    %91 = tpu.matmul %88, %89, %cst_25 {dimension_numbers = #tpu.dot_dimension_numbers<[2], [2], [1], [1], [0, 0, 0, 1, 1, 1], [0], [0]>} : vector<2x16x8xbf16>, vector<2x16x8xbf16>, vector<2x16x16xf32> -> vector<2x16x16xf32>
    "tpu.trace_stop"() : () -> ()
    %cst_26 = arith.constant 0.353553385 : f32
    %92 = vector.broadcast %cst_26 : f32 to vector<2x16x16xf32>
    %93 = arith.mulf %91, %92 : vector<2x16x16xf32>
    %94 = vector.extract_strided_slice %15 {offsets = [3, 0, 0], sizes = [1, 16, 16], strides = [1, 1, 1]} : vector<4x16x16xf32> to vector<1x16x16xf32>
    %95 = vector.shape_cast %94 : vector<1x16x16xf32> to vector<16x16xf32>
    %96 = vector.shape_cast %95 : vector<16x16xf32> to vector<1x16x16xf32>
    %97 = vector.broadcast %96 : vector<1x16x16xf32> to vector<2x16x16xf32>
    %98 = arith.addf %93, %97 : vector<2x16x16xf32>
    %99 = arith.addf %98, %13 : vector<2x16x16xf32>
    %cst_27 = arith.constant dense<0xFF800000> : vector<2x16xf32>
    %100 = vector.multi_reduction <maximumf>, %99, %cst_27 [2] : vector<2x16x16xf32> to vector<2x16xf32>
    %101 = vector.shape_cast %100 : vector<2x16xf32> to vector<2x16x1xf32>
    %102 = vector.broadcast %101 : vector<2x16x1xf32> to vector<2x16x16xf32>
    %103 = arith.subf %99, %102 : vector<2x16x16xf32>
    %104 = math.exp %103 : vector<2x16x16xf32>
    %cst_28 = arith.constant dense<0.000000e+00> : vector<2x16xf32>
    %105 = vector.multi_reduction <add>, %104, %cst_28 [2] : vector<2x16x16xf32> to vector<2x16xf32>
    %106 = vector.shape_cast %105 : vector<2x16xf32> to vector<2x16x1xf32>
    %107 = tpu.reciprocal %106 {approx = true} : vector<2x16x1xf32> -> vector<2x16x1xf32>
    %108 = vector.broadcast %107 : vector<2x16x1xf32> to vector<2x16x16xf32>
    %109 = arith.mulf %104, %108 : vector<2x16x16xf32>
    %110 = arith.truncf %109 : vector<2x16x16xf32> to vector<2x16x16xbf16>
    "tpu.trace_start"() <{level = 10 : i32, message = "wnm,wmd->wnd"}> : () -> ()
    %cst_29 = arith.constant dense<0.000000e+00> : vector<2x16x8xf32>
    %111 = tpu.matmul %110, %90, %cst_29 {dimension_numbers = #tpu.dot_dimension_numbers<[2], [1], [1], [2], [0, 0, 0, 1, 1, 2], [0], [0]>} : vector<2x16x16xbf16>, vector<2x16x8xbf16>, vector<2x16x8xf32> -> vector<2x16x8xf32>
    "tpu.trace_stop"() : () -> ()
    %112 = tpu.concatenate %39, %63, %87, %111 in 2 : vector<2x16x8xf32>, vector<2x16x8xf32>, vector<2x16x8xf32>, vector<2x16x8xf32> -> vector<2x16x32xf32>
    %113 = arith.truncf %112 : vector<2x16x32xf32> to vector<2x16x32xbf16>
    %114 = vector.shape_cast %113 : vector<2x16x32xbf16> to vector<1x2x512xbf16>
    %c0_30 = arith.constant 0 : index
    %c0_31 = arith.constant 0 : index
    %c0_32 = arith.constant 0 : index
    %115 = vector.load %arg4[%c0_30, %c0_31, %c0_32] : memref<1x2x512xbf16, #tpu.memory_space<vmem>>, vector<1x2x512xbf16>
    tpu.vector_store %arg4[%c0_30, %c0_31, %c0_32], %114 {strides = array<i32>} : memref<1x2x512xbf16, #tpu.memory_space<vmem>>, vector<1x2x512xbf16>,
    return
  }
  func.func @transform_0(%arg0: i32) -> (i32, i32, i32) {
    %c0_i32 = arith.constant 0 : i32
    %c0_i32_0 = arith.constant 0 : i32
    %c0_i32_1 = arith.constant 0 : i32
    return %arg0, %c0_i32, %c0_i32_0 : i32, i32, i32
  }
  func.func @transform_1(%arg0: i32) -> (i32, i32, i32) {
    %c0_i32 = arith.constant 0 : i32
    %c0_i32_0 = arith.constant 0 : i32
    %c0_i32_1 = arith.constant 0 : i32
    %c0_i32_2 = arith.constant 0 : i32
    return %c0_i32, %c0_i32_0, %c0_i32_1 : i32, i32, i32
  }
  func.func @transform_2(%arg0: i32) -> (i32, i32, i32) {
    %c0_i32 = arith.constant 0 : i32
    %c0_i32_0 = arith.constant 0 : i32
    %c0_i32_1 = arith.constant 0 : i32
    %c0_i32_2 = arith.constant 0 : i32
    return %c0_i32, %c0_i32_0, %c0_i32_1 : i32, i32, i32
  }
  func.func @transform_3(%arg0: i32) -> (i32, i32, i32) {
    %c0_i32 = arith.constant 0 : i32
    %c0_i32_0 = arith.constant 0 : i32
    %c0_i32_1 = arith.constant 0 : i32
    return %arg0, %c0_i32, %c0_i32_0 : i32, i32, i32
  }
}

</mosaic_0001>

<bundles_post_ra>
// kernel: basic_layer_forward.6
= control target key start
LH: loop header
LB: loop body
LE: loop exit
PB: predicated region body
PF: predicated region fallthrough
CT: control target
= control target key end

     0   :  { %s560_s18 = smov 0   ;;  %s606_s0 = inlined_call_operand.vmem [shape: f32[128,32], index: 0, kind: input, shape index: {}]   ;;  %s607_s1 = inlined_call_operand.vmem [shape: f32[1,32], index: 1, kind: input, shape index: {}]   ;;  %s608_s2 = inlined_call_operand.vmem [shape: f32[1,32], index: 2, kind: input, shape index: {}]   ;;  %s609_s3 = inlined_call_operand.vmem [shape: bf16[32,96], index: 3, kind: input, shape index: {}]   ;;  %s610_s4 = inlined_call_operand.vmem [shape: f32[1,96], index: 4, kind: input, shape index: {}]   ;;  %s611_s5 = inlined_call_operand.vmem [shape: bf16[128,96], index: 5, kind: output, shape index: {}]  }
   0x1 LB: > { %s466_s19 = sadd.s32 4294967295, %s528_s18   ;;  %p470_p0 = scmp.ge.s32.totalorder %s528_s18, 1  ;;  %s528_s18 = sphi %s560_s18, %s15_s18  }
   0x2   : > { %p188_p1 = scmp.lt.s32.totalorder %s528_s18, 5 }
   0x4   : > { %p189_p2 = pnand %p470_p0, %p188_p1 }
   0x5   : > { %s471_s20 = sshll.u32 (!%p189_p2), %s466_s19, 2 }
   0x6   : > { %192 = sbr.rel (%p189_p2) target bundleno = 537 (0x219), region = 40  ;;  %p217_p3 = scmp.lt.s32.totalorder (!%p189_p2), %s471_s20, 15 }
   0xb   : > { %s613_s20 = smov (!%p217_p3, %s471_s20), 15  ;;  %vm233_vm0 = vcmask 261120   ;;  %v512_v28 = vld [vmem:[%s609_s3 + $0x8] sm:$0xff]   ;;  %v513_v29 = vld [vmem:[%s609_s3] sm:$0xff]   ;;  %vm405_vm1 = vcmask 781312  }
   0xc   : > { %s472_s21 = sshll.u32 %s613_s20, 3  ;;  %496 = vmatprep.subr.bf16.mxu0 %v512_v28  ;;  %v475_v44 = vld [vmem:[%s607_s1] ss:$0 sm:$0xff]  ;;  %s474_s10 = sshll.u32 %s613_s20, 2 }
   0xd   : > { %s220_s24 = scalar_lea.vmem %s606_s0, %s472_s21  ;;  %497 = vmatpush3.bf16.msra.mxu0 %v512_v28  ;;  %v476_v49 = vld [vmem:[%s608_s2] ss:$0 sm:$0xff]  ;;  %s226_s13 = scalar_lea.vmem %s611_s5, %s474_s10 }
   0xe   : > { %v229_v0 = vld [vmem:[%s220_s24] sm:$0xff]  ;;  %v231_v1 = vld [vmem:[%s220_s24 + $0x10] sm:$0xff]  ;;  %v230_v2 = vld [vmem:[%s220_s24 + $0x8] sm:$0xff]  ;;  %498 = vmatprep.subr.bf16.mxu0 %v513_v29 }
   0xf   : > { %v234_v3 = vsel %vm233_vm0, %v229_v0, 0.0  ;;  %v240_v4 = vsel %vm233_vm0, %v231_v1, 0.0  ;;  %v232_v5 = vld [vmem:[%s220_s24 + $0x18] sm:$0xff]  ;;  %v237_v6 = vsel %vm233_vm0, %v230_v2, 0.0  ;;  %v477_v62 = vld [vmem:[%s610_s4] ss:$0 sm:$0xff] }
  0x10   : > { %235 = vadd.xlane.f32.xlu0 %v234_v3  ;;  %241 = vadd.xlane.f32.xlu1 %v240_v4  ;;  %v243_v7 = vsel %vm233_vm0, %v232_v5, 0.0 }
  0x11   : > { %499 = vmatpush3.bf16.msra.mxu0 %v513_v29 }
  0x14   : > { %238 = vadd.xlane.f32.xlu0 %v237_v6  ;;  %244 = vadd.xlane.f32.xlu1 %v243_v7 }
  0x99   : > { %v236_v8 = vpop.xlane.xlu0 %235  ;;  %v242_v9 = vpop.xlane.xlu1 %241 }
  0x9a   : > { %v247_v10 = vmul.f32 0.03125, %v236_v8  ;;  %v249_v11 = vmul.f32 0.03125, %v242_v9 }
  0x9c   : > { %v251_v12 = vsub.f32 %v229_v0, %v247_v10  ;;  %v253_v13 = vsub.f32 %v231_v1, %v249_v11 }
  0x9d   : > { %v239_v14 = vpop.xlane.xlu0 %238  ;;  %v245_v15 = vpop.xlane.xlu1 %244 }
  0x9e   : > { %v248_v16 = vmul.f32 0.03125, %v239_v14  ;;  %v250_v17 = vmul.f32 0.03125, %v245_v15  ;;  %v255_v18 = vmul.f32 %v251_v12, %v251_v12  ;;  %v257_v19 = vmul.f32 %v253_v13, %v253_v13 }
  0xa0   : > { %v252_v20 = vsub.f32 %v230_v2, %v248_v16  ;;  %v254_v21 = vsub.f32 %v232_v5, %v250_v17  ;;  %v259_v22 = vsel %vm233_vm0, %v255_v18, 0.0  ;;  %v265_v23 = vsel %vm233_vm0, %v257_v19, 0.0 }
  0xa1   : > { %260 = vadd.xlane.f32.xlu0 %v259_v22 }
  0xa2   : > { %v256_v24 = vmul.f32 %v252_v20, %v252_v20  ;;  %v258_v25 = vmul.f32 %v254_v21, %v254_v21 }
  0xa4   : > { %v262_v26 = vsel %vm233_vm0, %v256_v24, 0.0  ;;  %v268_v27 = vsel %vm233_vm0, %v258_v25, 0.0 }
  0xa5   : > { %266 = vadd.xlane.f32.xlu0 %v265_v23  ;;  %263 = vadd.xlane.f32.xlu1 %v262_v26 }
  0xa9   : > { %269 = vadd.xlane.f32.xlu1 %v268_v27 }
 0x12a   : > { %v261_v30 = vpop.xlane.xlu0 %260 }
 0x12b   : > { %v271_v31 = vmul.f32 0.03125, %v261_v30 }
 0x12d   : > { %v275_v32 = vadd.f32 1e-05, %v271_v31 }
 0x12e   : > { %v264_v33 = vpop.xlane.xlu1 %263  ;;  %v267_v34 = vpop.xlane.xlu0 %266 }
 0x12f   : > { %514 = vrsqrt.f32 %v275_v32  ;;  %v272_v35 = vmul.f32 0.03125, %v264_v33  ;;  %v273_v36 = vmul.f32 0.03125, %v267_v34 }
 0x131   : > { %v276_v37 = vadd.f32 1e-05, %v272_v35  ;;  %v277_v38 = vadd.f32 1e-05, %v273_v36 }
 0x132   : > { %v270_v39 = vpop.xlane.xlu1 %269 }
 0x133   : > { %516 = vrsqrt.f32 %v276_v37  ;;  %v274_v40 = vmul.f32 0.03125, %v270_v39 }
 0x134   : > { %518 = vrsqrt.f32 %v277_v38 }
 0x135   : > { %v278_v41 = vadd.f32 1e-05, %v274_v40 }
 0x137   : > { %520 = vrsqrt.f32 %v278_v41 }
 0x13c   : > { %v515_v42 = vpop.eup %514 }
 0x13d   : > { %v283_v43 = vmul.f32 %v515_v42, %v251_v12 }
 0x13f   : > { %v294_v48 = vmul.f32 %v475_v44, %v283_v43 }
 0x140   : > { %v517_v45 = vpop.eup %516 }
 0x141   : > { %v519_v46 = vpop.eup %518  ;;  %v284_v47 = vmul.f32 %v517_v45, %v252_v20  ;;  %v305_v53 = vadd.f32 %v476_v49, %v294_v48 }
 0x142   : > { %v285_v50 = vmul.f32 %v519_v46, %v253_v13 }
 0x143   : > { %v295_v51 = vmul.f32 %v475_v44, %v284_v47 }
 0x144   : > { %v521_v52 = vpop.eup %520  ;;  %v296_v56 = vmul.f32 %v475_v44, %v285_v50 }
 0x145   : > { %v306_v54 = vadd.f32 %v476_v49, %v295_v51  ;;  %v286_v55 = vmul.f32 %v521_v52, %v254_v21 }
 0x146   : > { %v307_v59 = vadd.f32 %v476_v49, %v296_v56 }
 0x147   : > { %v309_v57 = vpack.c.bf16 %v306_v54, %v305_v53  ;;  %v297_v58 = vmul.f32 %v475_v44, %v286_v55 }
 0x149   : > { %500 = vmatprep.mubr.msk.bf16.mxu0 %vm233_vm0, %v309_v57  ;;  %v308_v60 = vadd.f32 %v476_v49, %v297_v58 }
 0x14b   : > { %v310_v61 = vpack.c.bf16 %v308_v60, %v307_v59 }
 0x14d   : > { %501 = vmatmul.mubr.msk.bf16.vlgmr.msra.gmra.mxu0 %vm233_vm0, %v310_v61 }
 0x20d   : > { %v502_v63 = vpop.f32.mrf.mxu0 }
 0x20e   : > { %v383_v0 = vadd.f32 %v502_v63, %v477_v62 }
 0x20f   : > { %v374_v1 = vpop.f32.mrf.mxu0 }
 0x210   : > { %v490_v2 = vpack.c.bf16 %v383_v0, %v383_v0  ;;  %v375_v3 = vadd.f32 %v477_v62, %v374_v1 }
 0x211   : > { %v503_v4 = vpop.f32.mrf.mxu0 }
 0x212   : > { %408 = vst.msk [vmem:[%s226_s13 + $0x8] sm:$0xf] %vm405_vm1, %v490_v2  ;;  %v488_v5 = vpack.c.bf16 %v375_v3, %v375_v3  ;;  %v386_v6 = vadd.f32 %v503_v4, %v477_v62 }
 0x213   : > { %v377_v7 = vpop.f32.mrf.mxu0 }
 0x214   : > { %406 = vst.msk [vmem:[%s226_s13] sm:$0xf] %vm405_vm1, %v488_v5  ;;  %v491_v8 = vpack.c.bf16 %v386_v6, %v386_v6  ;;  %v378_v9 = vadd.f32 %v477_v62, %v377_v7 }
 0x216   : > { %409 = vst.msk [vmem:[%s226_s13 + $0xc] sm:$0xf] %vm405_vm1, %v491_v8  ;;  %v489_v10 = vpack.c.bf16 %v378_v9, %v378_v9 }
 0x218   : > { %407 = vst.msk [vmem:[%s226_s13 + $0x4] sm:$0xf] %vm405_vm1, %v489_v10 }
 0x219 PF: > { %s15_s18 = sadd.s32 1, %s528_s18  }
 0x21a   : > { %p12_p4 = scmp.ge.s32.totalorder %s15_s18, 6  }
 0x21c   :  { %14 = sbr.rel (!%p12_p4) target bundleno = 1 (0x1), region = 70 }

// kernel: basic_layer_forward.7
= control target key start
LH: loop header
LB: loop body
LE: loop exit
PB: predicated region body
PF: predicated region fallthrough
CT: control target
= control target key end

     0   :  { %s1821_s9 = smov 0   ;;  %s2081_s0 = inlined_call_operand.vmem [shape: bf16[8,16,96], index: 0, kind: input, shape index: {}]   ;;  %s2082_s1 = inlined_call_operand.vmem [shape: f32[4,16,16], index: 1, kind: input, shape index: {}]   ;;  %s2083_s2 = inlined_call_operand.vmem [shape: bf16[4,2,512], index: 2, kind: output, shape index: {}]  }
   0x1 LB: > { %s1827_s10 = sadd.s32 4294967295, %s1783_s9   ;;  %p1497_p0 = scmp.ge.s32.totalorder %s1783_s9, 1  ;;  %s1783_s9 = sphi %s1821_s9, %s12_s9  }
   0x2   : > { %p114_p1 = scmp.lt.s32.totalorder %s1783_s9, 5 }
   0x4   : > { %p115_p2 = pnand %p1497_p0, %p114_p1 }
   0x5   : > { %s1498_s11 = sshll.u32 (!%p115_p2), %s1827_s10, 1  ;;  %s1787_s16 = smov (!%p115_p2), 96  }
   0x6   : > { %118 = sbr.rel (%p115_p2) target bundleno = 2702 (0xa8e), region = 28  ;;  %p137_p3 = scmp.lt.s32.totalorder (!%p115_p2), %s1498_s11, 7 }
   0x7   : > { %s1788_s21 = smov (!%p115_p2), 64   ;;  %s1789_s22 = smov (!%p115_p2), 88  }
   0x8   : > { %s1790_s23 = smov (!%p115_p2), 120   ;;  %s1791_s28 = smov (!%p115_p2), 56  }
   0x9   : > { %s1792_s29 = smov (!%p115_p2), 80   ;;  %s1793_s30 = smov (!%p115_p2), 112  }
   0xa   : > { %s1794_s7 = smov (!%p115_p2), 48   ;;  %s1795_s8 = smov (!%p115_p2), 72  }
   0xb   : > { %v1785_v0 = vmov 0.0   ;;  %vm1786_vm0 = vmmov 0   ;;  %s2085_s11 = smov (!%p137_p3, %s1498_s11), 7  ;;  %vm167_vm1 = vcmask 64512   ;;  %v152_v8 = vld [vmem:[%s2082_s1] sm:$0xff]  ;;  %vm277_vm2 = vcmask 130048  }
   0xc   : > { %1556 = vmatprep.subr.bf16.mxu0 %v1785_v0  ;;  %1562 = vmatprep.subr.bf16.mxu1 %v1785_v0  ;;  %s1523_s12 = sshll.u32 %s2085_s11, 3  ;;  %v153_v14 = vld [vmem:[%s2082_s1 + $0x8] sm:$0xff]  ;;  %s1796_s11 = smov 104   ;;  %vm1224_vm3 = vcmask 195584   ;;  %vm1379_vm4 = vcmask 261120   ;;  %vm1383_vm5 = vcmask 523264  }
   0xd   : > { %1558 = vmatprep.mubr.msk.bf16.mxu0 %vm1786_vm0, %v1785_v0  ;;  %1564 = vmatprep.mubr.msk.bf16.mxu1 %vm1786_vm0, %v1785_v0  ;;  %s141_s15 = scalar_lea.vmem %s2081_s0, %s1523_s12  ;;  %s1797_s17 = smov 40   ;;  %vm1386_vm6 = vcmask 785408  }
   0xe   : > { %v1841_v1 = vld [vmem:[%s141_s15] sm:$0xff]   ;;  %v1845_v2 = vld [vmem:[%s141_s15 + $0x8] sm:$0xff]   ;;  %s1798_s18 = smov 8   ;;  %s1799_s19 = smov 16  }
   0xf   : > { %165 = vrot.lane.b32.xlu0 %v1841_v1, %s1787_s16  ;;  %s1800_s20 = smov 24   ;;  %p143_p4 = scmp.lt.s32.totalorder %s1827_s10, 3 }
  0x11   : > { %s2087_s10 = smov (!%p143_p4, %s1827_s10), 3 }
  0x13   : > { %220 = vrot.lane.b32.xlu0 %v1845_v2, %s1787_s16 }
  0x81   : > { %v166_v3 = vpop.permute.xlu0 %165 }
  0x82   : > { %v172_v4 = vsel %vm167_vm1, %v166_v3, 0 }
  0x83   : > { %1557 = vmatpush3.bf16.xpose.msra.mxu0 %v172_v4 }
  0x84   : > { %1568 = vmatprep.subr.bf16.mxu0 %v1785_v0 }
  0x85   : > { %v221_v5 = vpop.permute.xlu0 %220 }
  0x86   : > { %v226_v6 = vsel %vm167_vm1, %v221_v5, 0 }
  0x87   : > { %1563 = vmatpush3.bf16.xpose.msra.mxu1 %v226_v6 }
  0x88   : > { %1574 = vmatprep.subr.bf16.mxu1 %v1785_v0 }
  0x8a   : > { %1559 = vmatmul.mubr.msk.bf16.vlgmr.msra.gmra.mxu0 %vm167_vm1, %v1841_v1 }
  0x8b   : > { %1570 = vmatprep.mubr.msk.bf16.mxu0 %vm1786_vm0, %v1785_v0 }
  0x8e   : > { %1565 = vmatmul.mubr.msk.bf16.vlgmr.msra.gmra.mxu1 %vm167_vm1, %v1845_v2 }
  0x8f   : > { %1576 = vmatprep.mubr.msk.bf16.mxu1 %vm1786_vm0, %v1785_v0 }
 0x14a   : > { %v208_v7 = vpop.f32.mrf.mxu0 }
 0x14b   : > { %v269_v9 = vmul.f32 0.35355338, %v208_v7 }
 0x14c   : > { %v1560_v10 = vpop.f32.mrf.mxu0 }
 0x14d   : > { %v273_v11 = vadd.f32 %v269_v9, %v152_v8 }
 0x14e   : > { %v211_v12 = vpop.f32.mrf.mxu0  ;;  %v262_v13 = vpop.f32.mrf.mxu1 }
 0x14f   : > { %v270_v15 = vmul.f32 0.35355338, %v211_v12  ;;  %v271_v16 = vmul.f32 0.35355338, %v262_v13  ;;  %v278_v17 = vsel %vm277_vm2, %v273_v11, -inf }
 0x150   : > { %279 = vmax.xlane.f32.xlu1 %v278_v17  ;;  %v1561_v18 = vpop.f32.mrf.mxu0  ;;  %v1566_v19 = vpop.f32.mrf.mxu1 }
 0x151   : > { %v274_v20 = vadd.f32 %v270_v15, %v153_v14  ;;  %v275_v21 = vadd.f32 %v271_v16, %v152_v8  ;;  %v154_v18 = vld [vmem:[%s2082_s1 + $0x10] sm:$0xff] }
 0x152   : > { %v265_v22 = vpop.f32.mrf.mxu1 }
 0x153   : > { %v272_v23 = vmul.f32 0.35355338, %v265_v22  ;;  %v281_v24 = vsel %vm277_vm2, %v274_v20, -inf  ;;  %v284_v25 = vsel %vm277_vm2, %v275_v21, -inf }
 0x154   : > { %282 = vmax.xlane.f32.xlu1 %v281_v24  ;;  %285 = vmax.xlane.f32.xlu0 %v284_v25  ;;  %v1567_v26 = vpop.f32.mrf.mxu1  ;;  %v155_v25 = vld [vmem:[%s2082_s1 + $0x18] sm:$0xff] }
 0x155   : > { %v276_v27 = vadd.f32 %v272_v23, %v153_v14 }
 0x157   : > { %v287_v28 = vsel %vm277_vm2, %v276_v27, -inf }
 0x158   : > { %288 = vmax.xlane.f32.xlu1 %v287_v28 }
 0x169   : > { %324 = vrot.lane.b32.xlu1 %v1841_v1, %s1788_s21 }
 0x16a   : > { %371 = vrot.lane.b32.xlu0 %v1845_v2, %s1788_s21 }
 0x16d   : > { %420 = vrot.lane.b32.xlu1 %v1841_v1, %s1789_s22 }
 0x171   : > { %471 = vrot.lane.b32.xlu1 %v1845_v2, %s1789_s22  ;;  %s1804_s22 = smov 32  }
 0x1d9   : > { %v280_v29 = vpop.xlane.xlu1 %279 }
 0x1da   : > { %v290_v30 = vsub.f32 %v273_v11, %v280_v29 }
 0x1dc   : > { %v294_v31 = vmul.f32 1.442695, %v290_v30 }
 0x1dd   : > { %v283_v32 = vpop.xlane.xlu1 %282  ;;  %v286_v33 = vpop.xlane.xlu0 %285 }
 0x1de   : > { %1713 = vpow2.f32 %v294_v31  ;;  %v291_v34 = vsub.f32 %v274_v20, %v283_v32  ;;  %v292_v35 = vsub.f32 %v275_v21, %v286_v33 }
 0x1e0   : > { %v298_v36 = vmul.f32 1.442695, %v292_v35  ;;  %v296_v37 = vmul.f32 1.442695, %v291_v34 }
 0x1e1   : > { %v289_v38 = vpop.xlane.xlu1 %288  ;;  %v372_v50 = vpop.permute.xlu0 %371 }
 0x1e2   : > { %v293_v39 = vsub.f32 %v276_v27, %v289_v38  ;;  %1715 = vpow2.f32 %v298_v36  ;;  %1575 = vmatpush3.bf16.msra.mxu1 %v372_v50 }
 0x1e3   : > { %1717 = vpow2.f32 %v296_v37  ;;  %1586 = vmatprep.subr.bf16.mxu1 %v1785_v0 }
 0x1e4   : > { %v300_v40 = vmul.f32 1.442695, %v293_v39 }
 0x1e5   : > { %v325_v41 = vpop.permute.xlu1 %324 }
 0x1e6   : > { %1569 = vmatpush3.bf16.msra.mxu0 %v325_v41  ;;  %1719 = vpow2.f32 %v300_v40 }
 0x1e7   : > { %1580 = vmatprep.subr.bf16.mxu0 %v1785_v0 }
 0x1e9   : > { %v421_v51 = vpop.permute.xlu1 %420 }
 0x1ea   : > { %v426_v3 = vsel %vm167_vm1, %v421_v51, 0 }
 0x1eb   : > { %v1714_v42 = vpop.eup %1713 }
 0x1ec   : > { %v302_v43 = vsel %vm277_vm2, %v1714_v42, 0.0 }
 0x1ed   : > { %303 = vadd.xlane.f32.xlu1 %v302_v43  ;;  %v472_v52 = vpop.permute.xlu1 %471 }
 0x1ee   : > { %v477_v8 = vsel %vm167_vm1, %v472_v52, 0 }
 0x1ef   : > { %v1716_v44 = vpop.eup %1715 }
 0x1f0   : > { %v308_v45 = vsel %vm277_vm2, %v1716_v44, 0.0  ;;  %v1718_v46 = vpop.eup %1717 }
 0x1f1   : > { %309 = vadd.xlane.f32.xlu1 %v308_v45  ;;  %v305_v47 = vsel %vm277_vm2, %v1718_v46, 0.0 }
 0x1f3   : > { %v1720_v48 = vpop.eup %1719 }
 0x1f4   : > { %v311_v49 = vsel %vm277_vm2, %v1720_v48, 0.0 }
 0x1f5   : > { %306 = vadd.xlane.f32.xlu1 %v305_v47 }
 0x1f9   : > { %312 = vadd.xlane.f32.xlu1 %v311_v49 }
 0x20a   : > { %418 = vrot.lane.b32.xlu1 %v1841_v1, %s1790_s23 }
 0x20e   : > { %469 = vrot.lane.b32.xlu1 %v1845_v2, %s1790_s23 }
 0x276   : > { %v304_v53 = vpop.xlane.xlu1 %303 }
 0x277   : > { %1721 = vrcp.f32 %v304_v53 }
 0x27a   : > { %v310_v54 = vpop.xlane.xlu1 %309 }
 0x27e   : > { %v307_v55 = vpop.xlane.xlu1 %306 }
 0x27f   : > { %1723 = vrcp.f32 %v307_v55 }
 0x280   : > { %1725 = vrcp.f32 %v310_v54 }
 0x282   : > { %v313_v56 = vpop.xlane.xlu1 %312 }
 0x283   : > { %1727 = vrcp.f32 %v313_v56 }
 0x284   : > { %v1722_v57 = vpop.eup %1721 }
 0x285   : > { %v318_v59 = vmul.f32 %v1722_v57, %v1714_v42 }
 0x286   : > { %v419_v7 = vpop.permute.xlu1 %418 }
 0x28a   : > { %v470_v9 = vpop.permute.xlu1 %469 }
 0x28c   : > { %v1724_v58 = vpop.eup %1723 }
 0x28d   : > { %v319_v60 = vmul.f32 %v1724_v58, %v1718_v46  ;;  %v1726_v61 = vpop.eup %1725 }
 0x28e   : > { %v320_v4 = vmul.f32 %v1726_v61, %v1716_v44 }
 0x28f   : > { %v322_v62 = vpack.c.bf16 %v319_v60, %v318_v59 }
 0x290   : > { %v1728_v63 = vpop.eup %1727 }
 0x291   : > { %1571 = vmatmul.mubr.msk.bf16.vlgmr.msra.gmra.mxu0 %vm277_vm2, %v322_v62  ;;  %v321_v5 = vmul.f32 %v1728_v63, %v1720_v48 }
 0x292   : > { %1581 = vmatpush3.bf16.xpose.msra.mxu0 %v426_v3  ;;  %1582 = vmatprep.mubr.msk.bf16.mxu0 %vm1786_vm0, %v1785_v0 }
 0x293   : > { %v323_v6 = vpack.c.bf16 %v321_v5, %v320_v4  ;;  %1592 = vmatprep.subr.bf16.mxu0 %v1785_v0 }
 0x295   : > { %1577 = vmatmul.mubr.msk.bf16.vlgmr.msra.gmra.mxu1 %vm277_vm2, %v323_v6 }
 0x296   : > { %1587 = vmatpush3.bf16.xpose.msra.mxu1 %v477_v8  ;;  %1588 = vmatprep.mubr.msk.bf16.mxu1 %vm1786_vm0, %v1785_v0 }
 0x297   : > { %1598 = vmatprep.subr.bf16.mxu1 %v1785_v0 }
 0x299   : > { %1583 = vmatmul.mubr.msk.bf16.vlgmr.msra.gmra.mxu0 %vm167_vm1, %v419_v7 }
 0x29a   : > { %1594 = vmatprep.mubr.msk.bf16.mxu0 %vm1786_vm0, %v1785_v0 }
 0x29d   : > { %1589 = vmatmul.mubr.msk.bf16.vlgmr.msra.gmra.mxu1 %vm167_vm1, %v470_v9 }
 0x29e   : > { %1600 = vmatprep.mubr.msk.bf16.mxu1 %vm1786_vm0, %v1785_v0 }
 0x351   : > { %v1901_v10 = vpop.f32.mrf.mxu0 }
 0x353   : > { %v1572_v11 = vpop.f32.mrf.mxu0 }
 0x355   : > { %v1903_v12 = vpop.f32.mrf.mxu0  ;;  %v1905_v13 = vpop.f32.mrf.mxu1 }
 0x357   : > { %v1573_v14 = vpop.f32.mrf.mxu0  ;;  %v1578_v15 = vpop.f32.mrf.mxu1 }
 0x359   : > { %v1907_v16 = vpop.f32.mrf.mxu1  ;;  %v462_v17 = vpop.f32.mrf.mxu0 }
 0x35a   : > { %v520_v19 = vmul.f32 0.35355338, %v462_v17 }
 0x35b   : > { %v1579_v20 = vpop.f32.mrf.mxu1  ;;  %v1584_v21 = vpop.f32.mrf.mxu0 }
 0x35c   : > { %v524_v22 = vadd.f32 %v520_v19, %v154_v18 }
 0x35d   : > { %v465_v23 = vpop.f32.mrf.mxu0  ;;  %v513_v24 = vpop.f32.mrf.mxu1 }
 0x35e   : > { %v521_v26 = vmul.f32 0.35355338, %v465_v23  ;;  %v522_v27 = vmul.f32 0.35355338, %v513_v24  ;;  %v528_v28 = vsel %vm277_vm2, %v524_v22, -inf }
 0x35f   : > { %529 = vmax.xlane.f32.xlu0 %v528_v28  ;;  %v1585_v29 = vpop.f32.mrf.mxu0  ;;  %v1590_v30 = vpop.f32.mrf.mxu1 }
 0x360   : > { %v525_v31 = vadd.f32 %v521_v26, %v155_v25  ;;  %v526_v32 = vadd.f32 %v522_v27, %v154_v18 }
 0x361   : > { %v516_v33 = vpop.f32.mrf.mxu1 }
 0x362   : > { %v523_v34 = vmul.f32 0.35355338, %v516_v33  ;;  %v531_v35 = vsel %vm277_vm2, %v525_v31, -inf  ;;  %v534_v36 = vsel %vm277_vm2, %v526_v32, -inf }
 0x363   : > { %532 = vmax.xlane.f32.xlu1 %v531_v35  ;;  %535 = vmax.xlane.f32.xlu0 %v534_v36  ;;  %v1591_v37 = vpop.f32.mrf.mxu1 }
 0x364   : > { %v527_v38 = vadd.f32 %v523_v34, %v155_v25  ;;  %v156_v34 = vld [vmem:[%s2082_s1 + $0x20] sm:$0xff] }
 0x366   : > { %v537_v39 = vsel %vm277_vm2, %v527_v38, -inf }
 0x367   : > { %538 = vmax.xlane.f32.xlu0 %v537_v39 }
 0x374   : > { %574 = vrot.lane.b32.xlu1 %v1841_v1, %s1791_s28 }
 0x3e8   : > { %v530_v40 = vpop.xlane.xlu0 %529 }
 0x3e9   : > { %v540_v41 = vsub.f32 %v524_v22, %v530_v40 }
 0x3eb   : > { %v544_v42 = vmul.f32 1.442695, %v540_v41 }
 0x3ec   : > { %v533_v43 = vpop.xlane.xlu1 %532  ;;  %v536_v44 = vpop.xlane.xlu0 %535 }
 0x3ed   : > { %1729 = vpow2.f32 %v544_v42  ;;  %v541_v45 = vsub.f32 %v525_v31, %v533_v43  ;;  %v542_v46 = vsub.f32 %v526_v32, %v536_v44  ;;  %v157_v42 = vld [vmem:[%s2082_s1 + $0x28] sm:$0xff] }
 0x3ef   : > { %v546_v47 = vmul.f32 1.442695, %v541_v45  ;;  %v548_v48 = vmul.f32 1.442695, %v542_v46 }
 0x3f0   : > { %v539_v49 = vpop.xlane.xlu0 %538  ;;  %v575_v50 = vpop.permute.xlu1 %574 }
 0x3f1   : > { %1731 = vpow2.f32 %v546_v47  ;;  %v543_v51 = vsub.f32 %v527_v38, %v539_v49  ;;  %1593 = vmatpush3.bf16.msra.mxu0 %v575_v50 }
 0x3f2   : > { %1733 = vpow2.f32 %v548_v48  ;;  %1604 = vmatprep.subr.bf16.mxu0 %v1785_v0 }
 0x3f3   : > { %v550_v52 = vmul.f32 1.442695, %v543_v51 }
 0x3f5   : > { %1735 = vpow2.f32 %v550_v52 }
 0x3fa   : > { %v1730_v53 = vpop.eup %1729 }
 0x3fb   : > { %v552_v54 = vsel %vm277_vm2, %v1730_v53, 0.0 }
 0x3fc   : > { %553 = vadd.xlane.f32.xlu1 %v552_v54 }
 0x3fe   : > { %v1732_v55 = vpop.eup %1731 }
 0x3ff   : > { %v1734_v56 = vpop.eup %1733  ;;  %v555_v57 = vsel %vm277_vm2, %v1732_v55, 0.0 }
 0x400   : > { %v558_v58 = vsel %vm277_vm2, %v1734_v56, 0.0  ;;  %556 = vadd.xlane.f32.xlu0 %v555_v57 }
 0x401   : > { %559 = vadd.xlane.f32.xlu1 %v558_v58 }
 0x402   : > { %v1736_v59 = vpop.eup %1735 }
 0x403   : > { %v561_v60 = vsel %vm277_vm2, %v1736_v59, 0.0 }
 0x404   : > { %562 = vadd.xlane.f32.xlu0 %v561_v60 }
 0x412   : > { %670 = vrot.lane.b32.xlu1 %v1841_v1, %s1792_s29 }
 0x416   : > { %721 = vrot.lane.b32.xlu1 %v1845_v2, %s1792_s29 }
 0x41a   : > { %621 = vrot.lane.b32.xlu0 %v1845_v2, %s1791_s28  ;;  %719 = vrot.lane.b32.xlu1 %v1845_v2, %s1793_s30 }
 0x41e   : > { %668 = vrot.lane.b32.xlu0 %v1841_v1, %s1793_s30 }
 0x485   : > { %v554_v61 = vpop.xlane.xlu1 %553 }
 0x486   : > { %1737 = vrcp.f32 %v554_v61 }
 0x489   : > { %v557_v62 = vpop.xlane.xlu0 %556 }
 0x48a   : > { %v560_v63 = vpop.xlane.xlu1 %559  ;;  %1739 = vrcp.f32 %v557_v62 }
 0x48b   : > { %1741 = vrcp.f32 %v560_v63 }
 0x48d   : > { %v563_v3 = vpop.xlane.xlu0 %562 }
 0x48e   : > { %1743 = vrcp.f32 %v563_v3  ;;  %v671_v6 = vpop.permute.xlu1 %670 }
 0x48f   : > { %v676_v14 = vsel %vm167_vm1, %v671_v6, 0 }
 0x491   : > { %v622_v4 = vpop.permute.xlu0 %621 }
 0x492   : > { %1599 = vmatpush3.bf16.msra.mxu1 %v622_v4  ;;  %v722_v18 = vpop.permute.xlu1 %721 }
 0x493   : > { %1610 = vmatprep.subr.bf16.mxu1 %v1785_v0  ;;  %v1738_v5 = vpop.eup %1737  ;;  %v727_v21 = vsel %vm167_vm1, %v722_v18, 0 }
 0x494   : > { %v568_v8 = vmul.f32 %v1738_v5, %v1730_v53 }
 0x495   : > { %v669_v23 = vpop.permute.xlu0 %668 }
 0x496   : > { %v720_v24 = vpop.permute.xlu1 %719 }
 0x497   : > { %v1740_v7 = vpop.eup %1739 }
 0x498   : > { %v569_v9 = vmul.f32 %v1740_v7, %v1732_v55  ;;  %v1742_v11 = vpop.eup %1741 }
 0x499   : > { %v570_v19 = vmul.f32 %v1742_v11, %v1734_v56 }
 0x49a   : > { %v572_v15 = vpack.c.bf16 %v569_v9, %v568_v8 }
 0x49b   : > { %v1744_v17 = vpop.eup %1743 }
 0x49c   : > { %1595 = vmatmul.mubr.msk.bf16.vlgmr.msra.gmra.mxu0 %vm277_vm2, %v572_v15  ;;  %v571_v20 = vmul.f32 %v1744_v17, %v1736_v59 }
 0x49d   : > { %1605 = vmatpush3.bf16.xpose.msra.mxu0 %v676_v14  ;;  %1606 = vmatprep.mubr.msk.bf16.mxu0 %vm1786_vm0, %v1785_v0 }
 0x49e   : > { %v573_v22 = vpack.c.bf16 %v571_v20, %v570_v19  ;;  %1616 = vmatprep.subr.bf16.mxu0 %v1785_v0 }
 0x4a0   : > { %1601 = vmatmul.mubr.msk.bf16.vlgmr.msra.gmra.mxu1 %vm277_vm2, %v573_v22 }
 0x4a1   : > { %1611 = vmatpush3.bf16.xpose.msra.mxu1 %v727_v21  ;;  %1612 = vmatprep.mubr.msk.bf16.mxu1 %vm1786_vm0, %v1785_v0 }
 0x4a2   : > { %1622 = vmatprep.subr.bf16.mxu1 %v1785_v0 }
 0x4a4   : > { %1607 = vmatmul.mubr.msk.bf16.vlgmr.msra.gmra.mxu0 %vm167_vm1, %v669_v23 }
 0x4a5   : > { %1618 = vmatprep.mubr.msk.bf16.mxu0 %vm1786_vm0, %v1785_v0 }
 0x4a8   : > { %1613 = vmatmul.mubr.msk.bf16.vlgmr.msra.gmra.mxu1 %vm167_vm1, %v720_v24 }
 0x4a9   : > { %1624 = vmatprep.mubr.msk.bf16.mxu1 %vm1786_vm0, %v1785_v0 }
 0x55c   : > { %v1949_v25 = vpop.f32.mrf.mxu0 }
 0x55e   : > { %v1596_v26 = vpop.f32.mrf.mxu0 }
 0x560   : > { %v1951_v27 = vpop.f32.mrf.mxu0  ;;  %v1953_v28 = vpop.f32.mrf.mxu1 }
 0x561   : > { %v1681_v29 = vpack.i.bf16 %v1951_v27, %v1949_v25 }
 0x562   : > { %v1597_v30 = vpop.f32.mrf.mxu0  ;;  %v1602_v31 = vpop.f32.mrf.mxu1 }
 0x564   : > { %v1957_v32 = vpop.f32.mrf.mxu1  ;;  %v712_v33 = vpop.f32.mrf.mxu0 }
 0x565   : > { %v1686_v35 = vpack.i.bf16 %v1957_v32, %v1953_v28  ;;  %v770_v36 = vmul.f32 0.35355338, %v712_v33 }
 0x566   : > { %v1603_v37 = vpop.f32.mrf.mxu1  ;;  %v1608_v38 = vpop.f32.mrf.mxu0 }
 0x567   : > { %v774_v39 = vadd.f32 %v770_v36, %v156_v34 }
 0x568   : > { %v715_v40 = vpop.f32.mrf.mxu0  ;;  %v763_v41 = vpop.f32.mrf.mxu1 }
 0x569   : > { %v771_v43 = vmul.f32 0.35355338, %v715_v40  ;;  %v772_v44 = vmul.f32 0.35355338, %v763_v41  ;;  %v778_v45 = vsel %vm277_vm2, %v774_v39, -inf }
 0x56a   : > { %779 = vmax.xlane.f32.xlu0 %v778_v45  ;;  %v1609_v46 = vpop.f32.mrf.mxu0  ;;  %v1614_v47 = vpop.f32.mrf.mxu1 }
 0x56b   : > { %v775_v48 = vadd.f32 %v771_v43, %v157_v42  ;;  %v776_v49 = vadd.f32 %v772_v44, %v156_v34 }
 0x56c   : > { %v766_v50 = vpop.f32.mrf.mxu1 }
 0x56d   : > { %v773_v51 = vmul.f32 0.35355338, %v766_v50  ;;  %v781_v52 = vsel %vm277_vm2, %v775_v48, -inf  ;;  %v784_v53 = vsel %vm277_vm2, %v776_v49, -inf }
 0x56e   : > { %782 = vmax.xlane.f32.xlu1 %v781_v52  ;;  %785 = vmax.xlane.f32.xlu0 %v784_v53  ;;  %v1615_v54 = vpop.f32.mrf.mxu1 }
 0x56f   : > { %v777_v55 = vadd.f32 %v773_v51, %v157_v42 }
 0x571   : > { %v787_v56 = vsel %vm277_vm2, %v777_v55, -inf }
 0x572   : > { %788 = vmax.xlane.f32.xlu0 %v787_v56 }
 0x57f   : > { %824 = vrot.lane.b32.xlu1 %v1841_v1, %s1794_s7 }
 0x5f3   : > { %v780_v57 = vpop.xlane.xlu0 %779 }
 0x5f4   : > { %v790_v58 = vsub.f32 %v774_v39, %v780_v57  ;;  %v158_v57 = vld [vmem:[%s2082_s1 + $0x30] sm:$0xff] }
 0x5f6   : > { %v794_v59 = vmul.f32 1.442695, %v790_v58 }
 0x5f7   : > { %v783_v60 = vpop.xlane.xlu1 %782  ;;  %v786_v61 = vpop.xlane.xlu0 %785 }
 0x5f8   : > { %1745 = vpow2.f32 %v794_v59  ;;  %v791_v62 = vsub.f32 %v775_v48, %v783_v60  ;;  %v792_v63 = vsub.f32 %v776_v49, %v786_v61 }
 0x5fa   : > { %v796_v3 = vmul.f32 1.442695, %v791_v62  ;;  %v798_v4 = vmul.f32 1.442695, %v792_v63 }
 0x5fb   : > { %v789_v5 = vpop.xlane.xlu0 %788  ;;  %v825_v6 = vpop.permute.xlu1 %824 }
 0x5fc   : > { %1747 = vpow2.f32 %v796_v3  ;;  %v793_v7 = vsub.f32 %v777_v55, %v789_v5  ;;  %1617 = vmatpush3.bf16.msra.mxu0 %v825_v6  ;;  %v159_v3 = vld [vmem:[%s2082_s1 + $0x38] sm:$0xff] }
 0x5fd   : > { %1749 = vpow2.f32 %v798_v4  ;;  %1628 = vmatprep.subr.bf16.mxu0 %v1785_v0 }
 0x5fe   : > { %v800_v8 = vmul.f32 1.442695, %v793_v7 }
 0x600   : > { %1751 = vpow2.f32 %v800_v8 }
 0x605   : > { %v1746_v9 = vpop.eup %1745 }
 0x606   : > { %v802_v11 = vsel %vm277_vm2, %v1746_v9, 0.0 }
 0x607   : > { %803 = vadd.xlane.f32.xlu1 %v802_v11 }
 0x609   : > { %v1748_v14 = vpop.eup %1747 }
 0x60a   : > { %v1750_v15 = vpop.eup %1749  ;;  %v805_v17 = vsel %vm277_vm2, %v1748_v14, 0.0 }
 0x60b   : > { %v808_v18 = vsel %vm277_vm2, %v1750_v15, 0.0  ;;  %806 = vadd.xlane.f32.xlu0 %v805_v17 }
 0x60c   : > { %809 = vadd.xlane.f32.xlu1 %v808_v18 }
 0x60d   : > { %v1752_v19 = vpop.eup %1751 }
 0x60e   : > { %v811_v20 = vsel %vm277_vm2, %v1752_v19, 0.0 }
 0x60f   : > { %812 = vadd.xlane.f32.xlu0 %v811_v20 }
 0x61d   : > { %920 = vrot.lane.b32.xlu1 %v1841_v1, %s1795_s8 }
 0x621   : > { %971 = vrot.lane.b32.xlu1 %v1845_v2, %s1795_s8 }
 0x625   : > { %871 = vrot.lane.b32.xlu0 %v1845_v2, %s1794_s7  ;;  %969 = vrot.lane.b32.xlu1 %v1845_v2, %s1796_s11 }
 0x629   : > { %918 = vrot.lane.b32.xlu0 %v1841_v1, %s1796_s11 }
 0x690   : > { %v804_v21 = vpop.xlane.xlu1 %803 }
 0x691   : > { %1753 = vrcp.f32 %v804_v21 }
 0x694   : > { %v807_v22 = vpop.xlane.xlu0 %806 }
 0x695   : > { %v810_v23 = vpop.xlane.xlu1 %809  ;;  %1755 = vrcp.f32 %v807_v22 }
 0x696   : > { %1757 = vrcp.f32 %v810_v23 }
 0x698   : > { %v813_v24 = vpop.xlane.xlu0 %812 }
 0x699   : > { %1759 = vrcp.f32 %v813_v24  ;;  %v921_v31 = vpop.permute.xlu1 %920 }
 0x69a   : > { %v926_v38 = vsel %vm167_vm1, %v921_v31, 0 }
 0x69c   : > { %v872_v26 = vpop.permute.xlu0 %871 }
 0x69d   : > { %1623 = vmatpush3.bf16.msra.mxu1 %v872_v26  ;;  %v972_v41 = vpop.permute.xlu1 %971 }
 0x69e   : > { %1634 = vmatprep.subr.bf16.mxu1 %v1785_v0  ;;  %v1754_v30 = vpop.eup %1753  ;;  %v977_v44 = vsel %vm167_vm1, %v972_v41, 0 }
 0x69f   : > { %v818_v34 = vmul.f32 %v1754_v30, %v1746_v9 }
 0x6a0   : > { %v919_v46 = vpop.permute.xlu0 %918 }
 0x6a1   : > { %v970_v47 = vpop.permute.xlu1 %969 }
 0x6a2   : > { %v1756_v33 = vpop.eup %1755 }
 0x6a3   : > { %v819_v36 = vmul.f32 %v1756_v33, %v1748_v14  ;;  %v1758_v37 = vpop.eup %1757 }
 0x6a4   : > { %v820_v42 = vmul.f32 %v1758_v37, %v1750_v15 }
 0x6a5   : > { %v822_v39 = vpack.c.bf16 %v819_v36, %v818_v34 }
 0x6a6   : > { %v1760_v40 = vpop.eup %1759 }
 0x6a7   : > { %1619 = vmatmul.mubr.msk.bf16.vlgmr.msra.gmra.mxu0 %vm277_vm2, %v822_v39  ;;  %v821_v43 = vmul.f32 %v1760_v40, %v1752_v19 }
 0x6a8   : > { %1629 = vmatpush3.bf16.xpose.msra.mxu0 %v926_v38  ;;  %1630 = vmatprep.mubr.msk.bf16.mxu0 %vm1786_vm0, %v1785_v0 }
 0x6a9   : > { %v823_v45 = vpack.c.bf16 %v821_v43, %v820_v42  ;;  %1640 = vmatprep.subr.bf16.mxu0 %v1785_v0 }
 0x6ab   : > { %1625 = vmatmul.mubr.msk.bf16.vlgmr.msra.gmra.mxu1 %vm277_vm2, %v823_v45 }
 0x6ac   : > { %1635 = vmatpush3.bf16.xpose.msra.mxu1 %v977_v44  ;;  %1636 = vmatprep.mubr.msk.bf16.mxu1 %vm1786_vm0, %v1785_v0 }
 0x6ad   : > { %1646 = vmatprep.subr.bf16.mxu1 %v1785_v0 }
 0x6af   : > { %1631 = vmatmul.mubr.msk.bf16.vlgmr.msra.gmra.mxu0 %vm167_vm1, %v919_v46 }
 0x6b0   : > { %1642 = vmatprep.mubr.msk.bf16.mxu0 %vm1786_vm0, %v1785_v0 }
 0x6b3   : > { %1637 = vmatmul.mubr.msk.bf16.vlgmr.msra.gmra.mxu1 %vm167_vm1, %v970_v47 }
 0x6b4   : > { %1648 = vmatprep.mubr.msk.bf16.mxu1 %vm1786_vm0, %v1785_v0 }
 0x767   : > { %v2001_v48 = vpop.f32.mrf.mxu0 }
 0x769   : > { %v1620_v49 = vpop.f32.mrf.mxu0 }
 0x76b   : > { %v2003_v50 = vpop.f32.mrf.mxu0  ;;  %v2005_v51 = vpop.f32.mrf.mxu1 }
 0x76c   : > { %v1691_v52 = vpack.i.bf16 %v2003_v50, %v2001_v48 }
 0x76d   : > { %v1621_v53 = vpop.f32.mrf.mxu0  ;;  %v1626_v54 = vpop.f32.mrf.mxu1 }
 0x76f   : > { %v2009_v55 = vpop.f32.mrf.mxu1  ;;  %v962_v56 = vpop.f32.mrf.mxu0 }
 0x770   : > { %v1696_v0 = vpack.i.bf16 %v2009_v55, %v2005_v51  ;;  %v1020_v58 = vmul.f32 0.35355338, %v962_v56 }
 0x771   : > { %v1627_v59 = vpop.f32.mrf.mxu1  ;;  %v1632_v60 = vpop.f32.mrf.mxu0 }
 0x772   : > { %v1024_v61 = vadd.f32 %v1020_v58, %v158_v57 }
 0x773   : > { %v965_v62 = vpop.f32.mrf.mxu0  ;;  %v1013_v63 = vpop.f32.mrf.mxu1 }
 0x774   : > { %v1021_v4 = vmul.f32 0.35355338, %v965_v62  ;;  %v1022_v5 = vmul.f32 0.35355338, %v1013_v63  ;;  %v1028_v6 = vsel %vm277_vm2, %v1024_v61, -inf }
 0x775   : > { %1029 = vmax.xlane.f32.xlu0 %v1028_v6  ;;  %v1633_v7 = vpop.f32.mrf.mxu0  ;;  %v1638_v8 = vpop.f32.mrf.mxu1 }
 0x776   : > { %v1025_v9 = vadd.f32 %v1021_v4, %v159_v3  ;;  %v1026_v11 = vadd.f32 %v1022_v5, %v158_v57 }
 0x777   : > { %v1016_v14 = vpop.f32.mrf.mxu1 }
 0x778   : > { %v1023_v15 = vmul.f32 0.35355338, %v1016_v14  ;;  %v1031_v17 = vsel %vm277_vm2, %v1025_v9, -inf  ;;  %v1034_v18 = vsel %vm277_vm2, %v1026_v11, -inf }
 0x779   : > { %1032 = vmax.xlane.f32.xlu1 %v1031_v17  ;;  %1035 = vmax.xlane.f32.xlu0 %v1034_v18  ;;  %v1639_v19 = vpop.f32.mrf.mxu1 }
 0x77a   : > { %v1027_v20 = vadd.f32 %v1023_v15, %v159_v3 }
 0x77c   : > { %v1037_v21 = vsel %vm277_vm2, %v1027_v20, -inf }
 0x77d   : > { %1038 = vmax.xlane.f32.xlu0 %v1037_v21 }
 0x7fe   : > { %v1030_v22 = vpop.xlane.xlu0 %1029 }
 0x7ff   : > { %v1040_v23 = vsub.f32 %v1024_v61, %v1030_v22  ;;  %v1249_v22 = vlaneseq }
 0x801   : > { %v1044_v24 = vmul.f32 1.442695, %v1040_v23 }
 0x802   : > { %v1033_v26 = vpop.xlane.xlu1 %1032  ;;  %v1036_v30 = vpop.xlane.xlu0 %1035 }
 0x803   : > { %1761 = vpow2.f32 %v1044_v24  ;;  %v1041_v31 = vsub.f32 %v1025_v9, %v1033_v26  ;;  %v1042_v33 = vsub.f32 %v1026_v11, %v1036_v30 }
 0x805   : > { %v1046_v34 = vmul.f32 1.442695, %v1041_v31  ;;  %v1048_v36 = vmul.f32 1.442695, %v1042_v33 }
 0x806   : > { %v1039_v37 = vpop.xlane.xlu0 %1038 }
 0x807   : > { %1763 = vpow2.f32 %v1046_v34  ;;  %v1043_v38 = vsub.f32 %v1027_v20, %v1039_v37  ;;  %v1801_v20 = vmov 1983009808  }
 0x808   : > { %1765 = vpow2.f32 %v1048_v36  ;;  %v1247_v21 = vunpack.c.l.s4 %v1801_v20 }
 0x809   : > { %v1050_v39 = vmul.f32 1.442695, %v1043_v38  ;;  %v2048_v38 = vshrl.u32 %v1249_v22, 7 }
 0x80a   : > { %v1248_v37 = vunpack.c.0.s8 %v1247_v21 }
 0x80b   : > { %1767 = vpow2.f32 %v1050_v39  ;;  %v1802_v39 = vmov 1934713408  }
 0x810   : > { %v1762_v40 = vpop.eup %1761 }
 0x811   : > { %v1052_v41 = vsel %vm277_vm2, %v1762_v40, 0.0 }
 0x812   : > { %1053 = vadd.xlane.f32.xlu1 %v1052_v41 }
 0x814   : > { %v1764_v42 = vpop.eup %1763 }
 0x815   : > { %v1766_v43 = vpop.eup %1765  ;;  %v1055_v44 = vsel %vm277_vm2, %v1764_v42, 0.0 }
 0x816   : > { %v1058_v45 = vsel %vm277_vm2, %v1766_v43, 0.0  ;;  %1056 = vadd.xlane.f32.xlu0 %v1055_v44 }
 0x817   : > { %1059 = vadd.xlane.f32.xlu1 %v1058_v45 }
 0x818   : > { %v1768_v46 = vpop.eup %1767 }
 0x819   : > { %v1061_v47 = vsel %vm277_vm2, %v1768_v46, 0.0 }
 0x81a   : > { %1062 = vadd.xlane.f32.xlu0 %v1061_v47 }
 0x828   : > { %1074 = vrot.lane.b32.xlu1 %v1841_v1, %s1797_s17 }
 0x82c   : > { %1682 = vrot.lane.b32.xlu1 %v1681_v29, %s1798_s18 }
 0x830   : > { %1687 = vrot.lane.b32.xlu1 %v1686_v35, %s1798_s18  ;;  %1121 = vrot.lane.b32.xlu0 %v1845_v2, %s1797_s17 }
 0x834   : > { %1697 = vrot.lane.b32.xlu1 %v1696_v0, %s1799_s19  ;;  %1692 = vrot.lane.b32.xlu0 %v1691_v52, %s1799_s19 }
 0x89b   : > { %v1054_v49 = vpop.xlane.xlu1 %1053 }
 0x89c   : > { %1769 = vrcp.f32 %v1054_v49 }
 0x89f   : > { %v1057_v1 = vpop.xlane.xlu0 %1056 }
 0x8a0   : > { %v1060_v51 = vpop.xlane.xlu1 %1059  ;;  %1771 = vrcp.f32 %v1057_v1 }
 0x8a1   : > { %1773 = vrcp.f32 %v1060_v51 }
 0x8a3   : > { %v1063_v25 = vpop.xlane.xlu0 %1062 }
 0x8a4   : > { %v1075_v27 = vpop.permute.xlu1 %1074  ;;  %1775 = vrcp.f32 %v1063_v25  ;;  %v1251_v25 = vsub.s32 %v1248_v37, %v2048_v38 }
 0x8a5   : > { %1641 = vmatpush3.bf16.msra.mxu0 %v1075_v27 }
 0x8a7   : > { %v1122_v28 = vpop.permute.xlu0 %1121 }
 0x8a8   : > { %1647 = vmatpush3.bf16.msra.mxu1 %v1122_v28  ;;  %v1683_v4 = vpop.permute.xlu1 %1682 }
 0x8a9   : > { %v1770_v29 = vpop.eup %1769  ;;  %v1685_v6 = vunpack.i.h.bf16 %v1683_v4  ;;  %v1684_v7 = vunpack.i.l.bf16 %v1683_v4 }
 0x8aa   : > { %v1068_v32 = vmul.f32 %v1770_v29, %v1762_v40  ;;  %v1262_v40 = vunpack.c.l.s4 %v1802_v39 }
 0x8ab   : > { %v1693_v8 = vpop.permute.xlu0 %1692  ;;  %v1217_v14 = vsel %vm167_vm1, %v1903_v12, %v1685_v6  ;;  %v1216_v15 = vsel %vm167_vm1, %v1901_v10, %v1684_v7 }
 0x8ac   : > { %v1688_v5 = vpop.permute.xlu1 %1687  ;;  %v1695_v9 = vunpack.i.h.bf16 %v1693_v8  ;;  %v1694_v11 = vunpack.i.l.bf16 %v1693_v8  ;;  %v1263_v27 = vunpack.c.0.s8 %v1262_v40 }
 0x8ad   : > { %v1772_v2 = vpop.eup %1771  ;;  %v1690_v18 = vunpack.i.h.bf16 %v1688_v5  ;;  %v1689_v23 = vunpack.i.l.bf16 %v1688_v5 }
 0x8ae   : > { %v1069_v35 = vmul.f32 %v1772_v2, %v1764_v42  ;;  %v1774_v53 = vpop.eup %1773  ;;  %v1221_v30 = vsel %vm277_vm2, %v1217_v14, %v1695_v9  ;;  %v1220_v31 = vsel %vm277_vm2, %v1216_v15, %v1694_v11  ;;  %v1803_v2 = vmov 0  }
 0x8af   : > { %v1070_v50 = vmul.f32 %v1774_v53, %v1766_v43  ;;  %v1219_v41 = vsel %vm167_vm1, %v1907_v16, %v1690_v18  ;;  %v1218_v42 = vsel %vm167_vm1, %v1905_v13, %v1689_v23  ;;  %v1240_v13 = vpack.i.b16 %v1803_v2, %v1803_v2 }
 0x8b0   : > { %v1072_v54 = vpack.c.bf16 %v1069_v35, %v1068_v32  ;;  %v1698_v17 = vpop.permute.xlu1 %1697  ;;  %v1266_v35 = vsub.s32 %v1263_v27, %v2048_v38 }
 0x8b1   : > { %v1776_v48 = vpop.eup %1775  ;;  %v1700_v33 = vunpack.i.h.bf16 %v1698_v17  ;;  %v1699_v34 = vunpack.i.l.bf16 %v1698_v17 }
 0x8b2   : > { %1643 = vmatmul.mubr.msk.bf16.vlgmr.msra.gmra.mxu0 %vm277_vm2, %v1072_v54  ;;  %v1071_v52 = vmul.f32 %v1776_v48, %v1768_v46 }
 0x8b3   : > { %v1222_v45 = vsel %vm277_vm2, %v1218_v42, %v1699_v34  ;;  %v1223_v46 = vsel %vm277_vm2, %v1219_v41, %v1700_v33 }
 0x8b4   : > { %v1073_v55 = vpack.c.bf16 %v1071_v52, %v1070_v50 }
 0x8b6   : > { %1649 = vmatmul.mubr.msk.bf16.vlgmr.msra.gmra.mxu1 %vm277_vm2, %v1073_v55 }
 0x972   : > { %v1114_v56 = vpop.f32.mrf.mxu0 }
 0x974   : > { %v1644_v57 = vpop.f32.mrf.mxu0 }
 0x976   : > { %v1117_v0 = vpop.f32.mrf.mxu0  ;;  %v1161_v58 = vpop.f32.mrf.mxu1 }
 0x977   : > { %v1701_v59 = vpack.i.bf16 %v1117_v0, %v1114_v56 }
 0x978   : > { %v1645_v60 = vpop.f32.mrf.mxu0  ;;  %v1650_v61 = vpop.f32.mrf.mxu1 }
 0x979   : > { %1702 = vrot.lane.b32.xlu0 %v1701_v59, %s1800_s20 }
 0x97a   : > { %v1164_v62 = vpop.f32.mrf.mxu1 }
 0x97b   : > { %v1706_v63 = vpack.i.bf16 %v1164_v62, %v1161_v58 }
 0x97c   : > { %v1651_v3 = vpop.f32.mrf.mxu1 }
 0x97d   : > { %1707 = vrot.lane.b32.xlu1 %v1706_v63, %s1800_s20 }
 0x9eb   : > { %v1703_v19 = vpop.permute.xlu0 %1702 }
 0x9ec   : > { %v1705_v24 = vunpack.i.h.bf16 %v1703_v19  ;;  %v1704_v26 = vunpack.i.l.bf16 %v1703_v19 }
 0x9ee   : > { %v1225_v12 = vsel %vm1224_vm3, %v1220_v31, %v1704_v26  ;;  %v1226_v10 = vsel %vm1224_vm3, %v1221_v30, %v1705_v24  ;;  %v1805_v30 = vmov 1966171168  }
 0x9ef   : > { %v1708_v36 = vpop.permute.xlu1 %1707  ;;  %v1229_v47 = vpack.c.bf16 %v1226_v10, %v1225_v12  ;;  %v1417_v31 = vunpack.c.l.s4 %v1805_v30 }
 0x9f0   : > { %v1710_v43 = vunpack.i.h.bf16 %v1708_v36  ;;  %v1709_v44 = vunpack.i.l.bf16 %v1708_v36 }
 0x9f1   : > { %v1235_v28 = vshrl.u32 %v1229_v47, 16  ;;  %v1418_v10 = vunpack.c.0.s8 %v1417_v31 }
 0x9f2   : > { %v1228_v49 = vsel %vm1224_vm3, %v1223_v46, %v1710_v43  ;;  %v1227_v1 = vsel %vm1224_vm3, %v1222_v45, %v1709_v44 }
 0x9f3   : > { %v1230_v51 = vpack.c.bf16 %v1228_v49, %v1227_v1 }
 0x9f5   : > { %v1233_v16 = vpack.i.b16 %v1230_v51, %v1229_v47  ;;  %v1236_v29 = vshrl.u32 %v1230_v51, 16  ;;  %v1421_v47 = vsub.s32 %v1418_v10, %v2048_v38 }
 0x9f7   : > { %v1237_v32 = vpack.i.b16 %v1236_v29, %v1235_v28  ;;  %v1252_v53 = vrot.slane %v1233_v16, %v1251_v25  ;;  %v1245_v52 = vcombine.high %v1233_v16, %v1240_v13 }
 0x9f9   : > { %v1301_v54 = vrot.slane %v1237_v32, %v1251_v25  ;;  %v1260_v48 = vcombine.high %v1252_v53, %v1803_v2  ;;  %v1294_v50 = vcombine.high %v1237_v32, %v1240_v13  ;;  %v1267_v57 = vrot.slane %v1252_v53, %v1266_v35 }
 0x9fa   : > { %v1259_v60 = vrot.slane %v1245_v52, %v1251_v25 }
 0x9fb   : > { %v1316_v55 = vrot.slane %v1301_v54, %v1266_v35  ;;  %v1309_v56 = vcombine.high %v1301_v54, %v1803_v2  ;;  %v1274_v58 = vrot.slane %v1260_v48, %v1266_v35  ;;  %v1308_v59 = vrot.slane %v1294_v50, %v1251_v25 }
 0x9fc   : > { %v1290_v61 = vcombine.high %v1267_v57, %v1803_v2  ;;  %v1275_v3 = vcombine.high %v1259_v60, %v1803_v2  ;;  %v1282_v5 = vrot.slane %v1259_v60, %v1266_v35 }
 0x9fd   : > { %1344 = vrot.lane.b32.xlu0 %v1316_v55, %s1804_s22  ;;  %v1323_v0 = vrot.slane %v1309_v56, %v1266_v35  ;;  %v1291_v62 = vcombine.high %v1274_v58, %v1803_v2  ;;  %v1324_v63 = vcombine.high %v1308_v59, %v1803_v2  ;;  %v1331_v4 = vrot.slane %v1308_v59, %v1266_v35 }
 0x9fe   : > { %v1289_v7 = vrot.slane %v1275_v3, %v1266_v35  ;;  %v1292_v8 = vcombine.high %v1282_v5, %v1803_v2  ;;  %v1339_v11 = vcombine.high %v1316_v55, %v1803_v2 }
 0x9ff   : > { %1353 = vrot.lane.b32.xlu1 %v1323_v0, %s1804_s22  ;;  %v1338_v6 = vrot.slane %v1324_v63, %v1266_v35  ;;  %v1340_v14 = vcombine.high %v1323_v0, %v1803_v2  ;;  %v1341_v15 = vcombine.high %v1331_v4, %v1803_v2 }
 0xa00   : > { %v1293_v9 = vcombine.high %v1289_v7, %v1803_v2 }
 0xa01   : > { %1347 = vrot.lane.b32.xlu0 %v1290_v61, %s1788_s21  ;;  %v1342_v17 = vcombine.high %v1338_v6, %v1803_v2 }
 0xa03   : > { %1356 = vrot.lane.b32.xlu1 %v1291_v62, %s1788_s21 }
 0xa05   : > { %1362 = vrot.lane.b32.xlu0 %v1331_v4, %s1804_s22 }
 0xa07   : > { %1371 = vrot.lane.b32.xlu1 %v1338_v6, %s1804_s22 }
 0xa09   : > { %1365 = vrot.lane.b32.xlu0 %v1292_v8, %s1788_s21 }
 0xa0b   : > { %1374 = vrot.lane.b32.xlu1 %v1293_v9, %s1788_s21 }
 0xa0d   : > { %1350 = vrot.lane.b32.xlu0 %v1339_v11, %s1787_s16 }
 0xa0f   : > { %1359 = vrot.lane.b32.xlu1 %v1340_v14, %s1787_s16 }
 0xa11   : > { %1368 = vrot.lane.b32.xlu0 %v1341_v15, %s1787_s16 }
 0xa13   : > { %1377 = vrot.lane.b32.xlu1 %v1342_v17, %s1787_s16  ;;  %s1501_s16 = sshll.u32 %s2087_s10, 2 }
 0xa14   : > { %s146_s24 = scalar_lea.vmem %s2083_s2, %s1501_s16 }
 0xa6f   : > { %v1345_v18 = vpop.permute.xlu0 %1344 }
 0xa70   : > { %v1382_v37 = vsel %vm1379_vm4, %v1267_v57, %v1345_v18 }
 0xa71   : > { %v1354_v19 = vpop.permute.xlu1 %1353 }
 0xa72   : > { %v1391_v34 = vsel %vm1379_vm4, %v1274_v58, %v1354_v19 }
 0xa73   : > { %v1348_v20 = vpop.permute.xlu0 %1347 }
 0xa74   : > { %v1385_v40 = vsel %vm1383_vm5, %v1382_v37, %v1348_v20 }
 0xa75   : > { %v1357_v21 = vpop.permute.xlu1 %1356 }
 0xa76   : > { %v1393_v12 = vsel %vm1383_vm5, %v1391_v34, %v1357_v21 }
 0xa77   : > { %v1363_v22 = vpop.permute.xlu0 %1362 }
 0xa78   : > { %v1398_v42 = vsel %vm1379_vm4, %v1282_v5, %v1363_v22 }
 0xa79   : > { %v1372_v23 = vpop.permute.xlu1 %1371 }
 0xa7a   : > { %v1405_v43 = vsel %vm1379_vm4, %v1289_v7, %v1372_v23 }
 0xa7b   : > { %v1366_v24 = vpop.permute.xlu0 %1365 }
 0xa7c   : > { %v1400_v45 = vsel %vm1383_vm5, %v1398_v42, %v1366_v24 }
 0xa7d   : > { %v1375_v26 = vpop.permute.xlu1 %1374 }
 0xa7e   : > { %v1407_v46 = vsel %vm1383_vm5, %v1405_v43, %v1375_v26 }
 0xa7f   : > { %v1351_v33 = vpop.permute.xlu0 %1350 }
 0xa80   : > { %v1388_v44 = vsel %vm1386_vm6, %v1385_v40, %v1351_v33 }
 0xa81   : > { %v1360_v36 = vpop.permute.xlu1 %1359 }
 0xa82   : > { %v1395_v39 = vsel %vm1386_vm6, %v1393_v12, %v1360_v36 }
 0xa83   : > { %v1369_v41 = vpop.permute.xlu0 %1368  ;;  %v1414_v49 = vcombine.low %v1388_v44, %v1395_v39 }
 0xa84   : > { %v1402_v51 = vsel %vm1386_vm6, %v1400_v45, %v1369_v41 }
 0xa85   : > { %v1378_v1 = vpop.permute.xlu1 %1377  ;;  %v1422_v28 = vrot.slane %v1414_v49, %v1421_v47 }
 0xa86   : > { %v1409_v25 = vsel %vm1386_vm6, %v1407_v46, %v1378_v1 }
 0xa87   : > { %v1415_v27 = vcombine.low %v1402_v51, %v1409_v25 }
 0xa89   : > { %v1429_v16 = vrot.slane %v1415_v27, %v1421_v47 }
 0xa8b   : > { %v1430_v29 = vcombine.low %v1422_v28, %v1429_v16 }
 0xa8d   : > { %1520 = vst.sshfl [vmem:[%s146_s24] sm:$0x55 pattern:$0x73625140] %v1430_v29 }
 0xa8e PF: > { %s12_s9 = sadd.s32 1, %s1783_s9  }
 0xa8f   : > { %p9_p5 = scmp.ge.s32.totalorder %s12_s9, 6  }
 0xa91   :  { %11 = sbr.rel (!%p9_p5) target bundleno = 1 (0x1), region = 58 }

// kernel: basic_layer_forward.8
= control target key start
LH: loop header
LB: loop body
LE: loop exit
PB: predicated region body
PF: predicated region fallthrough
CT: control target
= control target key end

     0   :  { %s1055_s13 = smov 0   ;;  %s1170_s0 = inlined_call_operand.vmem [shape: bf16[128,32], index: 0, kind: input, shape index: {}]   ;;  %s1171_s1 = inlined_call_operand.vmem [shape: f32[128,32], index: 1, kind: input, shape index: {}]   ;;  %s1172_s2 = inlined_call_operand.vmem [shape: bf16[32,32], index: 2, kind: input, shape index: {}]   ;;  %s1173_s3 = inlined_call_operand.vmem [shape: f32[1,32], index: 3, kind: input, shape index: {}]   ;;  %s1174_s4 = inlined_call_operand.vmem [shape: f32[1,32], index: 4, kind: input, shape index: {}]   ;;  %s1175_s5 = inlined_call_operand.vmem [shape: f32[1,32], index: 5, kind: input, shape index: {}]   ;;  %s1176_s6 = inlined_call_operand.vmem [shape: bf16[32,128], index: 6, kind: input, shape index: {}]   ;;  %s1177_s7 = inlined_call_operand.vmem [shape: f32[1,128], index: 7, kind: input, shape index: {}]   ;;  %s1178_s8 = inlined_call_operand.vmem [shape: bf16[128,32], index: 8, kind: input, shape index: {}]   ;;  %s1179_s9 = inlined_call_operand.vmem [shape: f32[1,32], index: 9, kind: input, shape index: {}]   ;;  %s1180_s10 = inlined_call_operand.vmem [shape: f32[128,32], index: 10, kind: output, shape index: {}]  }
   0x1 LB: > { %s864_s14 = sadd.s32 4294967295, %s998_s13   ;;  %p868_p0 = scmp.ge.s32.totalorder %s998_s13, 1  ;;  %s998_s13 = sphi %s1055_s13, %s20_s13  }
   0x2   : > { %p324_p1 = scmp.lt.s32.totalorder %s998_s13, 5 }
   0x4   : > { %p325_p2 = pnand %p868_p0, %p324_p1 }
   0x5   : > { %s869_s17 = sshll.u32 (!%p325_p2), %s864_s14, 2 }
   0x6   : > { %328 = sbr.rel (%p325_p2) target bundleno = 965 (0x3c5), region = 60  ;;  %p368_p3 = scmp.lt.s32.totalorder (!%p325_p2), %s869_s17, 15 }
   0xb   : > { %v962_v0 = vld [vmem:[%s1172_s2 + $0x8] sm:$0xff]   ;;  %v963_v1 = vld [vmem:[%s1172_s2] sm:$0xff]   ;;  %s1182_s17 = smov (!%p368_p3, %s869_s17), 15  ;;  %vm420_vm0 = vcmask 261120  }
   0xc   : > { %918 = vmatprep.subr.bf16.mxu1 %v962_v0  ;;  %s870_s20 = sshll.u32 %s1182_s17, 2  ;;  %s872_s24 = sshll.u32 %s1182_s17, 3  ;;  %v881_v6 = vld [vmem:[%s1173_s3] ss:$0 sm:$0xff]  ;;  %v966_v45 = vld [vmem:[%s1176_s6 + $0x8] sm:$0xff]  }
   0xd   : > { %919 = vmatpush3.bf16.msra.mxu1 %v962_v0  ;;  %s371_s23 = scalar_lea.vmem %s1170_s0, %s870_s20  ;;  %s377_s27 = scalar_lea.vmem %s1171_s1, %s872_s24  ;;  %v967_v46 = vld [vmem:[%s1176_s6] sm:$0xff]  }
   0xe   : > { %920 = vmatprep.subr.bf16.mxu1 %v963_v1  ;;  %v964_v2 = vld [vmem:[%s371_s23] sm:$0xff]   ;;  %v965_v3 = vld [vmem:[%s371_s23 + $0x8] sm:$0xff]   ;;  %v392_v4 = vld [vmem:[%s377_s27 + $0x10] sm:$0xff]  ;;  %s383_s26 = scalar_lea.vmem %s1180_s10, %s872_s24 }
   0xf   : > { %922 = vmatprep.mubr.msk.bf16.mxu1 %vm420_vm0, %v964_v2  ;;  %v390_v7 = vld [vmem:[%s377_s27] sm:$0xff]  ;;  %v393_v10 = vld [vmem:[%s377_s27 + $0x18] sm:$0xff]  ;;  %v391_v14 = vld [vmem:[%s377_s27 + $0x8] sm:$0xff] }
  0x10   : > { %v882_v61 = vld [vmem:[%s1174_s4] ss:$0 sm:$0xff] }
  0x11   : > { %921 = vmatpush3.bf16.msra.mxu1 %v963_v1 }
  0x12   : > { %926 = vmatprep.subr.bf16.mxu1 %v966_v45 }
  0x14   : > { %923 = vmatmul.mubr.msk.bf16.vlgmr.msra.gmra.mxu1 %vm420_vm0, %v965_v3  ;;  %v883_v3 = vld [vmem:[%s1175_s5] ss:$0 sm:$0xff] }
  0x15   : > { %927 = vmatpush3.bf16.msra.mxu1 %v966_v45 }
  0x16   : > { %928 = vmatprep.subr.bf16.mxu1 %v967_v46 }
  0x19   : > { %929 = vmatpush3.bf16.msra.mxu1 %v967_v46 }
  0xd4   : > { %v924_v5 = vpop.f32.mrf.mxu1 }
  0xd5   : > { %v478_v8 = vadd.f32 %v924_v5, %v392_v4 }
  0xd6   : > { %v461_v9 = vpop.f32.mrf.mxu1 }
  0xd7   : > { %v1086_v11 = vadd.f32 %v881_v6, %v478_v8  ;;  %v476_v12 = vadd.f32 %v461_v9, %v390_v7 }
  0xd8   : > { %v925_v13 = vpop.f32.mrf.mxu1 }
  0xd9   : > { %v1088_v15 = vadd.f32 %v881_v6, %v476_v12  ;;  %v479_v16 = vadd.f32 %v925_v13, %v393_v10  ;;  %v497_v17 = vsel %vm420_vm0, %v1086_v11, 0.0 }
  0xda   : > { %498 = vadd.xlane.f32.xlu1 %v497_v17  ;;  %v464_v18 = vpop.f32.mrf.mxu1  ;;  %v968_v17 = vld [vmem:[%s1178_s8 + $0x38] sm:$0xff]  }
  0xdb   : > { %v1092_v19 = vadd.f32 %v881_v6, %v479_v16  ;;  %v477_v20 = vadd.f32 %v464_v18, %v391_v14  ;;  %v491_v21 = vsel %vm420_vm0, %v1088_v15, 0.0  ;;  %934 = vmatprep.subr.bf16.mxu0 %v968_v17  ;;  %v969_v18 = vld [vmem:[%s1178_s8 + $0x30] sm:$0xff]  }
  0xdc   : > { %492 = vadd.xlane.f32.xlu0 %v491_v21  ;;  %935 = vmatpush3.bf16.msra.mxu0 %v968_v17  ;;  %v971_v21 = vld [vmem:[%s1178_s8 + $0x20] sm:$0xff]  }
  0xdd   : > { %v1096_v22 = vadd.f32 %v881_v6, %v477_v20  ;;  %v500_v23 = vsel %vm420_vm0, %v1092_v19, 0.0  ;;  %936 = vmatprep.subr.bf16.mxu0 %v969_v18  ;;  %v970_v20 = vld [vmem:[%s1178_s8 + $0x28] sm:$0xff]  }
  0xde   : > { %501 = vadd.xlane.f32.xlu1 %v500_v23  ;;  %v972_v23 = vld [vmem:[%s1178_s8 + $0x18] sm:$0xff]  }
  0xdf   : > { %v494_v24 = vsel %vm420_vm0, %v1096_v22, 0.0 }
  0xe0   : > { %495 = vadd.xlane.f32.xlu0 %v494_v24  ;;  %937 = vmatpush3.bf16.msra.mxu0 %v969_v18  ;;  %v973_v24 = vld [vmem:[%s1178_s8 + $0x10] sm:$0xff]  }
  0xe1   : > { %938 = vmatprep.subr.bf16.mxu0 %v970_v20 }
  0xe4   : > { %939 = vmatpush3.bf16.msra.mxu0 %v970_v20 }
  0xe5   : > { %940 = vmatprep.subr.bf16.mxu0 %v971_v21 }
  0xe8   : > { %941 = vmatpush3.bf16.msra.mxu0 %v971_v21 }
  0xe9   : > { %942 = vmatprep.subr.bf16.mxu0 %v972_v23 }
  0xec   : > { %943 = vmatpush3.bf16.msra.mxu0 %v972_v23 }
  0xed   : > { %944 = vmatprep.subr.bf16.mxu0 %v973_v24 }
  0xf0   : > { %945 = vmatpush3.bf16.msra.mxu0 %v973_v24 }
 0x163   : > { %v499_v25 = vpop.xlane.xlu1 %498 }
 0x164   : > { %v506_v26 = vmul.f32 0.03125, %v499_v25  ;;  %v974_v25 = vld [vmem:[%s1178_s8 + $0x8] sm:$0xff]  }
 0x165   : > { %v493_v27 = vpop.xlane.xlu0 %492  ;;  %946 = vmatprep.subr.bf16.mxu0 %v974_v25 }
 0x166   : > { %v504_v28 = vmul.f32 0.03125, %v493_v27  ;;  %v510_v30 = vsub.f32 %v1086_v11, %v506_v26  ;;  %v975_v26 = vld [vmem:[%s1178_s8] sm:$0xff]   ;;  %947 = vmatpush3.bf16.msra.mxu0 %v974_v25 }
 0x167   : > { %v502_v29 = vpop.xlane.xlu1 %501  ;;  %948 = vmatprep.subr.bf16.mxu0 %v975_v26  ;;  %v884_v27 = vld [vmem:[%s1177_s7] ss:$0 sm:$0xff] }
 0x168   : > { %v508_v31 = vsub.f32 %v1088_v15, %v504_v28  ;;  %v507_v32 = vmul.f32 0.03125, %v502_v29  ;;  %v514_v39 = vmul.f32 %v510_v30, %v510_v30 }
 0x169   : > { %v496_v33 = vpop.xlane.xlu0 %495 }
 0x16a   : > { %v505_v34 = vmul.f32 0.03125, %v496_v33  ;;  %v512_v35 = vmul.f32 %v508_v31, %v508_v31  ;;  %v511_v36 = vsub.f32 %v1092_v19, %v507_v32  ;;  %v522_v41 = vsel %vm420_vm0, %v514_v39, 0.0  ;;  %949 = vmatpush3.bf16.msra.mxu0 %v975_v26 }
 0x16c   : > { %v509_v37 = vsub.f32 %v1096_v22, %v505_v34  ;;  %v516_v38 = vsel %vm420_vm0, %v512_v35, 0.0  ;;  %v515_v43 = vmul.f32 %v511_v36, %v511_v36 }
 0x16d   : > { %517 = vadd.xlane.f32.xlu0 %v516_v38 }
 0x16e   : > { %v513_v40 = vmul.f32 %v509_v37, %v509_v37  ;;  %v525_v44 = vsel %vm420_vm0, %v515_v43, 0.0 }
 0x170   : > { %v519_v42 = vsel %vm420_vm0, %v513_v40, 0.0 }
 0x171   : > { %523 = vadd.xlane.f32.xlu0 %v522_v41  ;;  %520 = vadd.xlane.f32.xlu1 %v519_v42 }
 0x175   : > { %526 = vadd.xlane.f32.xlu1 %v525_v44 }
 0x1f6   : > { %v518_v47 = vpop.xlane.xlu0 %517 }
 0x1f7   : > { %v528_v48 = vmul.f32 0.03125, %v518_v47 }
 0x1f9   : > { %v532_v49 = vadd.f32 1e-05, %v528_v48 }
 0x1fa   : > { %v521_v50 = vpop.xlane.xlu1 %520  ;;  %v524_v51 = vpop.xlane.xlu0 %523 }
 0x1fb   : > { %976 = vrsqrt.f32 %v532_v49  ;;  %v529_v52 = vmul.f32 0.03125, %v521_v50  ;;  %v530_v53 = vmul.f32 0.03125, %v524_v51 }
 0x1fd   : > { %v533_v54 = vadd.f32 1e-05, %v529_v52  ;;  %v534_v55 = vadd.f32 1e-05, %v530_v53 }
 0x1fe   : > { %v527_v56 = vpop.xlane.xlu1 %526 }
 0x1ff   : > { %978 = vrsqrt.f32 %v533_v54  ;;  %v531_v57 = vmul.f32 0.03125, %v527_v56 }
 0x200   : > { %980 = vrsqrt.f32 %v534_v55 }
 0x201   : > { %v535_v58 = vadd.f32 1e-05, %v531_v57 }
 0x203   : > { %982 = vrsqrt.f32 %v535_v58  ;;  %v889_v58 = vld [vmem:[%s1179_s9] ss:$0 sm:$0xff] }
 0x208   : > { %v977_v59 = vpop.eup %976 }
 0x209   : > { %v540_v60 = vmul.f32 %v977_v59, %v508_v31 }
 0x20b   : > { %v551_v1 = vmul.f32 %v882_v61, %v540_v60 }
 0x20c   : > { %v979_v62 = vpop.eup %978 }
 0x20d   : > { %v981_v63 = vpop.eup %980  ;;  %v541_v0 = vmul.f32 %v979_v62, %v509_v37  ;;  %v562_v7 = vadd.f32 %v883_v3, %v551_v1 }
 0x20e   : > { %v542_v2 = vmul.f32 %v981_v63, %v510_v30 }
 0x20f   : > { %v552_v4 = vmul.f32 %v882_v61, %v541_v0 }
 0x210   : > { %v983_v5 = vpop.eup %982  ;;  %v553_v9 = vmul.f32 %v882_v61, %v542_v2 }
 0x211   : > { %v543_v6 = vmul.f32 %v983_v5, %v511_v36  ;;  %v563_v8 = vadd.f32 %v883_v3, %v552_v4 }
 0x212   : > { %v564_v13 = vadd.f32 %v883_v3, %v553_v9 }
 0x213   : > { %v566_v10 = vpack.c.bf16 %v563_v8, %v562_v7  ;;  %v554_v12 = vmul.f32 %v882_v61, %v543_v6 }
 0x215   : > { %930 = vmatprep.mubr.msk.bf16.mxu1 %vm420_vm0, %v566_v10  ;;  %v565_v14 = vadd.f32 %v883_v3, %v554_v12 }
 0x217   : > { %v567_v16 = vpack.c.bf16 %v565_v14, %v564_v13 }
 0x219   : > { %931 = vmatmul.mubr.msk.bf16.vlgmr.msra.gmra.mxu1 %vm420_vm0, %v567_v16 }
 0x2d9   : > { %v932_v28 = vpop.f32.mrf.mxu1 }
 0x2da   : > { %v640_v29 = vadd.f32 %v932_v28, %v884_v27 }
 0x2db   : > { %v631_v30 = vpop.f32.mrf.mxu1 }
 0x2dc   : > { %v632_v31 = vadd.f32 %v884_v27, %v631_v30  ;;  %v652_v32 = vmul.f32 0.70710677, %v640_v29  ;;  %v648_v51 = vmul.f32 0.5, %v640_v29 }
 0x2dd   : > { %v933_v33 = vpop.f32.mrf.mxu1 }
 0x2de   : > { %v650_v34 = vmul.f32 0.70710677, %v632_v31  ;;  %v643_v35 = vadd.f32 %v933_v33, %v884_v27  ;;  %v646_v48 = vmul.f32 0.5, %v632_v31 }
 0x2df   : > { %v634_v36 = vpop.f32.mrf.mxu1 }
 0x2e0   : > { %984 = verf.f32 %v650_v34  ;;  %v653_v37 = vmul.f32 0.70710677, %v643_v35  ;;  %v635_v38 = vadd.f32 %v884_v27, %v634_v36  ;;  %v649_v47 = vmul.f32 0.5, %v643_v35 }
 0x2e1   : > { %986 = verf.f32 %v652_v32 }
 0x2e2   : > { %988 = verf.f32 %v653_v37  ;;  %v651_v39 = vmul.f32 0.70710677, %v635_v38  ;;  %v647_v49 = vmul.f32 0.5, %v635_v38 }
 0x2e4   : > { %990 = verf.f32 %v651_v39 }
 0x2ed   : > { %v985_v40 = vpop.eup %984 }
 0x2ee   : > { %v987_v41 = vpop.eup %986  ;;  %v658_v44 = vadd.f32 1.0, %v985_v40 }
 0x2ef   : > { %v989_v42 = vpop.eup %988  ;;  %v660_v46 = vadd.f32 1.0, %v987_v41 }
 0x2f0   : > { %v661_v43 = vadd.f32 1.0, %v989_v42  ;;  %v662_v53 = vmul.f32 %v658_v44, %v646_v48 }
 0x2f1   : > { %v991_v45 = vpop.eup %990  ;;  %v664_v55 = vmul.f32 %v660_v46, %v648_v51 }
 0x2f2   : > { %v659_v50 = vadd.f32 1.0, %v991_v45  ;;  %v665_v52 = vmul.f32 %v661_v43, %v649_v47 }
 0x2f4   : > { %v663_v54 = vmul.f32 %v659_v50, %v647_v49  ;;  %v667_v57 = vpack.c.bf16 %v665_v52, %v664_v55 }
 0x2f6   : > { %v666_v56 = vpack.c.bf16 %v663_v54, %v662_v53 }
 0x2f8   : > { %950 = vmatprep.mubr.bf16.mxu0 %v666_v56 }
 0x2f9   : > { %951 = vmatmul.mubr.bf16.vlgmr.msra.gmra.mxu0 %v667_v57 }
 0x3b9   : > { %v952_v59 = vpop.f32.mrf.mxu0 }
 0x3ba   : > { %v782_v60 = vadd.f32 %v952_v59, %v889_v58 }
 0x3bb   : > { %v773_v61 = vpop.f32.mrf.mxu0 }
 0x3bc   : > { %v790_v62 = vadd.f32 %v782_v60, %v1086_v11  ;;  %v774_v63 = vadd.f32 %v889_v58, %v773_v61 }
 0x3bd   : > { %v953_v0 = vpop.f32.mrf.mxu0 }
 0x3be   : > { %794 = vst.msk [vmem:[%s383_s26 + $0x10] sm:$0xff] %vm420_vm0, %v790_v62  ;;  %v788_v1 = vadd.f32 %v774_v63, %v1088_v15  ;;  %v785_v2 = vadd.f32 %v953_v0, %v889_v58 }
 0x3bf   : > { %v776_v3 = vpop.f32.mrf.mxu0 }
 0x3c0   : > { %792 = vst.msk [vmem:[%s383_s26] sm:$0xff] %vm420_vm0, %v788_v1  ;;  %v791_v4 = vadd.f32 %v785_v2, %v1092_v19  ;;  %v777_v5 = vadd.f32 %v889_v58, %v776_v3 }
 0x3c2   : > { %795 = vst.msk [vmem:[%s383_s26 + $0x18] sm:$0xff] %vm420_vm0, %v791_v4  ;;  %v789_v6 = vadd.f32 %v777_v5, %v1096_v22 }
 0x3c4   : > { %793 = vst.msk [vmem:[%s383_s26 + $0x8] sm:$0xff] %vm420_vm0, %v789_v6 }
 0x3c5 PF: > { %s20_s13 = sadd.s32 1, %s998_s13  }
 0x3c6   : > { %p17_p4 = scmp.ge.s32.totalorder %s20_s13, 6  }
 0x3c8   :  { %19 = sbr.rel (!%p17_p4) target bundleno = 1 (0x1), region = 93 }

// kernel: basic_layer_forward.10
= control target key start
LH: loop header
LB: loop body
LE: loop exit
PB: predicated region body
PF: predicated region fallthrough
CT: control target
= control target key end

     0   :  { %s1896_s12 = smov 0   ;;  %s2189_s0 = inlined_call_operand.vmem [shape: bf16[8,16,96], index: 0, kind: input, shape index: {}]   ;;  %s2190_s1 = inlined_call_operand.vmem [shape: f32[4,16,16], index: 1, kind: input, shape index: {}]   ;;  %s2191_s2 = inlined_call_operand.vmem [shape: f32[4,16,16], index: 2, kind: input, shape index: {}]   ;;  %s2192_s3 = inlined_call_operand.vmem [shape: bf16[4,2,512], index: 3, kind: output, shape index: {}]  }
   0x1 LB: > { %s1902_s13 = sadd.s32 4294967295, %s1853_s12   ;;  %p1561_p0 = scmp.ge.s32.totalorder %s1853_s12, 1  ;;  %s1853_s12 = sphi %s1896_s12, %s13_s12  }
   0x2   : > { %p139_p1 = scmp.lt.s32.totalorder %s1853_s12, 5 }
   0x4   : > { %p140_p2 = pnand %p1561_p0, %p139_p1 }
   0x5   : > { %s1562_s14 = sshll.u32 (!%p140_p2), %s1902_s13, 1  ;;  %s1857_s19 = smov (!%p140_p2), 96  }
   0x6   : > { %143 = sbr.rel (%p140_p2) target bundleno = 2710 (0xa96), region = 32  ;;  %p164_p3 = scmp.lt.s32.totalorder (!%p140_p2), %s1562_s14, 7 }
   0x7   : > { %s176_s20 = ssub.s32 (!%p140_p2), 0, %s1902_s13  ;;  %p175_p4 = scmp.lt.s32.totalorder (!%p140_p2), %s1902_s13, 0 }
   0x8   : > { %s1566_s21 = smin.u32 (!%p140_p2), %s1902_s13, %s176_s20  ;;  %s1858_s6 = smov (!%p140_p2), 64  }
   0x9   : > { %s178_s22 = sand.u32 (!%p140_p2), 1, %s1566_s21   ;;  %s1859_s7 = smov (!%p140_p2), 88  }
   0xa   : > { %s179_s23 = ssub.s32 (!%p140_p2), 0, %s178_s22  ;;  %s1860_s8 = smov (!%p140_p2), 120  }
   0xb   : > { %v1855_v0 = vmov 0.0   ;;  %vm1856_vm0 = vmmov 0   ;;  %s2194_s14 = smov (!%p164_p3, %s1562_s14), 7  ;;  %vm213_vm1 = vcmask 64512   ;;  %s2196_s23 = smov (!%p175_p4, %s179_s23), %s178_s22  ;;  %v198_v7 = vld [vmem:[%s2190_s1] sm:$0xff]  ;;  %v199_v13 = vld [vmem:[%s2190_s1 + $0x8] sm:$0xff] }
   0xc   : > { %1626 = vmatprep.subr.bf16.mxu0 %v1855_v0  ;;  %1632 = vmatprep.subr.bf16.mxu1 %v1855_v0  ;;  %s1592_s15 = sshll.u32 %s2194_s14, 3  ;;  %p1568_p5 = scmp.lt.s32.totalorder %s2196_s23, 0  ;;  %vm327_vm2 = vcmask 130048   ;;  %vm1286_vm3 = vcmask 195584   ;;  %vm1441_vm4 = vcmask 261120   ;;  %vm1445_vm5 = vcmask 523264  }
   0xd   : > { %1628 = vmatprep.mubr.msk.bf16.mxu0 %vm1856_vm0, %v1855_v0  ;;  %1634 = vmatprep.mubr.msk.bf16.mxu1 %vm1856_vm0, %v1855_v0  ;;  %s168_s18 = scalar_lea.vmem %s2189_s0, %s1592_s15  ;;  %s185_s24 = sadd.s32 2, %s2196_s23  ;;  %vm1448_vm6 = vcmask 785408  }
   0xe   : > { %v1916_v1 = vld [vmem:[%s168_s18] sm:$0xff]   ;;  %v1920_v2 = vld [vmem:[%s168_s18 + $0x8] sm:$0xff]   ;;  %s2198_s24 = smov (!%p1568_p5, %s185_s24), %s2196_s23  ;;  %s1861_s15 = smov 56  }
   0xf   : > { %211 = vrot.lane.b32.xlu0 %v1916_v1, %s1857_s19  ;;  %s1593_s25 = sshll.u32 %s2198_s24, 5  ;;  %s1862_s16 = smov 80  }
  0x10   : > { %s189_s28 = scalar_lea.vmem %s2191_s2, %s1593_s25  ;;  %s1863_s17 = smov 112  }
  0x11   : > { %v1945_v11 = vld [vmem:[%s189_s28] sm:$0xff]  ;;  %v1951_v21 = vld [vmem:[%s189_s28 + $0x8] sm:$0xff]  ;;  %v1953_v22 = vld [vmem:[%s189_s28 + $0x10] sm:$0xff]  ;;  %s1864_s23 = smov 48   ;;  %s1865_s24 = smov 72  }
  0x12   : > { %v1958_v31 = vld [vmem:[%s189_s28 + $0x18] sm:$0xff]  ;;  %s1866_s25 = smov 104   ;;  %s1867_s30 = smov 40  }
  0x13   : > { %266 = vrot.lane.b32.xlu0 %v1920_v2, %s1857_s19  ;;  %s1868_s4 = smov 8   ;;  %s1869_s5 = smov 16  }
  0x14   : > { %p170_p6 = scmp.lt.s32.totalorder %s1902_s13, 3 }
  0x16   : > { %s2200_s13 = smov (!%p170_p6, %s1902_s13), 3 }
  0x81   : > { %v212_v3 = vpop.permute.xlu0 %211 }
  0x82   : > { %v218_v4 = vsel %vm213_vm1, %v212_v3, 0 }
  0x83   : > { %1627 = vmatpush3.bf16.xpose.msra.mxu0 %v218_v4 }
  0x84   : > { %1638 = vmatprep.subr.bf16.mxu0 %v1855_v0 }
  0x85   : > { %v267_v5 = vpop.permute.xlu0 %266 }
  0x86   : > { %v272_v6 = vsel %vm213_vm1, %v267_v5, 0 }
  0x87   : > { %1633 = vmatpush3.bf16.xpose.msra.mxu1 %v272_v6 }
  0x88   : > { %1644 = vmatprep.subr.bf16.mxu1 %v1855_v0 }
  0x8a   : > { %1629 = vmatmul.mubr.msk.bf16.vlgmr.msra.gmra.mxu0 %vm213_vm1, %v1916_v1 }
  0x8b   : > { %1640 = vmatprep.mubr.msk.bf16.mxu0 %vm1856_vm0, %v1855_v0 }
  0x8e   : > { %1635 = vmatmul.mubr.msk.bf16.vlgmr.msra.gmra.mxu1 %vm213_vm1, %v1920_v2 }
  0x8f   : > { %1646 = vmatprep.mubr.msk.bf16.mxu1 %vm1856_vm0, %v1855_v0 }
 0x14a   : > { %v254_v8 = vpop.f32.mrf.mxu0 }
 0x14b   : > { %v315_v9 = vmul.f32 0.35355338, %v254_v8 }
 0x14c   : > { %v1630_v10 = vpop.f32.mrf.mxu0 }
 0x14d   : > { %v319_v12 = vadd.f32 %v315_v9, %v198_v7 }
 0x14e   : > { %v257_v14 = vpop.f32.mrf.mxu0  ;;  %v308_v15 = vpop.f32.mrf.mxu1 }
 0x14f   : > { %v316_v16 = vmul.f32 0.35355338, %v257_v14  ;;  %v317_v17 = vmul.f32 0.35355338, %v308_v15  ;;  %v323_v18 = vadd.f32 %v319_v12, %v1945_v11 }
 0x150   : > { %v1631_v19 = vpop.f32.mrf.mxu0  ;;  %v1636_v20 = vpop.f32.mrf.mxu1 }
 0x151   : > { %v320_v23 = vadd.f32 %v316_v16, %v199_v13  ;;  %v321_v24 = vadd.f32 %v317_v17, %v198_v7  ;;  %v328_v25 = vsel %vm327_vm2, %v323_v18, -inf }
 0x152   : > { %329 = vmax.xlane.f32.xlu1 %v328_v25  ;;  %v311_v26 = vpop.f32.mrf.mxu1 }
 0x153   : > { %v318_v27 = vmul.f32 0.35355338, %v311_v26  ;;  %v324_v28 = vadd.f32 %v320_v23, %v1951_v21  ;;  %v325_v29 = vadd.f32 %v321_v24, %v1953_v22 }
 0x154   : > { %v1637_v30 = vpop.f32.mrf.mxu1 }
 0x155   : > { %v322_v32 = vadd.f32 %v318_v27, %v199_v13  ;;  %v331_v33 = vsel %vm327_vm2, %v324_v28, -inf  ;;  %v334_v34 = vsel %vm327_vm2, %v325_v29, -inf }
 0x156   : > { %332 = vmax.xlane.f32.xlu1 %v331_v33  ;;  %335 = vmax.xlane.f32.xlu0 %v334_v34 }
 0x157   : > { %v326_v35 = vadd.f32 %v322_v32, %v1958_v31 }
 0x159   : > { %v337_v36 = vsel %vm327_vm2, %v326_v35, -inf }
 0x15a   : > { %338 = vmax.xlane.f32.xlu1 %v337_v36 }
 0x16b   : > { %374 = vrot.lane.b32.xlu1 %v1916_v1, %s1858_s6 }
 0x16c   : > { %421 = vrot.lane.b32.xlu0 %v1920_v2, %s1858_s6 }
 0x16f   : > { %470 = vrot.lane.b32.xlu1 %v1916_v1, %s1859_s7 }
 0x173   : > { %521 = vrot.lane.b32.xlu1 %v1920_v2, %s1859_s7  ;;  %s1870_s7 = smov 24  }
 0x1db   : > { %v330_v37 = vpop.xlane.xlu1 %329 }
 0x1dc   : > { %v340_v38 = vsub.f32 %v323_v18, %v330_v37 }
 0x1de   : > { %v344_v39 = vmul.f32 1.442695, %v340_v38 }
 0x1df   : > { %v333_v40 = vpop.xlane.xlu1 %332  ;;  %v336_v41 = vpop.xlane.xlu0 %335 }
 0x1e0   : > { %1783 = vpow2.f32 %v344_v39  ;;  %v341_v42 = vsub.f32 %v324_v28, %v333_v40  ;;  %v342_v43 = vsub.f32 %v325_v29, %v336_v41  ;;  %v200_v28 = vld [vmem:[%s2190_s1 + $0x10] sm:$0xff] }
 0x1e2   : > { %v348_v44 = vmul.f32 1.442695, %v342_v43  ;;  %v346_v45 = vmul.f32 1.442695, %v341_v42 }
 0x1e3   : > { %v339_v46 = vpop.xlane.xlu1 %338  ;;  %v422_v58 = vpop.permute.xlu0 %421 }
 0x1e4   : > { %v343_v47 = vsub.f32 %v326_v35, %v339_v46  ;;  %1785 = vpow2.f32 %v348_v44  ;;  %1645 = vmatpush3.bf16.msra.mxu1 %v422_v58  ;;  %v201_v35 = vld [vmem:[%s2190_s1 + $0x18] sm:$0xff] }
 0x1e5   : > { %1787 = vpow2.f32 %v346_v45  ;;  %1656 = vmatprep.subr.bf16.mxu1 %v1855_v0 }
 0x1e6   : > { %v350_v48 = vmul.f32 1.442695, %v343_v47 }
 0x1e7   : > { %v375_v49 = vpop.permute.xlu1 %374 }
 0x1e8   : > { %1639 = vmatpush3.bf16.msra.mxu0 %v375_v49  ;;  %1789 = vpow2.f32 %v350_v48 }
 0x1e9   : > { %1650 = vmatprep.subr.bf16.mxu0 %v1855_v0 }
 0x1eb   : > { %v471_v59 = vpop.permute.xlu1 %470 }
 0x1ec   : > { %v476_v12 = vsel %vm213_vm1, %v471_v59, 0 }
 0x1ed   : > { %v1784_v50 = vpop.eup %1783 }
 0x1ee   : > { %v352_v51 = vsel %vm327_vm2, %v1784_v50, 0.0 }
 0x1ef   : > { %353 = vadd.xlane.f32.xlu1 %v352_v51  ;;  %v522_v60 = vpop.permute.xlu1 %521 }
 0x1f0   : > { %v527_v17 = vsel %vm213_vm1, %v522_v60, 0 }
 0x1f1   : > { %v1786_v52 = vpop.eup %1785 }
 0x1f2   : > { %v358_v53 = vsel %vm327_vm2, %v1786_v52, 0.0  ;;  %v1788_v54 = vpop.eup %1787 }
 0x1f3   : > { %359 = vadd.xlane.f32.xlu1 %v358_v53  ;;  %v355_v55 = vsel %vm327_vm2, %v1788_v54, 0.0 }
 0x1f5   : > { %v1790_v56 = vpop.eup %1789 }
 0x1f6   : > { %v361_v57 = vsel %vm327_vm2, %v1790_v56, 0.0 }
 0x1f7   : > { %356 = vadd.xlane.f32.xlu1 %v355_v55 }
 0x1fb   : > { %362 = vadd.xlane.f32.xlu1 %v361_v57 }
 0x20c   : > { %468 = vrot.lane.b32.xlu1 %v1916_v1, %s1860_s8 }
 0x210   : > { %519 = vrot.lane.b32.xlu1 %v1920_v2, %s1860_s8  ;;  %s1874_s8 = smov 32  }
 0x278   : > { %v354_v61 = vpop.xlane.xlu1 %353 }
 0x279   : > { %1791 = vrcp.f32 %v354_v61 }
 0x27c   : > { %v360_v62 = vpop.xlane.xlu1 %359 }
 0x280   : > { %v357_v63 = vpop.xlane.xlu1 %356 }
 0x281   : > { %1793 = vrcp.f32 %v357_v63 }
 0x282   : > { %1795 = vrcp.f32 %v360_v62 }
 0x284   : > { %v363_v3 = vpop.xlane.xlu1 %362 }
 0x285   : > { %1797 = vrcp.f32 %v363_v3 }
 0x286   : > { %v1792_v4 = vpop.eup %1791 }
 0x287   : > { %v368_v6 = vmul.f32 %v1792_v4, %v1784_v50 }
 0x288   : > { %v469_v16 = vpop.permute.xlu1 %468 }
 0x28c   : > { %v520_v18 = vpop.permute.xlu1 %519 }
 0x28e   : > { %v1794_v5 = vpop.eup %1793 }
 0x28f   : > { %v369_v7 = vmul.f32 %v1794_v5, %v1788_v54  ;;  %v1796_v8 = vpop.eup %1795 }
 0x290   : > { %v370_v13 = vmul.f32 %v1796_v8, %v1786_v52 }
 0x291   : > { %v372_v9 = vpack.c.bf16 %v369_v7, %v368_v6 }
 0x292   : > { %v1798_v10 = vpop.eup %1797 }
 0x293   : > { %1641 = vmatmul.mubr.msk.bf16.vlgmr.msra.gmra.mxu0 %vm327_vm2, %v372_v9  ;;  %v371_v14 = vmul.f32 %v1798_v10, %v1790_v56 }
 0x294   : > { %1651 = vmatpush3.bf16.xpose.msra.mxu0 %v476_v12  ;;  %1652 = vmatprep.mubr.msk.bf16.mxu0 %vm1856_vm0, %v1855_v0 }
 0x295   : > { %v373_v15 = vpack.c.bf16 %v371_v14, %v370_v13  ;;  %1662 = vmatprep.subr.bf16.mxu0 %v1855_v0 }
 0x297   : > { %1647 = vmatmul.mubr.msk.bf16.vlgmr.msra.gmra.mxu1 %vm327_vm2, %v373_v15 }
 0x298   : > { %1657 = vmatpush3.bf16.xpose.msra.mxu1 %v527_v17  ;;  %1658 = vmatprep.mubr.msk.bf16.mxu1 %vm1856_vm0, %v1855_v0 }
 0x299   : > { %1668 = vmatprep.subr.bf16.mxu1 %v1855_v0 }
 0x29b   : > { %1653 = vmatmul.mubr.msk.bf16.vlgmr.msra.gmra.mxu0 %vm213_vm1, %v469_v16 }
 0x29c   : > { %1664 = vmatprep.mubr.msk.bf16.mxu0 %vm1856_vm0, %v1855_v0 }
 0x29f   : > { %1659 = vmatmul.mubr.msk.bf16.vlgmr.msra.gmra.mxu1 %vm213_vm1, %v520_v18 }
 0x2a0   : > { %1670 = vmatprep.mubr.msk.bf16.mxu1 %vm1856_vm0, %v1855_v0 }
 0x353   : > { %v1994_v19 = vpop.f32.mrf.mxu0 }
 0x355   : > { %v1642_v20 = vpop.f32.mrf.mxu0 }
 0x357   : > { %v1996_v23 = vpop.f32.mrf.mxu0  ;;  %v1998_v24 = vpop.f32.mrf.mxu1 }
 0x359   : > { %v1643_v25 = vpop.f32.mrf.mxu0  ;;  %v1648_v26 = vpop.f32.mrf.mxu1 }
 0x35b   : > { %v2000_v27 = vpop.f32.mrf.mxu1  ;;  %v512_v29 = vpop.f32.mrf.mxu0 }
 0x35c   : > { %v570_v30 = vmul.f32 0.35355338, %v512_v29 }
 0x35d   : > { %v1649_v32 = vpop.f32.mrf.mxu1  ;;  %v1654_v33 = vpop.f32.mrf.mxu0 }
 0x35e   : > { %v574_v34 = vadd.f32 %v570_v30, %v200_v28 }
 0x35f   : > { %v515_v36 = vpop.f32.mrf.mxu0  ;;  %v563_v37 = vpop.f32.mrf.mxu1 }
 0x360   : > { %v571_v38 = vmul.f32 0.35355338, %v515_v36  ;;  %v572_v39 = vmul.f32 0.35355338, %v563_v37  ;;  %v578_v40 = vadd.f32 %v574_v34, %v1945_v11 }
 0x361   : > { %v1655_v41 = vpop.f32.mrf.mxu0  ;;  %v1660_v42 = vpop.f32.mrf.mxu1 }
 0x362   : > { %v575_v43 = vadd.f32 %v571_v38, %v201_v35  ;;  %v576_v44 = vadd.f32 %v572_v39, %v200_v28  ;;  %v582_v45 = vsel %vm327_vm2, %v578_v40, -inf }
 0x363   : > { %583 = vmax.xlane.f32.xlu0 %v582_v45  ;;  %v566_v46 = vpop.f32.mrf.mxu1 }
 0x364   : > { %v573_v47 = vmul.f32 0.35355338, %v566_v46  ;;  %v579_v48 = vadd.f32 %v575_v43, %v1951_v21  ;;  %v580_v49 = vadd.f32 %v576_v44, %v1953_v22 }
 0x365   : > { %v1661_v50 = vpop.f32.mrf.mxu1 }
 0x366   : > { %v577_v51 = vadd.f32 %v573_v47, %v201_v35  ;;  %v585_v52 = vsel %vm327_vm2, %v579_v48, -inf  ;;  %v588_v53 = vsel %vm327_vm2, %v580_v49, -inf }
 0x367   : > { %586 = vmax.xlane.f32.xlu1 %v585_v52  ;;  %589 = vmax.xlane.f32.xlu0 %v588_v53  ;;  %v202_v53 = vld [vmem:[%s2190_s1 + $0x20] sm:$0xff] }
 0x368   : > { %v581_v54 = vadd.f32 %v577_v51, %v1958_v31 }
 0x36a   : > { %v591_v55 = vsel %vm327_vm2, %v581_v54, -inf }
 0x36b   : > { %592 = vmax.xlane.f32.xlu0 %v591_v55 }
 0x378   : > { %628 = vrot.lane.b32.xlu1 %v1916_v1, %s1861_s15 }
 0x3ec   : > { %v584_v56 = vpop.xlane.xlu0 %583 }
 0x3ed   : > { %v594_v57 = vsub.f32 %v578_v40, %v584_v56 }
 0x3ef   : > { %v598_v58 = vmul.f32 1.442695, %v594_v57 }
 0x3f0   : > { %v587_v59 = vpop.xlane.xlu1 %586  ;;  %v590_v60 = vpop.xlane.xlu0 %589 }
 0x3f1   : > { %1799 = vpow2.f32 %v598_v58  ;;  %v595_v61 = vsub.f32 %v579_v48, %v587_v59  ;;  %v596_v62 = vsub.f32 %v580_v49, %v590_v60  ;;  %v203_v60 = vld [vmem:[%s2190_s1 + $0x28] sm:$0xff] }
 0x3f3   : > { %v600_v63 = vmul.f32 1.442695, %v595_v61  ;;  %v602_v3 = vmul.f32 1.442695, %v596_v62 }
 0x3f4   : > { %v593_v4 = vpop.xlane.xlu0 %592  ;;  %v629_v5 = vpop.permute.xlu1 %628 }
 0x3f5   : > { %1801 = vpow2.f32 %v600_v63  ;;  %v597_v6 = vsub.f32 %v581_v54, %v593_v4  ;;  %1663 = vmatpush3.bf16.msra.mxu0 %v629_v5 }
 0x3f6   : > { %1803 = vpow2.f32 %v602_v3  ;;  %1674 = vmatprep.subr.bf16.mxu0 %v1855_v0 }
 0x3f7   : > { %v604_v7 = vmul.f32 1.442695, %v597_v6 }
 0x3f9   : > { %1805 = vpow2.f32 %v604_v7 }
 0x3fe   : > { %v1800_v8 = vpop.eup %1799 }
 0x3ff   : > { %v606_v9 = vsel %vm327_vm2, %v1800_v8, 0.0 }
 0x400   : > { %607 = vadd.xlane.f32.xlu1 %v606_v9 }
 0x402   : > { %v1802_v10 = vpop.eup %1801 }
 0x403   : > { %v1804_v12 = vpop.eup %1803  ;;  %v609_v13 = vsel %vm327_vm2, %v1802_v10, 0.0 }
 0x404   : > { %v612_v14 = vsel %vm327_vm2, %v1804_v12, 0.0  ;;  %610 = vadd.xlane.f32.xlu0 %v609_v13 }
 0x405   : > { %613 = vadd.xlane.f32.xlu1 %v612_v14 }
 0x406   : > { %v1806_v15 = vpop.eup %1805 }
 0x407   : > { %v615_v16 = vsel %vm327_vm2, %v1806_v15, 0.0 }
 0x408   : > { %616 = vadd.xlane.f32.xlu0 %v615_v16 }
 0x416   : > { %724 = vrot.lane.b32.xlu1 %v1916_v1, %s1862_s16 }
 0x41a   : > { %775 = vrot.lane.b32.xlu1 %v1920_v2, %s1862_s16 }
 0x41e   : > { %675 = vrot.lane.b32.xlu0 %v1920_v2, %s1861_s15  ;;  %773 = vrot.lane.b32.xlu1 %v1920_v2, %s1863_s17 }
 0x422   : > { %722 = vrot.lane.b32.xlu0 %v1916_v1, %s1863_s17 }
 0x489   : > { %v608_v17 = vpop.xlane.xlu1 %607 }
 0x48a   : > { %1807 = vrcp.f32 %v608_v17 }
 0x48d   : > { %v611_v18 = vpop.xlane.xlu0 %610 }
 0x48e   : > { %v614_v20 = vpop.xlane.xlu1 %613  ;;  %1809 = vrcp.f32 %v611_v18 }
 0x48f   : > { %1811 = vrcp.f32 %v614_v20 }
 0x491   : > { %v617_v25 = vpop.xlane.xlu0 %616 }
 0x492   : > { %1813 = vrcp.f32 %v617_v25  ;;  %v725_v29 = vpop.permute.xlu1 %724 }
 0x493   : > { %v730_v35 = vsel %vm213_vm1, %v725_v29, 0 }
 0x495   : > { %v676_v26 = vpop.permute.xlu0 %675 }
 0x496   : > { %1669 = vmatpush3.bf16.msra.mxu1 %v676_v26  ;;  %v776_v38 = vpop.permute.xlu1 %775 }
 0x497   : > { %1680 = vmatprep.subr.bf16.mxu1 %v1855_v0  ;;  %v1808_v28 = vpop.eup %1807  ;;  %v781_v41 = vsel %vm213_vm1, %v776_v38, 0 }
 0x498   : > { %v622_v32 = vmul.f32 %v1808_v28, %v1800_v8 }
 0x499   : > { %v723_v43 = vpop.permute.xlu0 %722 }
 0x49a   : > { %v774_v44 = vpop.permute.xlu1 %773 }
 0x49b   : > { %v1810_v30 = vpop.eup %1809 }
 0x49c   : > { %v623_v33 = vmul.f32 %v1810_v30, %v1802_v10  ;;  %v1812_v34 = vpop.eup %1811 }
 0x49d   : > { %v624_v39 = vmul.f32 %v1812_v34, %v1804_v12 }
 0x49e   : > { %v626_v36 = vpack.c.bf16 %v623_v33, %v622_v32 }
 0x49f   : > { %v1814_v37 = vpop.eup %1813 }
 0x4a0   : > { %1665 = vmatmul.mubr.msk.bf16.vlgmr.msra.gmra.mxu0 %vm327_vm2, %v626_v36  ;;  %v625_v40 = vmul.f32 %v1814_v37, %v1806_v15 }
 0x4a1   : > { %1675 = vmatpush3.bf16.xpose.msra.mxu0 %v730_v35  ;;  %1676 = vmatprep.mubr.msk.bf16.mxu0 %vm1856_vm0, %v1855_v0 }
 0x4a2   : > { %v627_v42 = vpack.c.bf16 %v625_v40, %v624_v39  ;;  %1686 = vmatprep.subr.bf16.mxu0 %v1855_v0 }
 0x4a4   : > { %1671 = vmatmul.mubr.msk.bf16.vlgmr.msra.gmra.mxu1 %vm327_vm2, %v627_v42 }
 0x4a5   : > { %1681 = vmatpush3.bf16.xpose.msra.mxu1 %v781_v41  ;;  %1682 = vmatprep.mubr.msk.bf16.mxu1 %vm1856_vm0, %v1855_v0 }
 0x4a6   : > { %1692 = vmatprep.subr.bf16.mxu1 %v1855_v0 }
 0x4a8   : > { %1677 = vmatmul.mubr.msk.bf16.vlgmr.msra.gmra.mxu0 %vm213_vm1, %v723_v43 }
 0x4a9   : > { %1688 = vmatprep.mubr.msk.bf16.mxu0 %vm1856_vm0, %v1855_v0 }
 0x4ac   : > { %1683 = vmatmul.mubr.msk.bf16.vlgmr.msra.gmra.mxu1 %vm213_vm1, %v774_v44 }
 0x4ad   : > { %1694 = vmatprep.mubr.msk.bf16.mxu1 %vm1856_vm0, %v1855_v0 }
 0x560   : > { %v2046_v45 = vpop.f32.mrf.mxu0 }
 0x562   : > { %v1666_v46 = vpop.f32.mrf.mxu0 }
 0x564   : > { %v2048_v47 = vpop.f32.mrf.mxu0  ;;  %v2050_v48 = vpop.f32.mrf.mxu1 }
 0x565   : > { %v1751_v49 = vpack.i.bf16 %v2048_v47, %v2046_v45 }
 0x566   : > { %v1667_v50 = vpop.f32.mrf.mxu0  ;;  %v1672_v51 = vpop.f32.mrf.mxu1 }
 0x568   : > { %v2054_v52 = vpop.f32.mrf.mxu1  ;;  %v766_v54 = vpop.f32.mrf.mxu0 }
 0x569   : > { %v1756_v55 = vpack.i.bf16 %v2054_v52, %v2050_v48  ;;  %v824_v56 = vmul.f32 0.35355338, %v766_v54 }
 0x56a   : > { %v1673_v57 = vpop.f32.mrf.mxu1  ;;  %v1678_v58 = vpop.f32.mrf.mxu0 }
 0x56b   : > { %v828_v59 = vadd.f32 %v824_v56, %v202_v53 }
 0x56c   : > { %v769_v61 = vpop.f32.mrf.mxu0  ;;  %v817_v62 = vpop.f32.mrf.mxu1 }
 0x56d   : > { %v825_v63 = vmul.f32 0.35355338, %v769_v61  ;;  %v826_v3 = vmul.f32 0.35355338, %v817_v62  ;;  %v832_v4 = vadd.f32 %v828_v59, %v1945_v11 }
 0x56e   : > { %v1679_v5 = vpop.f32.mrf.mxu0  ;;  %v1684_v6 = vpop.f32.mrf.mxu1 }
 0x56f   : > { %v829_v7 = vadd.f32 %v825_v63, %v203_v60  ;;  %v830_v8 = vadd.f32 %v826_v3, %v202_v53  ;;  %v836_v9 = vsel %vm327_vm2, %v832_v4, -inf }
 0x570   : > { %837 = vmax.xlane.f32.xlu0 %v836_v9  ;;  %v820_v10 = vpop.f32.mrf.mxu1 }
 0x571   : > { %v827_v12 = vmul.f32 0.35355338, %v820_v10  ;;  %v833_v13 = vadd.f32 %v829_v7, %v1951_v21  ;;  %v834_v14 = vadd.f32 %v830_v8, %v1953_v22 }
 0x572   : > { %v1685_v15 = vpop.f32.mrf.mxu1 }
 0x573   : > { %v831_v16 = vadd.f32 %v827_v12, %v203_v60  ;;  %v839_v17 = vsel %vm327_vm2, %v833_v13, -inf  ;;  %v842_v18 = vsel %vm327_vm2, %v834_v14, -inf }
 0x574   : > { %840 = vmax.xlane.f32.xlu1 %v839_v17  ;;  %843 = vmax.xlane.f32.xlu0 %v842_v18 }
 0x575   : > { %v835_v20 = vadd.f32 %v831_v16, %v1958_v31 }
 0x577   : > { %v845_v25 = vsel %vm327_vm2, %v835_v20, -inf }
 0x578   : > { %846 = vmax.xlane.f32.xlu0 %v845_v25 }
 0x585   : > { %882 = vrot.lane.b32.xlu1 %v1916_v1, %s1864_s23 }
 0x5f9   : > { %v838_v26 = vpop.xlane.xlu0 %837 }
 0x5fa   : > { %v848_v28 = vsub.f32 %v832_v4, %v838_v26 }
 0x5fc   : > { %v852_v29 = vmul.f32 1.442695, %v848_v28 }
 0x5fd   : > { %v841_v30 = vpop.xlane.xlu1 %840  ;;  %v844_v32 = vpop.xlane.xlu0 %843 }
 0x5fe   : > { %1815 = vpow2.f32 %v852_v29  ;;  %v849_v33 = vsub.f32 %v833_v13, %v841_v30  ;;  %v850_v34 = vsub.f32 %v834_v14, %v844_v32  ;;  %v204_v30 = vld [vmem:[%s2190_s1 + $0x30] sm:$0xff] }
 0x600   : > { %v854_v35 = vmul.f32 1.442695, %v849_v33  ;;  %v856_v36 = vmul.f32 1.442695, %v850_v34 }
 0x601   : > { %v847_v37 = vpop.xlane.xlu0 %846  ;;  %v883_v38 = vpop.permute.xlu1 %882 }
 0x602   : > { %1817 = vpow2.f32 %v854_v35  ;;  %v851_v39 = vsub.f32 %v835_v20, %v847_v37  ;;  %1687 = vmatpush3.bf16.msra.mxu0 %v883_v38  ;;  %v205_v37 = vld [vmem:[%s2190_s1 + $0x38] sm:$0xff] }
 0x603   : > { %1819 = vpow2.f32 %v856_v36  ;;  %1698 = vmatprep.subr.bf16.mxu0 %v1855_v0 }
 0x604   : > { %v858_v40 = vmul.f32 1.442695, %v851_v39 }
 0x606   : > { %1821 = vpow2.f32 %v858_v40 }
 0x60b   : > { %v1816_v41 = vpop.eup %1815 }
 0x60c   : > { %v860_v42 = vsel %vm327_vm2, %v1816_v41, 0.0 }
 0x60d   : > { %861 = vadd.xlane.f32.xlu1 %v860_v42 }
 0x60f   : > { %v1818_v43 = vpop.eup %1817 }
 0x610   : > { %v1820_v44 = vpop.eup %1819  ;;  %v863_v46 = vsel %vm327_vm2, %v1818_v43, 0.0 }
 0x611   : > { %v866_v50 = vsel %vm327_vm2, %v1820_v44, 0.0  ;;  %864 = vadd.xlane.f32.xlu0 %v863_v46 }
 0x612   : > { %867 = vadd.xlane.f32.xlu1 %v866_v50 }
 0x613   : > { %v1822_v51 = vpop.eup %1821 }
 0x614   : > { %v869_v53 = vsel %vm327_vm2, %v1822_v51, 0.0 }
 0x615   : > { %870 = vadd.xlane.f32.xlu0 %v869_v53 }
 0x623   : > { %978 = vrot.lane.b32.xlu1 %v1916_v1, %s1865_s24 }
 0x627   : > { %1029 = vrot.lane.b32.xlu1 %v1920_v2, %s1865_s24 }
 0x62b   : > { %929 = vrot.lane.b32.xlu0 %v1920_v2, %s1864_s23  ;;  %1027 = vrot.lane.b32.xlu1 %v1920_v2, %s1866_s25 }
 0x62f   : > { %976 = vrot.lane.b32.xlu0 %v1916_v1, %s1866_s25 }
 0x696   : > { %v862_v54 = vpop.xlane.xlu1 %861 }
 0x697   : > { %1823 = vrcp.f32 %v862_v54 }
 0x69a   : > { %v865_v56 = vpop.xlane.xlu0 %864 }
 0x69b   : > { %v868_v57 = vpop.xlane.xlu1 %867  ;;  %1825 = vrcp.f32 %v865_v56 }
 0x69c   : > { %1827 = vrcp.f32 %v868_v57 }
 0x69e   : > { %v871_v58 = vpop.xlane.xlu0 %870 }
 0x69f   : > { %1829 = vrcp.f32 %v871_v58  ;;  %v979_v61 = vpop.permute.xlu1 %978 }
 0x6a0   : > { %v984_v5 = vsel %vm213_vm1, %v979_v61, 0 }
 0x6a2   : > { %v930_v59 = vpop.permute.xlu0 %929 }
 0x6a3   : > { %1693 = vmatpush3.bf16.msra.mxu1 %v930_v59  ;;  %v1030_v8 = vpop.permute.xlu1 %1029 }
 0x6a4   : > { %1704 = vmatprep.subr.bf16.mxu1 %v1855_v0  ;;  %v1824_v60 = vpop.eup %1823  ;;  %v1035_v12 = vsel %vm213_vm1, %v1030_v8, 0 }
 0x6a5   : > { %v876_v63 = vmul.f32 %v1824_v60, %v1816_v41 }
 0x6a6   : > { %v977_v14 = vpop.permute.xlu0 %976 }
 0x6a7   : > { %v1028_v15 = vpop.permute.xlu1 %1027 }
 0x6a8   : > { %v1826_v62 = vpop.eup %1825 }
 0x6a9   : > { %v877_v3 = vmul.f32 %v1826_v62, %v1818_v43  ;;  %v1828_v4 = vpop.eup %1827 }
 0x6aa   : > { %v878_v9 = vmul.f32 %v1828_v4, %v1820_v44 }
 0x6ab   : > { %v880_v6 = vpack.c.bf16 %v877_v3, %v876_v63 }
 0x6ac   : > { %v1830_v7 = vpop.eup %1829 }
 0x6ad   : > { %1689 = vmatmul.mubr.msk.bf16.vlgmr.msra.gmra.mxu0 %vm327_vm2, %v880_v6  ;;  %v879_v10 = vmul.f32 %v1830_v7, %v1822_v51 }
 0x6ae   : > { %1699 = vmatpush3.bf16.xpose.msra.mxu0 %v984_v5  ;;  %1700 = vmatprep.mubr.msk.bf16.mxu0 %vm1856_vm0, %v1855_v0 }
 0x6af   : > { %v881_v13 = vpack.c.bf16 %v879_v10, %v878_v9  ;;  %1710 = vmatprep.subr.bf16.mxu0 %v1855_v0 }
 0x6b1   : > { %1695 = vmatmul.mubr.msk.bf16.vlgmr.msra.gmra.mxu1 %vm327_vm2, %v881_v13 }
 0x6b2   : > { %1705 = vmatpush3.bf16.xpose.msra.mxu1 %v1035_v12  ;;  %1706 = vmatprep.mubr.msk.bf16.mxu1 %vm1856_vm0, %v1855_v0 }
 0x6b3   : > { %1716 = vmatprep.subr.bf16.mxu1 %v1855_v0 }
 0x6b5   : > { %1701 = vmatmul.mubr.msk.bf16.vlgmr.msra.gmra.mxu0 %vm213_vm1, %v977_v14 }
 0x6b6   : > { %1712 = vmatprep.mubr.msk.bf16.mxu0 %vm1856_vm0, %v1855_v0 }
 0x6b9   : > { %1707 = vmatmul.mubr.msk.bf16.vlgmr.msra.gmra.mxu1 %vm213_vm1, %v1028_v15 }
 0x6ba   : > { %1718 = vmatprep.mubr.msk.bf16.mxu1 %vm1856_vm0, %v1855_v0 }
 0x76d   : > { %v2102_v16 = vpop.f32.mrf.mxu0 }
 0x76f   : > { %v1690_v17 = vpop.f32.mrf.mxu0 }
 0x771   : > { %v2104_v18 = vpop.f32.mrf.mxu0  ;;  %v2106_v20 = vpop.f32.mrf.mxu1 }
 0x772   : > { %v1761_v25 = vpack.i.bf16 %v2104_v18, %v2102_v16 }
 0x773   : > { %v1691_v26 = vpop.f32.mrf.mxu0  ;;  %v1696_v28 = vpop.f32.mrf.mxu1 }
 0x775   : > { %v2110_v29 = vpop.f32.mrf.mxu1  ;;  %v1020_v32 = vpop.f32.mrf.mxu0 }
 0x776   : > { %v1766_v0 = vpack.i.bf16 %v2110_v29, %v2106_v20  ;;  %v1078_v33 = vmul.f32 0.35355338, %v1020_v32 }
 0x777   : > { %v1697_v34 = vpop.f32.mrf.mxu1  ;;  %v1702_v35 = vpop.f32.mrf.mxu0 }
 0x778   : > { %v1082_v36 = vadd.f32 %v1078_v33, %v204_v30 }
 0x779   : > { %v1023_v38 = vpop.f32.mrf.mxu0  ;;  %v1071_v39 = vpop.f32.mrf.mxu1 }
 0x77a   : > { %v1079_v40 = vmul.f32 0.35355338, %v1023_v38  ;;  %v1080_v41 = vmul.f32 0.35355338, %v1071_v39  ;;  %v1086_v42 = vadd.f32 %v1082_v36, %v1945_v11 }
 0x77b   : > { %v1703_v43 = vpop.f32.mrf.mxu0  ;;  %v1708_v44 = vpop.f32.mrf.mxu1 }
 0x77c   : > { %v1083_v46 = vadd.f32 %v1079_v40, %v205_v37  ;;  %v1084_v50 = vadd.f32 %v1080_v41, %v204_v30  ;;  %v1090_v51 = vsel %vm327_vm2, %v1086_v42, -inf }
 0x77d   : > { %1091 = vmax.xlane.f32.xlu0 %v1090_v51  ;;  %v1074_v53 = vpop.f32.mrf.mxu1 }
 0x77e   : > { %v1081_v54 = vmul.f32 0.35355338, %v1074_v53  ;;  %v1087_v56 = vadd.f32 %v1083_v46, %v1951_v21  ;;  %v1088_v57 = vadd.f32 %v1084_v50, %v1953_v22 }
 0x77f   : > { %v1709_v58 = vpop.f32.mrf.mxu1 }
 0x780   : > { %v1085_v59 = vadd.f32 %v1081_v54, %v205_v37  ;;  %v1093_v60 = vsel %vm327_vm2, %v1087_v56, -inf  ;;  %v1096_v61 = vsel %vm327_vm2, %v1088_v57, -inf }
 0x781   : > { %1094 = vmax.xlane.f32.xlu1 %v1093_v60  ;;  %1097 = vmax.xlane.f32.xlu0 %v1096_v61 }
 0x782   : > { %v1089_v11 = vadd.f32 %v1085_v59, %v1958_v31 }
 0x784   : > { %v1099_v62 = vsel %vm327_vm2, %v1089_v11, -inf }
 0x785   : > { %1100 = vmax.xlane.f32.xlu0 %v1099_v62 }
 0x806   : > { %v1092_v63 = vpop.xlane.xlu0 %1091 }
 0x807   : > { %v1102_v3 = vsub.f32 %v1086_v42, %v1092_v63  ;;  %v1311_v63 = vlaneseq }
 0x809   : > { %v1106_v4 = vmul.f32 1.442695, %v1102_v3 }
 0x80a   : > { %v1095_v5 = vpop.xlane.xlu1 %1094  ;;  %v1098_v21 = vpop.xlane.xlu0 %1097 }
 0x80b   : > { %1831 = vpow2.f32 %v1106_v4  ;;  %v1103_v22 = vsub.f32 %v1087_v56, %v1095_v5  ;;  %v1104_v6 = vsub.f32 %v1088_v57, %v1098_v21 }
 0x80d   : > { %v1108_v7 = vmul.f32 1.442695, %v1103_v22  ;;  %v1110_v8 = vmul.f32 1.442695, %v1104_v6 }
 0x80e   : > { %v1101_v9 = vpop.xlane.xlu0 %1100 }
 0x80f   : > { %1833 = vpow2.f32 %v1108_v7  ;;  %v1105_v10 = vsub.f32 %v1089_v11, %v1101_v9  ;;  %v1871_v11 = vmov 1983009808  }
 0x810   : > { %1835 = vpow2.f32 %v1110_v8  ;;  %v1309_v62 = vunpack.c.l.s4 %v1871_v11 }
 0x811   : > { %v1112_v12 = vmul.f32 1.442695, %v1105_v10  ;;  %v2156_v10 = vshrl.u32 %v1311_v63, 7 }
 0x812   : > { %v1310_v9 = vunpack.c.0.s8 %v1309_v62 }
 0x813   : > { %1837 = vpow2.f32 %v1112_v12  ;;  %v1872_v12 = vmov 1934713408  }
 0x818   : > { %v1832_v31 = vpop.eup %1831 }
 0x819   : > { %v1114_v13 = vsel %vm327_vm2, %v1832_v31, 0.0 }
 0x81a   : > { %1115 = vadd.xlane.f32.xlu1 %v1114_v13 }
 0x81c   : > { %v1834_v14 = vpop.eup %1833 }
 0x81d   : > { %v1836_v15 = vpop.eup %1835  ;;  %v1117_v17 = vsel %vm327_vm2, %v1834_v14, 0.0 }
 0x81e   : > { %v1120_v26 = vsel %vm327_vm2, %v1836_v15, 0.0  ;;  %1118 = vadd.xlane.f32.xlu0 %v1117_v17 }
 0x81f   : > { %1121 = vadd.xlane.f32.xlu1 %v1120_v26 }
 0x820   : > { %v1838_v28 = vpop.eup %1837 }
 0x821   : > { %v1123_v30 = vsel %vm327_vm2, %v1838_v28, 0.0 }
 0x822   : > { %1124 = vadd.xlane.f32.xlu0 %v1123_v30 }
 0x830   : > { %1136 = vrot.lane.b32.xlu1 %v1916_v1, %s1867_s30 }
 0x834   : > { %1752 = vrot.lane.b32.xlu1 %v1751_v49, %s1868_s4 }
 0x838   : > { %1757 = vrot.lane.b32.xlu1 %v1756_v55, %s1868_s4  ;;  %1183 = vrot.lane.b32.xlu0 %v1920_v2, %s1867_s30 }
 0x83c   : > { %1767 = vrot.lane.b32.xlu1 %v1766_v0, %s1869_s5  ;;  %1762 = vrot.lane.b32.xlu0 %v1761_v25, %s1869_s5 }
 0x8a3   : > { %v1116_v1 = vpop.xlane.xlu1 %1115 }
 0x8a4   : > { %1839 = vrcp.f32 %v1116_v1 }
 0x8a7   : > { %v1119_v32 = vpop.xlane.xlu0 %1118 }
 0x8a8   : > { %v1122_v45 = vpop.xlane.xlu1 %1121  ;;  %1841 = vrcp.f32 %v1119_v32 }
 0x8a9   : > { %1843 = vrcp.f32 %v1122_v45 }
 0x8ab   : > { %v1125_v47 = vpop.xlane.xlu0 %1124 }
 0x8ac   : > { %v1137_v48 = vpop.permute.xlu1 %1136  ;;  %1845 = vrcp.f32 %v1125_v47  ;;  %v1313_v47 = vsub.s32 %v1310_v9, %v2156_v10 }
 0x8ad   : > { %1711 = vmatpush3.bf16.msra.mxu0 %v1137_v48 }
 0x8af   : > { %v1184_v2 = vpop.permute.xlu0 %1183 }
 0x8b0   : > { %1717 = vmatpush3.bf16.msra.mxu1 %v1184_v2  ;;  %v1753_v44 = vpop.permute.xlu1 %1752 }
 0x8b1   : > { %v1840_v49 = vpop.eup %1839  ;;  %v1755_v50 = vunpack.i.h.bf16 %v1753_v44  ;;  %v1754_v51 = vunpack.i.l.bf16 %v1753_v44 }
 0x8b2   : > { %v1130_v55 = vmul.f32 %v1840_v49, %v1832_v31  ;;  %v1324_v31 = vunpack.c.l.s4 %v1872_v12 }
 0x8b3   : > { %v1763_v53 = vpop.permute.xlu0 %1762  ;;  %v1279_v57 = vsel %vm213_vm1, %v1996_v23, %v1755_v50  ;;  %v1278_v58 = vsel %vm213_vm1, %v1994_v19, %v1754_v51 }
 0x8b4   : > { %v1758_v46 = vpop.permute.xlu1 %1757  ;;  %v1765_v54 = vunpack.i.h.bf16 %v1763_v53  ;;  %v1764_v56 = vunpack.i.l.bf16 %v1763_v53  ;;  %v1325_v48 = vunpack.c.0.s8 %v1324_v31 }
 0x8b5   : > { %v1842_v52 = vpop.eup %1841  ;;  %v1760_v60 = vunpack.i.h.bf16 %v1758_v46  ;;  %v1759_v3 = vunpack.i.l.bf16 %v1758_v46 }
 0x8b6   : > { %v1131_v20 = vmul.f32 %v1842_v52, %v1834_v14  ;;  %v1844_v29 = vpop.eup %1843  ;;  %v1283_v21 = vsel %vm327_vm2, %v1279_v57, %v1765_v54  ;;  %v1282_v22 = vsel %vm327_vm2, %v1278_v58, %v1764_v56  ;;  %v1873_v52 = vmov 0  }
 0x8b7   : > { %v1132_v18 = vmul.f32 %v1844_v29, %v1836_v15  ;;  %v1281_v13 = vsel %vm213_vm1, %v2000_v27, %v1760_v60  ;;  %v1280_v14 = vsel %vm213_vm1, %v1998_v24, %v1759_v3  ;;  %v1302_v24 = vpack.i.b16 %v1873_v52, %v1873_v52 }
 0x8b8   : > { %v1134_v0 = vpack.c.bf16 %v1131_v20, %v1130_v55  ;;  %v1768_v59 = vpop.permute.xlu1 %1767  ;;  %v1328_v20 = vsub.s32 %v1325_v48, %v2156_v10 }
 0x8b9   : > { %v1846_v16 = vpop.eup %1845  ;;  %v1770_v6 = vunpack.i.h.bf16 %v1768_v59  ;;  %v1769_v7 = vunpack.i.l.bf16 %v1768_v59 }
 0x8ba   : > { %1713 = vmatmul.mubr.msk.bf16.vlgmr.msra.gmra.mxu0 %vm327_vm2, %v1134_v0  ;;  %v1133_v25 = vmul.f32 %v1846_v16, %v1838_v28 }
 0x8bb   : > { %v1284_v26 = vsel %vm327_vm2, %v1280_v14, %v1769_v7  ;;  %v1285_v28 = vsel %vm327_vm2, %v1281_v13, %v1770_v6 }
 0x8bc   : > { %v1135_v33 = vpack.c.bf16 %v1133_v25, %v1132_v18 }
 0x8be   : > { %1719 = vmatmul.mubr.msk.bf16.vlgmr.msra.gmra.mxu1 %vm327_vm2, %v1135_v33 }
 0x97a   : > { %v1176_v34 = vpop.f32.mrf.mxu0 }
 0x97c   : > { %v1714_v35 = vpop.f32.mrf.mxu0 }
 0x97e   : > { %v1179_v36 = vpop.f32.mrf.mxu0  ;;  %v1223_v37 = vpop.f32.mrf.mxu1 }
 0x97f   : > { %v1771_v38 = vpack.i.bf16 %v1179_v36, %v1176_v34 }
 0x980   : > { %v1715_v39 = vpop.f32.mrf.mxu0  ;;  %v1720_v40 = vpop.f32.mrf.mxu1 }
 0x981   : > { %1772 = vrot.lane.b32.xlu0 %v1771_v38, %s1870_s7 }
 0x982   : > { %v1226_v41 = vpop.f32.mrf.mxu1 }
 0x983   : > { %v1776_v42 = vpack.i.bf16 %v1226_v41, %v1223_v37 }
 0x984   : > { %v1721_v43 = vpop.f32.mrf.mxu1 }
 0x985   : > { %1777 = vrot.lane.b32.xlu1 %v1776_v42, %s1870_s7 }
 0x9f3   : > { %v1773_v61 = vpop.permute.xlu0 %1772 }
 0x9f4   : > { %v1775_v4 = vunpack.i.h.bf16 %v1773_v61  ;;  %v1774_v5 = vunpack.i.l.bf16 %v1773_v61 }
 0x9f6   : > { %v1287_v23 = vsel %vm1286_vm3, %v1282_v22, %v1774_v5  ;;  %v1288_v19 = vsel %vm1286_vm3, %v1283_v21, %v1775_v4  ;;  %v1875_v21 = vmov 1966171168  }
 0x9f7   : > { %v1778_v8 = vpop.permute.xlu1 %1777  ;;  %v1291_v30 = vpack.c.bf16 %v1288_v19, %v1287_v23  ;;  %v1479_v22 = vunpack.c.l.s4 %v1875_v21 }
 0x9f8   : > { %v1780_v15 = vunpack.i.h.bf16 %v1778_v8  ;;  %v1779_v17 = vunpack.i.l.bf16 %v1778_v8 }
 0x9f9   : > { %v1297_v2 = vshrl.u32 %v1291_v30, 16  ;;  %v1480_v19 = vunpack.c.0.s8 %v1479_v22 }
 0x9fa   : > { %v1290_v1 = vsel %vm1286_vm3, %v1285_v28, %v1780_v15  ;;  %v1289_v32 = vsel %vm1286_vm3, %v1284_v26, %v1779_v17 }
 0x9fb   : > { %v1292_v45 = vpack.c.bf16 %v1290_v1, %v1289_v32 }
 0x9fd   : > { %v1295_v27 = vpack.i.b16 %v1292_v45, %v1291_v30  ;;  %v1298_v49 = vshrl.u32 %v1292_v45, 16  ;;  %v1483_v30 = vsub.s32 %v1480_v19, %v2156_v10 }
 0x9ff   : > { %v1299_v55 = vpack.i.b16 %v1298_v49, %v1297_v2  ;;  %v1314_v29 = vrot.slane %v1295_v27, %v1313_v47  ;;  %v1307_v25 = vcombine.high %v1295_v27, %v1302_v24 }
 0xa01   : > { %v1363_v0 = vrot.slane %v1299_v55, %v1313_v47  ;;  %v1322_v16 = vcombine.high %v1314_v29, %v1873_v52  ;;  %v1356_v18 = vcombine.high %v1299_v55, %v1302_v24  ;;  %v1329_v35 = vrot.slane %v1314_v29, %v1328_v20 }
 0xa02   : > { %v1321_v39 = vrot.slane %v1307_v25, %v1313_v47 }
 0xa03   : > { %v1378_v33 = vrot.slane %v1363_v0, %v1328_v20  ;;  %v1371_v34 = vcombine.high %v1363_v0, %v1873_v52  ;;  %v1336_v37 = vrot.slane %v1322_v16, %v1328_v20  ;;  %v1370_v38 = vrot.slane %v1356_v18, %v1313_v47 }
 0xa04   : > { %v1352_v40 = vcombine.high %v1329_v35, %v1873_v52  ;;  %v1337_v43 = vcombine.high %v1321_v39, %v1873_v52  ;;  %v1344_v46 = vrot.slane %v1321_v39, %v1328_v20 }
 0xa05   : > { %1406 = vrot.lane.b32.xlu0 %v1378_v33, %s1874_s8  ;;  %v1385_v36 = vrot.slane %v1371_v34, %v1328_v20  ;;  %v1353_v41 = vcombine.high %v1336_v37, %v1873_v52  ;;  %v1386_v42 = vcombine.high %v1370_v38, %v1873_v52  ;;  %v1393_v44 = vrot.slane %v1370_v38, %v1328_v20 }
 0xa06   : > { %v1351_v51 = vrot.slane %v1337_v43, %v1328_v20  ;;  %v1354_v53 = vcombine.high %v1344_v46, %v1873_v52  ;;  %v1401_v56 = vcombine.high %v1378_v33, %v1873_v52 }
 0xa07   : > { %1415 = vrot.lane.b32.xlu1 %v1385_v36, %s1874_s8  ;;  %v1400_v50 = vrot.slane %v1386_v42, %v1328_v20  ;;  %v1402_v57 = vcombine.high %v1385_v36, %v1873_v52  ;;  %v1403_v58 = vcombine.high %v1393_v44, %v1873_v52 }
 0xa08   : > { %v1355_v54 = vcombine.high %v1351_v51, %v1873_v52 }
 0xa09   : > { %1409 = vrot.lane.b32.xlu0 %v1352_v40, %s1858_s6  ;;  %v1404_v59 = vcombine.high %v1400_v50, %v1873_v52 }
 0xa0b   : > { %1418 = vrot.lane.b32.xlu1 %v1353_v41, %s1858_s6 }
 0xa0d   : > { %1424 = vrot.lane.b32.xlu0 %v1393_v44, %s1874_s8 }
 0xa0f   : > { %1433 = vrot.lane.b32.xlu1 %v1400_v50, %s1874_s8 }
 0xa11   : > { %1427 = vrot.lane.b32.xlu0 %v1354_v53, %s1858_s6 }
 0xa13   : > { %1436 = vrot.lane.b32.xlu1 %v1355_v54, %s1858_s6 }
 0xa15   : > { %1412 = vrot.lane.b32.xlu0 %v1401_v56, %s1857_s19 }
 0xa17   : > { %1421 = vrot.lane.b32.xlu1 %v1402_v57, %s1857_s19 }
 0xa19   : > { %1430 = vrot.lane.b32.xlu0 %v1403_v58, %s1857_s19 }
 0xa1b   : > { %1439 = vrot.lane.b32.xlu1 %v1404_v59, %s1857_s19  ;;  %s1565_s19 = sshll.u32 %s2200_s13, 2 }
 0xa1c   : > { %s173_s10 = scalar_lea.vmem %s2192_s3, %s1565_s19 }
 0xa77   : > { %v1407_v60 = vpop.permute.xlu0 %1406 }
 0xa78   : > { %v1444_v9 = vsel %vm1441_vm4, %v1329_v35, %v1407_v60 }
 0xa79   : > { %v1416_v61 = vpop.permute.xlu1 %1415 }
 0xa7a   : > { %v1453_v7 = vsel %vm1441_vm4, %v1336_v37, %v1416_v61 }
 0xa7b   : > { %v1410_v11 = vpop.permute.xlu0 %1409 }
 0xa7c   : > { %v1447_v31 = vsel %vm1445_vm5, %v1444_v9, %v1410_v11 }
 0xa7d   : > { %v1419_v62 = vpop.permute.xlu1 %1418 }
 0xa7e   : > { %v1455_v23 = vsel %vm1445_vm5, %v1453_v7, %v1419_v62 }
 0xa7f   : > { %v1425_v63 = vpop.permute.xlu0 %1424 }
 0xa80   : > { %v1460_v14 = vsel %vm1441_vm4, %v1344_v46, %v1425_v63 }
 0xa81   : > { %v1434_v3 = vpop.permute.xlu1 %1433 }
 0xa82   : > { %v1467_v15 = vsel %vm1441_vm4, %v1351_v51, %v1434_v3 }
 0xa83   : > { %v1428_v4 = vpop.permute.xlu0 %1427 }
 0xa84   : > { %v1462_v26 = vsel %vm1445_vm5, %v1460_v14, %v1428_v4 }
 0xa85   : > { %v1437_v5 = vpop.permute.xlu1 %1436 }
 0xa86   : > { %v1469_v28 = vsel %vm1445_vm5, %v1467_v15, %v1437_v5 }
 0xa87   : > { %v1413_v6 = vpop.permute.xlu0 %1412 }
 0xa88   : > { %v1450_v17 = vsel %vm1448_vm6, %v1447_v31, %v1413_v6 }
 0xa89   : > { %v1422_v8 = vpop.permute.xlu1 %1421 }
 0xa8a   : > { %v1457_v12 = vsel %vm1448_vm6, %v1455_v23, %v1422_v8 }
 0xa8b   : > { %v1431_v13 = vpop.permute.xlu0 %1430  ;;  %v1476_v1 = vcombine.low %v1450_v17, %v1457_v12 }
 0xa8c   : > { %v1464_v45 = vsel %vm1448_vm6, %v1462_v26, %v1431_v13 }
 0xa8d   : > { %v1440_v32 = vpop.permute.xlu1 %1439  ;;  %v1484_v2 = vrot.slane %v1476_v1, %v1483_v30 }
 0xa8e   : > { %v1471_v47 = vsel %vm1448_vm6, %v1469_v28, %v1440_v32 }
 0xa8f   : > { %v1477_v48 = vcombine.low %v1464_v45, %v1471_v47 }
 0xa91   : > { %v1491_v27 = vrot.slane %v1477_v48, %v1483_v30 }
 0xa93   : > { %v1492_v49 = vcombine.low %v1484_v2, %v1491_v27 }
 0xa95   : > { %1589 = vst.sshfl [vmem:[%s173_s10] sm:$0x55 pattern:$0x73625140] %v1492_v49 }
 0xa96 PF: > { %s13_s12 = sadd.s32 1, %s1853_s12  }
 0xa97   : > { %p10_p7 = scmp.ge.s32.totalorder %s13_s12, 6  }
 0xa99   :  { %12 = sbr.rel (!%p10_p7) target bundleno = 1 (0x1), region = 63 }

</bundles_post_ra>
